<compile_context>
chip_gen: v6e
topology: v6e:2x2x1
jax: 0.10.0
libtpu: 0.0.40
codegen_flags: <defaults>
</compile_context>

<pallas_src>
import functools

import jax
import jax.numpy as jnp
from jax.experimental import pallas as pl
from jax.experimental.pallas import tpu as pltpu

_EPS = 1e-5
_INV_SQRT2 = 0.7071067811865476
_HIGHEST = jax.lax.Precision.HIGHEST


def _gelu(x):
    # PyTorch nn.GELU / F.gelu default = exact erf formulation.
    return 0.5 * x * (1.0 + jax.lax.erf(x * _INV_SQRT2))


def _round_up(x, m):
    return (x + m - 1) // m * m


# ----------------------------- fused kernel --------------------------------


def _up_fused_kernel(x1_ref, x2_ref, up_ref, msk_ref,
                     w1a_ref, w1b_ref, w2a_ref, w2b_ref, pp_ref,
                     o_ref, *, H, W, c_inp, c_midp, c_out,
                     n_in, n_mid, n_out):
    HW = H * W

    # Boundary masks (0/1 floats, (1, HW) each): valid where the source
    # column/row of the corresponding 3x3 tap is in bounds.
    lm = msk_ref[0:1, :]          # source col-1 in-bounds
    rm = msk_ref[1:2, :]          # source col+1 in-bounds
    tm = msk_ref[2:3, :]          # source row-1 in-bounds
    bm = msk_ref[3:4, :]          # source row+1 in-bounds

    def conv3x3(x, w_ref):
        # x: (cpad, HW) with cpad % 8 == 0.  Build 3 masked column variants
        # once, derive the 9 taps with +/-W row rolls (XLU), concatenate
        # (sublane-aligned, stays in registers) and contract in one MXU
        # matmul (Cout, 9*cpad) x (9*cpad, HW).
        cols = (pltpu.roll(x, shift=1, axis=1) * lm,         # src col-1 (kx=0)
                x,                                            # src col   (kx=1)
                pltpu.roll(x, shift=HW - 1, axis=1) * rm)     # src col+1 (kx=2)
        taps = []
        for ky in range(3):
            for kx in range(3):
                v = cols[kx]
                if ky == 0:
                    v = pltpu.roll(v, shift=W, axis=1) * tm        # src row-1
                elif ky == 2:
                    v = pltpu.roll(v, shift=HW - W, axis=1) * bm   # src row+1
                taps.append(v)
        patch = jnp.concatenate(taps, axis=0)                 # (9*cpad, HW)
        return jnp.dot(w_ref[...], patch,
                       preferred_element_type=jnp.float32, precision=_HIGHEST)

    def groupnorm1(y, g, b, count):
        # nn.GroupNorm(1, C): normalize over the whole sample.  Two
        # independent reductions; zero-padded channel rows contribute 0 to
        # both sums, so `count` is the REAL element count.
        inv = 1.0 / count
        s1 = jnp.sum(y)
        s2 = jnp.sum(y * y)
        mean = s1 * inv
        var = s2 * inv - mean * mean
        return (y - mean) * jax.lax.rsqrt(var + _EPS) * g + b

    # Bilinear x2 upsample (align_corners=True) + F.pad of x1 as one MXU
    # matmul; torch.cat([x2, up(x1)], dim=1) is fused as an add of
    # channel-disjoint zero-padded operands (no VMEM round trip).
    xin = x2_ref[0] + jnp.dot(x1_ref[0], up_ref[...],
                              preferred_element_type=jnp.float32,
                              precision=_HIGHEST)              # (c_inp, HW)

    # DoubleConv(c_in, c_in, residual=True)
    h = _gelu(groupnorm1(conv3x3(xin, w1a_ref),
                         pp_ref[0:c_inp, 0:1], pp_ref[0:c_inp, 1:2],
                         n_in * HW))
    h = groupnorm1(conv3x3(h, w1b_ref),
                   pp_ref[0:c_inp, 2:3], pp_ref[0:c_inp, 3:4], n_in * HW)
    h = _gelu(xin + h)                      # residual path (Cin == Cout here)

    # DoubleConv(c_in, c_out, mid_channels=c_in // 2).  conv2a's output is
    # zero-padded up to c_midp channels via zero weight rows + zero gamma/beta
    # so the next im2col stays 8-row aligned and exact.
    h = _gelu(groupnorm1(conv3x3(h, w2a_ref),
                         pp_ref[0:c_midp, 4:5], pp_ref[0:c_midp, 5:6],
                         n_mid * HW))
    h = groupnorm1(conv3x3(h, w2b_ref),
                   pp_ref[0:c_out, 6:7], pp_ref[0:c_out, 7:8], n_out * HW)

    o_ref[0] = h.astype(o_ref.dtype)


# --------------------------- wrapper / plumbing -----------------------------


def _interp_matrix(n_in, n_out):
    """(n_out, n_in) bilinear interpolation matrix, align_corners=True."""
    if n_in == 1:
        return jnp.ones((n_out, 1), jnp.float32)
    src = jnp.arange(n_out, dtype=jnp.float32) * (n_in - 1) / (n_out - 1)
    i0 = jnp.clip(jnp.floor(src).astype(jnp.int32), 0, n_in - 2)
    f = src - i0.astype(jnp.float32)
    e0 = jax.nn.one_hot(i0, n_in, dtype=jnp.float32)
    e1 = jax.nn.one_hot(i0 + 1, n_in, dtype=jnp.float32)
    return e0 * (1.0 - f)[:, None] + e1 * f[:, None]


def _pad_rows(m, before, after):
    """Zero-pad (or crop, for negative pads) along axis 0; exact, no matmul."""
    if before < 0:
        m, before = m[-before:], 0
    if after < 0:
        m, after = m[:m.shape[0] + after], 0
    return jnp.pad(m, ((before, after), (0, 0)))


def _im2col_weight(w, cin_pad, cout_pad):
    """HWIO (3,3,cin,cout) -> (cout_pad, 9*cin_pad) with exact zero padding."""
    kh, kw, cin, cout = w.shape
    w = jnp.pad(w.astype(jnp.float32),
                ((0, 0), (0, 0), (0, cin_pad - cin), (0, cout_pad - cout)))
    return jnp.transpose(w, (3, 0, 1, 2)).reshape(cout_pad, kh * kw * cin_pad)


def _pack_affine(p1, p2, c_max):
    """Pack the 8 gamma/beta vectors into one (c_max, 8) array (single DMA)."""
    cols = [p1["g1"], p1["b1"], p1["g2"], p1["b2"],
            p2["g1"], p2["b1"], p2["g2"], p2["b2"]]
    cols = [jnp.pad(jnp.asarray(c, jnp.float32), (0, c_max - c.shape[0]))
            for c in cols]
    return jnp.stack(cols, axis=1)


def up_forward(x1_nchw, x2_nchw, params):
    """Reproduces Up.forward (bilinear=True).  Inputs/outputs are NCHW."""
    N, c_low, h, w = x1_nchw.shape
    _, c_skip, H, W = x2_nchw.shape
    HW = H * W
    c_in = c_skip + c_low
    c_mid = params["conv2"]["w1"].shape[-1]
    c_out = params["conv2"]["w2"].shape[-1]
    c_inp = _round_up(c_in, 8)          # in-kernel channel widths, 8-aligned
    c_midp = _round_up(c_mid, 8)

    # Combined (bilinear x2, align_corners=True) + F.pad operator on the
    # flattened spatial axis: x1_up = x1_flat @ up_t, up_t: (h*w, H*W).
    diff_y, diff_x = H - 2 * h, W - 2 * w
    a_h = _pad_rows(_interp_matrix(h, 2 * h), diff_y // 2, diff_y - diff_y // 2)
    a_w = _pad_rows(_interp_matrix(w, 2 * w), diff_x // 2, diff_x - diff_x // 2)
    up_t = (a_h[:, None, :, None] * a_w[None, :, None, :]).reshape(HW, h * w).T

    # Boundary masks for the 3x3 taps: left/right/top/bottom, shape (4, HW).
    col = jnp.arange(HW, dtype=jnp.int32) % W
    row = jnp.arange(HW, dtype=jnp.int32) // W
    masks = jnp.stack([(col >= 1), (col <= W - 2),
                       (row >= 1), (row <= H - 2)]).astype(jnp.float32)

    # Channel-disjoint zero-padded inputs so the in-kernel concat is an add:
    #   rows [0, c_skip)     <- x2
    #   rows [c_skip, c_in)  <- x1 (upsampled in-kernel)
    #   rows [c_in, c_inp)   <- 0
    x1f = x1_nchw.reshape(N, c_low, h * w).astype(jnp.float32)
    x1p = jnp.pad(x1f, ((0, 0), (c_skip, c_inp - c_skip - c_low), (0, 0)))
    x2f = x2_nchw.reshape(N, c_skip, HW).astype(jnp.float32)
    x2p = jnp.pad(x2f, ((0, 0), (0, c_inp - c_skip), (0, 0)))

    p1, p2 = params["conv"], params["conv2"]
    w1a = _im2col_weight(p1["w1"], c_inp, c_inp)
    w1b = _im2col_weight(p1["w2"], c_inp, c_inp)
    w2a = _im2col_weight(p2["w1"], c_inp, c_midp)   # cout rows zero-padded
    w2b = _im2col_weight(p2["w2"], c_midp, c_out)   # cin cols zero-padded
    pp = _pack_affine(p1, p2, max(c_inp, c_midp))

    args = (x1p, x2p, up_t, masks, w1a, w1b, w2a, w2b, pp)

    def const_spec(a):
        return pl.BlockSpec(a.shape, lambda n: (0,) * a.ndim)

    kernel = functools.partial(
        _up_fused_kernel, H=H, W=W, c_inp=c_inp, c_midp=c_midp, c_out=c_out,
        n_in=c_in, n_mid=c_mid, n_out=c_out)

    out = pl.pallas_call(
        kernel,
        out_shape=jax.ShapeDtypeStruct((N, c_out, HW), jnp.float32),
        grid_spec=pltpu.PrefetchScalarGridSpec(
            num_scalar_prefetch=0,
            grid=(N,),
            in_specs=[
                pl.BlockSpec((1, c_inp, h * w), lambda n: (n, 0, 0)),
                pl.BlockSpec((1, c_inp, HW), lambda n: (n, 0, 0)),
            ] + [const_spec(a) for a in args[2:]],
            out_specs=pl.BlockSpec((1, c_out, HW), lambda n: (n, 0, 0)),
        ),
        compiler_params=pltpu.CompilerParams(
            dimension_semantics=("parallel",)),
    )(*args)

    return out.reshape(N, c_out, H, W)


# ------------------------- pure-JAX reference (check) -----------------------


def _ref_conv3x3(x, w):
    return jax.lax.conv_general_dilated(
        x, w, (1, 1), ((1, 1), (1, 1)),
        dimension_numbers=('NCHW', 'HWIO', 'NCHW'), precision=_HIGHEST)


def _ref_groupnorm(x, g, b):
    mean = jnp.mean(x, axis=(1, 2, 3), keepdims=True)
    var = jnp.mean(jnp.square(x - mean), axis=(1, 2, 3), keepdims=True)
    xn = (x - mean) * jax.lax.rsqrt(var + _EPS)
    return xn * g.reshape(1, -1, 1, 1) + b.reshape(1, -1, 1, 1)


def _ref_double_conv(x, p, residual):
    y = _ref_conv3x3(x, p["w1"])
    y = _gelu(_ref_groupnorm(y, p["g1"], p["b1"]))
    y = _ref_conv3x3(y, p["w2"])
    y = _ref_groupnorm(y, p["g2"], p["b2"])
    return _gelu(x + y) if residual else y


def _ref_up2x(x):
    N, C, H, W = x.shape

    def coords(n_in, n_out):
        if n_in == 1:
            z = jnp.zeros((n_out,), jnp.int32)
            return z, z, jnp.zeros((n_out,), jnp.float32)
        s = jnp.arange(n_out, dtype=jnp.float32) * (n_in - 1) / (n_out - 1)
        i0 = jnp.floor(s).astype(jnp.int32)
        return i0, jnp.minimum(i0 + 1, n_in - 1), s - i0.astype(jnp.float32)

    y0, y1, wy = coords(H, 2 * H)
    c0, c1, wx = coords(W, 2 * W)
    r = (x[:, :, y0, :] * (1.0 - wy)[None, None, :, None]
         + x[:, :, y1, :] * wy[None, None, :, None])
    return (r[:, :, :, c0] * (1.0 - wx)[None, None, None, :]
            + r[:, :, :, c1] * wx[None, None, None, :])


def _up_reference(x1, x2, params):
    u = _ref_up2x(x1.astype(jnp.float32))
    dy = x2.shape[2] - u.shape[2]
    dx = x2.shape[3] - u.shape[3]
    u = jnp.pad(u, ((0, 0), (0, 0),
                    (dy // 2, dy - dy // 2), (dx // 2, dx - dx // 2)))
    x = jnp.concatenate([x2.astype(jnp.float32), u], axis=1)
    x = _ref_double_conv(x, params["conv"], residual=True)
    x = _ref_double_conv(x, params["conv2"], residual=False)
    return x


# ----------------------------------- main -----------------------------------


def init_double_conv(key, cin, cout, cmid=None):
    if cmid is None:
        cmid = cout
    k = jax.random.split(key, 6)
    return dict(
        w1=0.1 * jax.random.normal(k[0], (3, 3, cin, cmid), jnp.float32),
        g1=1.0 + 0.1 * jax.random.normal(k[1], (cmid,), jnp.float32),
        b1=0.1 * jax.random.normal(k[2], (cmid,), jnp.float32),
        w2=0.1 * jax.random.normal(k[3], (3, 3, cmid, cout), jnp.float32),
        g2=1.0 + 0.1 * jax.random.normal(k[4], (cout,), jnp.float32),
        b2=0.1 * jax.random.normal(k[5], (cout,), jnp.float32),
    )


if __name__ == "__main__":
    key = jax.random.PRNGKey(0)
    k1, k2, kp1, kp2 = jax.random.split(key, 4)

    in_channels, out_channels = 8, 4            # Up(8, 4, bilinear=True)
    N, H, W = 2, 16, 16
    c_skip = in_channels // 2                   # channels of x2 (skip path)
    c_low = in_channels - c_skip                # channels of x1 (low-res path)

    x1 = jax.random.normal(k1, (N, c_low, H // 2, W // 2), jnp.float32)  # NCHW
    x2 = jax.random.normal(k2, (N, c_skip, H, W), jnp.float32)           # NCHW

    params = {
        "conv": init_double_conv(kp1, in_channels, in_channels),         # residual
        "conv2": init_double_conv(kp2, in_channels, out_channels,
                                  in_channels // 2),                     # mid = C//2
    }

    out = jax.jit(up_forward)(x1, x2, params)
    jax.block_until_ready(out)
    assert out.shape == (N, out_channels, H, W)

    ref = _up_reference(x1, x2, params)
    max_err = float(jnp.max(jnp.abs(out - ref)))
    mean_err = float(jnp.mean(jnp.abs(out - ref)))
    # Both sides run all matmuls/convs at Precision.HIGHEST, so agreement
    # should be near f32 rounding level; tolerance tightened ~30x vs. v1.
    assert max_err < 5e-3 and mean_err < 5e-4, (max_err, mean_err)
    print("KERNEL_OK")
</pallas_src>

<mosaic_0001>
module attributes {stable_mosaic.version = 11 : i64} {
  func.func @_up_fused_kernel(%arg0: i32, %arg1: memref<1x8x64xf32, #tpu.memory_space<vmem>>, %arg2: memref<1x8x256xf32, #tpu.memory_space<vmem>>, %arg3: memref<64x256xf32, #tpu.memory_space<vmem>>, %arg4: memref<4x256xf32, #tpu.memory_space<vmem>>, %arg5: memref<8x72xf32, #tpu.memory_space<vmem>>, %arg6: memref<8x72xf32, #tpu.memory_space<vmem>>, %arg7: memref<8x72xf32, #tpu.memory_space<vmem>>, %arg8: memref<4x72xf32, #tpu.memory_space<vmem>>, %arg9: memref<8x8xf32, #tpu.memory_space<vmem>>, %arg10: memref<1x4x256xf32, #tpu.memory_space<vmem>>) attributes {dimension_semantics = [#tpu.dimension_semantics<parallel>], iteration_bounds = array<i64: 2>, scalar_prefetch = 0 : i64, scratch_operands = 0 : i64, tpu.core_type = #tpu.core_type<tc>, window_params = [{transform_indices = @transform_0, window_bounds = array<i64: 1, 8, 64>}, {transform_indices = @transform_1, window_bounds = array<i64: 1, 8, 256>}, {pipeline_mode = #tpu.pipeline_mode<synchronous>, transform_indices = @transform_2, window_bounds = array<i64: 64, 256>}, {pipeline_mode = #tpu.pipeline_mode<synchronous>, transform_indices = @transform_3, window_bounds = array<i64: 4, 256>}, {pipeline_mode = #tpu.pipeline_mode<synchronous>, transform_indices = @transform_4, window_bounds = array<i64: 8, 72>}, {pipeline_mode = #tpu.pipeline_mode<synchronous>, transform_indices = @transform_5, window_bounds = array<i64: 8, 72>}, {pipeline_mode = #tpu.pipeline_mode<synchronous>, transform_indices = @transform_6, window_bounds = array<i64: 8, 72>}, {pipeline_mode = #tpu.pipeline_mode<synchronous>, transform_indices = @transform_7, window_bounds = array<i64: 4, 72>}, {pipeline_mode = #tpu.pipeline_mode<synchronous>, transform_indices = @transform_8, window_bounds = array<i64: 8, 8>}, {transform_indices = @transform_9, window_bounds = array<i64: 1, 4, 256>}]} {
    %c0 = arith.constant 0 : index
    %c0_0 = arith.constant 0 : index
    %0 = vector.load %arg4[%c0, %c0_0] : memref<4x256xf32, #tpu.memory_space<vmem>>, vector<1x256xf32>
    %c1 = arith.constant 1 : index
    %c0_1 = arith.constant 0 : index
    %1 = vector.load %arg4[%c1, %c0_1] : memref<4x256xf32, #tpu.memory_space<vmem>>, vector<1x256xf32>
    %c2 = arith.constant 2 : index
    %c0_2 = arith.constant 0 : index
    %2 = vector.load %arg4[%c2, %c0_2] : memref<4x256xf32, #tpu.memory_space<vmem>>, vector<1x256xf32>
    %c3 = arith.constant 3 : index
    %c0_3 = arith.constant 0 : index
    %3 = vector.load %arg4[%c3, %c0_3] : memref<4x256xf32, #tpu.memory_space<vmem>>, vector<1x256xf32>
    %c0_4 = arith.constant 0 : index
    %c0_5 = arith.constant 0 : index
    %c0_6 = arith.constant 0 : index
    %4 = vector.load %arg2[%c0_4, %c0_5, %c0_6] : memref<1x8x256xf32, #tpu.memory_space<vmem>>, vector<1x8x256xf32>
    %5 = vector.shape_cast %4 : vector<1x8x256xf32> to vector<8x256xf32>
    %c0_7 = arith.constant 0 : index
    %c0_8 = arith.constant 0 : index
    %c0_9 = arith.constant 0 : index
    %6 = vector.load %arg1[%c0_7, %c0_8, %c0_9] : memref<1x8x64xf32, #tpu.memory_space<vmem>>, vector<1x8x64xf32>
    %7 = vector.shape_cast %6 : vector<1x8x64xf32> to vector<8x64xf32>
    %c0_10 = arith.constant 0 : index
    %c0_11 = arith.constant 0 : index
    %8 = vector.load %arg3[%c0_10, %c0_11] : memref<64x256xf32, #tpu.memory_space<vmem>>, vector<64x256xf32>
    %cst = arith.constant dense<0.000000e+00> : vector<8x256xf32>
    %9 = tpu.matmul %7, %8, %cst {dimension_numbers = #tpu.dot_dimension_numbers<[1], [0], [0], [1], [0, 0, 1, 1], [], []>, precision = #tpu.contract_precision<fp32>} : vector<8x64xf32>, vector<64x256xf32>, vector<8x256xf32> -> vector<8x256xf32>
    %10 = arith.addf %5, %9 : vector<8x256xf32>
    %c1_i32 = arith.constant 1 : i32
    %11 = tpu.dynamic_rotate %10 by %c1_i32 dim 1 : vector<8x256xf32>, i32 -> vector<8x256xf32>
    %12 = vector.broadcast %0 : vector<1x256xf32> to vector<8x256xf32>
    %13 = arith.mulf %11, %12 : vector<8x256xf32>
    %c255_i32 = arith.constant 255 : i32
    %14 = tpu.dynamic_rotate %10 by %c255_i32 dim 1 : vector<8x256xf32>, i32 -> vector<8x256xf32>
    %15 = vector.broadcast %1 : vector<1x256xf32> to vector<8x256xf32>
    %16 = arith.mulf %14, %15 : vector<8x256xf32>
    %c16_i32 = arith.constant 16 : i32
    %17 = tpu.dynamic_rotate %13 by %c16_i32 dim 1 : vector<8x256xf32>, i32 -> vector<8x256xf32>
    %18 = vector.broadcast %2 : vector<1x256xf32> to vector<8x256xf32>
    %19 = arith.mulf %17, %18 : vector<8x256xf32>
    %c16_i32_12 = arith.constant 16 : i32
    %20 = tpu.dynamic_rotate %10 by %c16_i32_12 dim 1 : vector<8x256xf32>, i32 -> vector<8x256xf32>
    %21 = vector.broadcast %2 : vector<1x256xf32> to vector<8x256xf32>
    %22 = arith.mulf %20, %21 : vector<8x256xf32>
    %c16_i32_13 = arith.constant 16 : i32
    %23 = tpu.dynamic_rotate %16 by %c16_i32_13 dim 1 : vector<8x256xf32>, i32 -> vector<8x256xf32>
    %24 = vector.broadcast %2 : vector<1x256xf32> to vector<8x256xf32>
    %25 = arith.mulf %23, %24 : vector<8x256xf32>
    %c240_i32 = arith.constant 240 : i32
    %26 = tpu.dynamic_rotate %13 by %c240_i32 dim 1 : vector<8x256xf32>, i32 -> vector<8x256xf32>
    %27 = vector.broadcast %3 : vector<1x256xf32> to vector<8x256xf32>
    %28 = arith.mulf %26, %27 : vector<8x256xf32>
    %c240_i32_14 = arith.constant 240 : i32
    %29 = tpu.dynamic_rotate %10 by %c240_i32_14 dim 1 : vector<8x256xf32>, i32 -> vector<8x256xf32>
    %30 = vector.broadcast %3 : vector<1x256xf32> to vector<8x256xf32>
    %31 = arith.mulf %29, %30 : vector<8x256xf32>
    %c240_i32_15 = arith.constant 240 : i32
    %32 = tpu.dynamic_rotate %16 by %c240_i32_15 dim 1 : vector<8x256xf32>, i32 -> vector<8x256xf32>
    %33 = vector.broadcast %3 : vector<1x256xf32> to vector<8x256xf32>
    %34 = arith.mulf %32, %33 : vector<8x256xf32>
    %35 = tpu.concatenate %19, %22, %25, %13, %10, %16, %28, %31, %34 in 0 : vector<8x256xf32>, vector<8x256xf32>, vector<8x256xf32>, vector<8x256xf32>, vector<8x256xf32>, vector<8x256xf32>, vector<8x256xf32>, vector<8x256xf32>, vector<8x256xf32> -> vector<72x256xf32>
    %c0_16 = arith.constant 0 : index
    %c0_17 = arith.constant 0 : index
    %36 = vector.load %arg5[%c0_16, %c0_17] : memref<8x72xf32, #tpu.memory_space<vmem>>, vector<8x72xf32>
    %cst_18 = arith.constant dense<0.000000e+00> : vector<8x256xf32>
    %37 = tpu.matmul %36, %35, %cst_18 {dimension_numbers = #tpu.dot_dimension_numbers<[1], [0], [0], [1], [0, 0, 1, 1], [], []>, precision = #tpu.contract_precision<fp32>} : vector<8x72xf32>, vector<72x256xf32>, vector<8x256xf32> -> vector<8x256xf32>
    %c0_19 = arith.constant 0 : index
    %c0_20 = arith.constant 0 : index
    %38 = vector.load %arg9[%c0_19, %c0_20] : memref<8x8xf32, #tpu.memory_space<vmem>>, vector<8x1xf32>
    %c0_21 = arith.constant 0 : index
    %c1_22 = arith.constant 1 : index
    %39 = vector.load %arg9[%c0_21, %c1_22] : memref<8x8xf32, #tpu.memory_space<vmem>>, vector<8x1xf32>
    %40 = vector.shape_cast %37 : vector<8x256xf32> to vector<1x8x256xf32>
    %cst_23 = arith.constant dense<0.000000e+00> : vector<1xf32>
    %41 = vector.multi_reduction <add>, %40, %cst_23 [1, 2] : vector<1x8x256xf32> to vector<1xf32>
    %42 = vector.shape_cast %41 : vector<1xf32> to vector<1x1x1xf32>
    %43 = vector.extract %42[0, 0, 0] : f32 from vector<1x1x1xf32>
    %44 = arith.mulf %37, %37 : vector<8x256xf32>
    %45 = vector.shape_cast %44 : vector<8x256xf32> to vector<1x8x256xf32>
    %cst_24 = arith.constant dense<0.000000e+00> : vector<1xf32>
    %46 = vector.multi_reduction <add>, %45, %cst_24 [1, 2] : vector<1x8x256xf32> to vector<1xf32>
    %47 = vector.shape_cast %46 : vector<1xf32> to vector<1x1x1xf32>
    %48 = vector.extract %47[0, 0, 0] : f32 from vector<1x1x1xf32>
    %cst_25 = arith.constant 4.8828125E-4 : f32
    %49 = arith.mulf %43, %cst_25 : f32
    %cst_26 = arith.constant 4.8828125E-4 : f32
    %50 = arith.mulf %48, %cst_26 : f32
    %51 = arith.mulf %49, %49 : f32
    %52 = arith.subf %50, %51 : f32
    %53 = vector.broadcast %49 : f32 to vector<8x256xf32>
    %54 = arith.subf %37, %53 : vector<8x256xf32>
    %cst_27 = arith.constant 9.99999974E-6 : f32
    %55 = arith.addf %52, %cst_27 : f32
    %56 = math.rsqrt %55 : f32
    %57 = vector.broadcast %56 : f32 to vector<8x256xf32>
    %58 = arith.mulf %54, %57 : vector<8x256xf32>
    %59 = vector.broadcast %38 : vector<8x1xf32> to vector<8x256xf32>
    %60 = arith.mulf %58, %59 : vector<8x256xf32>
    %61 = vector.broadcast %39 : vector<8x1xf32> to vector<8x256xf32>
    %62 = arith.addf %60, %61 : vector<8x256xf32>
    %cst_28 = arith.constant 5.000000e-01 : f32
    %63 = vector.broadcast %cst_28 : f32 to vector<8x256xf32>
    %64 = arith.mulf %63, %62 : vector<8x256xf32>
    %cst_29 = arith.constant 0.707106769 : f32
    %65 = vector.broadcast %cst_29 : f32 to vector<8x256xf32>
    %66 = arith.mulf %62, %65 : vector<8x256xf32>
    %67 = math.erf %66 : vector<8x256xf32>
    %cst_30 = arith.constant 1.000000e+00 : f32
    %68 = vector.broadcast %cst_30 : f32 to vector<8x256xf32>
    %69 = arith.addf %68, %67 : vector<8x256xf32>
    %70 = arith.mulf %64, %69 : vector<8x256xf32>
    %c1_i32_31 = arith.constant 1 : i32
    %71 = tpu.dynamic_rotate %70 by %c1_i32_31 dim 1 : vector<8x256xf32>, i32 -> vector<8x256xf32>
    %72 = vector.broadcast %0 : vector<1x256xf32> to vector<8x256xf32>
    %73 = arith.mulf %71, %72 : vector<8x256xf32>
    %c255_i32_32 = arith.constant 255 : i32
    %74 = tpu.dynamic_rotate %70 by %c255_i32_32 dim 1 : vector<8x256xf32>, i32 -> vector<8x256xf32>
    %75 = vector.broadcast %1 : vector<1x256xf32> to vector<8x256xf32>
    %76 = arith.mulf %74, %75 : vector<8x256xf32>
    %c16_i32_33 = arith.constant 16 : i32
    %77 = tpu.dynamic_rotate %73 by %c16_i32_33 dim 1 : vector<8x256xf32>, i32 -> vector<8x256xf32>
    %78 = vector.broadcast %2 : vector<1x256xf32> to vector<8x256xf32>
    %79 = arith.mulf %77, %78 : vector<8x256xf32>
    %c16_i32_34 = arith.constant 16 : i32
    %80 = tpu.dynamic_rotate %70 by %c16_i32_34 dim 1 : vector<8x256xf32>, i32 -> vector<8x256xf32>
    %81 = vector.broadcast %2 : vector<1x256xf32> to vector<8x256xf32>
    %82 = arith.mulf %80, %81 : vector<8x256xf32>
    %c16_i32_35 = arith.constant 16 : i32
    %83 = tpu.dynamic_rotate %76 by %c16_i32_35 dim 1 : vector<8x256xf32>, i32 -> vector<8x256xf32>
    %84 = vector.broadcast %2 : vector<1x256xf32> to vector<8x256xf32>
    %85 = arith.mulf %83, %84 : vector<8x256xf32>
    %c240_i32_36 = arith.constant 240 : i32
    %86 = tpu.dynamic_rotate %73 by %c240_i32_36 dim 1 : vector<8x256xf32>, i32 -> vector<8x256xf32>
    %87 = vector.broadcast %3 : vector<1x256xf32> to vector<8x256xf32>
    %88 = arith.mulf %86, %87 : vector<8x256xf32>
    %c240_i32_37 = arith.constant 240 : i32
    %89 = tpu.dynamic_rotate %70 by %c240_i32_37 dim 1 : vector<8x256xf32>, i32 -> vector<8x256xf32>
    %90 = vector.broadcast %3 : vector<1x256xf32> to vector<8x256xf32>
    %91 = arith.mulf %89, %90 : vector<8x256xf32>
    %c240_i32_38 = arith.constant 240 : i32
    %92 = tpu.dynamic_rotate %76 by %c240_i32_38 dim 1 : vector<8x256xf32>, i32 -> vector<8x256xf32>
    %93 = vector.broadcast %3 : vector<1x256xf32> to vector<8x256xf32>
    %94 = arith.mulf %92, %93 : vector<8x256xf32>
    %95 = tpu.concatenate %79, %82, %85, %73, %70, %76, %88, %91, %94 in 0 : vector<8x256xf32>, vector<8x256xf32>, vector<8x256xf32>, vector<8x256xf32>, vector<8x256xf32>, vector<8x256xf32>, vector<8x256xf32>, vector<8x256xf32>, vector<8x256xf32> -> vector<72x256xf32>
    %c0_39 = arith.constant 0 : index
    %c0_40 = arith.constant 0 : index
    %96 = vector.load %arg6[%c0_39, %c0_40] : memref<8x72xf32, #tpu.memory_space<vmem>>, vector<8x72xf32>
    %cst_41 = arith.constant dense<0.000000e+00> : vector<8x256xf32>
    %97 = tpu.matmul %96, %95, %cst_41 {dimension_numbers = #tpu.dot_dimension_numbers<[1], [0], [0], [1], [0, 0, 1, 1], [], []>, precision = #tpu.contract_precision<fp32>} : vector<8x72xf32>, vector<72x256xf32>, vector<8x256xf32> -> vector<8x256xf32>
    %c0_42 = arith.constant 0 : index
    %c2_43 = arith.constant 2 : index
    %98 = vector.load %arg9[%c0_42, %c2_43] : memref<8x8xf32, #tpu.memory_space<vmem>>, vector<8x1xf32>
    %c0_44 = arith.constant 0 : index
    %c3_45 = arith.constant 3 : index
    %99 = vector.load %arg9[%c0_44, %c3_45] : memref<8x8xf32, #tpu.memory_space<vmem>>, vector<8x1xf32>
    %100 = vector.shape_cast %97 : vector<8x256xf32> to vector<1x8x256xf32>
    %cst_46 = arith.constant dense<0.000000e+00> : vector<1xf32>
    %101 = vector.multi_reduction <add>, %100, %cst_46 [1, 2] : vector<1x8x256xf32> to vector<1xf32>
    %102 = vector.shape_cast %101 : vector<1xf32> to vector<1x1x1xf32>
    %103 = vector.extract %102[0, 0, 0] : f32 from vector<1x1x1xf32>
    %104 = arith.mulf %97, %97 : vector<8x256xf32>
    %105 = vector.shape_cast %104 : vector<8x256xf32> to vector<1x8x256xf32>
    %cst_47 = arith.constant dense<0.000000e+00> : vector<1xf32>
    %106 = vector.multi_reduction <add>, %105, %cst_47 [1, 2] : vector<1x8x256xf32> to vector<1xf32>
    %107 = vector.shape_cast %106 : vector<1xf32> to vector<1x1x1xf32>
    %108 = vector.extract %107[0, 0, 0] : f32 from vector<1x1x1xf32>
    %cst_48 = arith.constant 4.8828125E-4 : f32
    %109 = arith.mulf %103, %cst_48 : f32
    %cst_49 = arith.constant 4.8828125E-4 : f32
    %110 = arith.mulf %108, %cst_49 : f32
    %111 = arith.mulf %109, %109 : f32
    %112 = arith.subf %110, %111 : f32
    %113 = vector.broadcast %109 : f32 to vector<8x256xf32>
    %114 = arith.subf %97, %113 : vector<8x256xf32>
    %cst_50 = arith.constant 9.99999974E-6 : f32
    %115 = arith.addf %112, %cst_50 : f32
    %116 = math.rsqrt %115 : f32
    %117 = vector.broadcast %116 : f32 to vector<8x256xf32>
    %118 = arith.mulf %114, %117 : vector<8x256xf32>
    %119 = vector.broadcast %98 : vector<8x1xf32> to vector<8x256xf32>
    %120 = arith.mulf %118, %119 : vector<8x256xf32>
    %121 = vector.broadcast %99 : vector<8x1xf32> to vector<8x256xf32>
    %122 = arith.addf %120, %121 : vector<8x256xf32>
    %123 = arith.addf %10, %122 : vector<8x256xf32>
    %cst_51 = arith.constant 5.000000e-01 : f32
    %124 = vector.broadcast %cst_51 : f32 to vector<8x256xf32>
    %125 = arith.mulf %124, %123 : vector<8x256xf32>
    %cst_52 = arith.constant 0.707106769 : f32
    %126 = vector.broadcast %cst_52 : f32 to vector<8x256xf32>
    %127 = arith.mulf %123, %126 : vector<8x256xf32>
    %128 = math.erf %127 : vector<8x256xf32>
    %cst_53 = arith.constant 1.000000e+00 : f32
    %129 = vector.broadcast %cst_53 : f32 to vector<8x256xf32>
    %130 = arith.addf %129, %128 : vector<8x256xf32>
    %131 = arith.mulf %125, %130 : vector<8x256xf32>
    %c1_i32_54 = arith.constant 1 : i32
    %132 = tpu.dynamic_rotate %131 by %c1_i32_54 dim 1 : vector<8x256xf32>, i32 -> vector<8x256xf32>
    %133 = vector.broadcast %0 : vector<1x256xf32> to vector<8x256xf32>
    %134 = arith.mulf %132, %133 : vector<8x256xf32>
    %c255_i32_55 = arith.constant 255 : i32
    %135 = tpu.dynamic_rotate %131 by %c255_i32_55 dim 1 : vector<8x256xf32>, i32 -> vector<8x256xf32>
    %136 = vector.broadcast %1 : vector<1x256xf32> to vector<8x256xf32>
    %137 = arith.mulf %135, %136 : vector<8x256xf32>
    %c16_i32_56 = arith.constant 16 : i32
    %138 = tpu.dynamic_rotate %134 by %c16_i32_56 dim 1 : vector<8x256xf32>, i32 -> vector<8x256xf32>
    %139 = vector.broadcast %2 : vector<1x256xf32> to vector<8x256xf32>
    %140 = arith.mulf %138, %139 : vector<8x256xf32>
    %c16_i32_57 = arith.constant 16 : i32
    %141 = tpu.dynamic_rotate %131 by %c16_i32_57 dim 1 : vector<8x256xf32>, i32 -> vector<8x256xf32>
    %142 = vector.broadcast %2 : vector<1x256xf32> to vector<8x256xf32>
    %143 = arith.mulf %141, %142 : vector<8x256xf32>
    %c16_i32_58 = arith.constant 16 : i32
    %144 = tpu.dynamic_rotate %137 by %c16_i32_58 dim 1 : vector<8x256xf32>, i32 -> vector<8x256xf32>
    %145 = vector.broadcast %2 : vector<1x256xf32> to vector<8x256xf32>
    %146 = arith.mulf %144, %145 : vector<8x256xf32>
    %c240_i32_59 = arith.constant 240 : i32
    %147 = tpu.dynamic_rotate %134 by %c240_i32_59 dim 1 : vector<8x256xf32>, i32 -> vector<8x256xf32>
    %148 = vector.broadcast %3 : vector<1x256xf32> to vector<8x256xf32>
    %149 = arith.mulf %147, %148 : vector<8x256xf32>
    %c240_i32_60 = arith.constant 240 : i32
    %150 = tpu.dynamic_rotate %131 by %c240_i32_60 dim 1 : vector<8x256xf32>, i32 -> vector<8x256xf32>
    %151 = vector.broadcast %3 : vector<1x256xf32> to vector<8x256xf32>
    %152 = arith.mulf %150, %151 : vector<8x256xf32>
    %c240_i32_61 = arith.constant 240 : i32
    %153 = tpu.dynamic_rotate %137 by %c240_i32_61 dim 1 : vector<8x256xf32>, i32 -> vector<8x256xf32>
    %154 = vector.broadcast %3 : vector<1x256xf32> to vector<8x256xf32>
    %155 = arith.mulf %153, %154 : vector<8x256xf32>
    %156 = tpu.concatenate %140, %143, %146, %134, %131, %137, %149, %152, %155 in 0 : vector<8x256xf32>, vector<8x256xf32>, vector<8x256xf32>, vector<8x256xf32>, vector<8x256xf32>, vector<8x256xf32>, vector<8x256xf32>, vector<8x256xf32>, vector<8x256xf32> -> vector<72x256xf32>
    %c0_62 = arith.constant 0 : index
    %c0_63 = arith.constant 0 : index
    %157 = vector.load %arg7[%c0_62, %c0_63] : memref<8x72xf32, #tpu.memory_space<vmem>>, vector<8x72xf32>
    %cst_64 = arith.constant dense<0.000000e+00> : vector<8x256xf32>
    %158 = tpu.matmul %157, %156, %cst_64 {dimension_numbers = #tpu.dot_dimension_numbers<[1], [0], [0], [1], [0, 0, 1, 1], [], []>, precision = #tpu.contract_precision<fp32>} : vector<8x72xf32>, vector<72x256xf32>, vector<8x256xf32> -> vector<8x256xf32>
    %c0_65 = arith.constant 0 : index
    %c4 = arith.constant 4 : index
    %159 = vector.load %arg9[%c0_65, %c4] : memref<8x8xf32, #tpu.memory_space<vmem>>, vector<8x1xf32>
    %c0_66 = arith.constant 0 : index
    %c5 = arith.constant 5 : index
    %160 = vector.load %arg9[%c0_66, %c5] : memref<8x8xf32, #tpu.memory_space<vmem>>, vector<8x1xf32>
    %161 = vector.shape_cast %158 : vector<8x256xf32> to vector<1x8x256xf32>
    %cst_67 = arith.constant dense<0.000000e+00> : vector<1xf32>
    %162 = vector.multi_reduction <add>, %161, %cst_67 [1, 2] : vector<1x8x256xf32> to vector<1xf32>
    %163 = vector.shape_cast %162 : vector<1xf32> to vector<1x1x1xf32>
    %164 = vector.extract %163[0, 0, 0] : f32 from vector<1x1x1xf32>
    %165 = arith.mulf %158, %158 : vector<8x256xf32>
    %166 = vector.shape_cast %165 : vector<8x256xf32> to vector<1x8x256xf32>
    %cst_68 = arith.constant dense<0.000000e+00> : vector<1xf32>
    %167 = vector.multi_reduction <add>, %166, %cst_68 [1, 2] : vector<1x8x256xf32> to vector<1xf32>
    %168 = vector.shape_cast %167 : vector<1xf32> to vector<1x1x1xf32>
    %169 = vector.extract %168[0, 0, 0] : f32 from vector<1x1x1xf32>
    %cst_69 = arith.constant 9.765625E-4 : f32
    %170 = arith.mulf %164, %cst_69 : f32
    %cst_70 = arith.constant 9.765625E-4 : f32
    %171 = arith.mulf %169, %cst_70 : f32
    %172 = arith.mulf %170, %170 : f32
    %173 = arith.subf %171, %172 : f32
    %174 = vector.broadcast %170 : f32 to vector<8x256xf32>
    %175 = arith.subf %158, %174 : vector<8x256xf32>
    %cst_71 = arith.constant 9.99999974E-6 : f32
    %176 = arith.addf %173, %cst_71 : f32
    %177 = math.rsqrt %176 : f32
    %178 = vector.broadcast %177 : f32 to vector<8x256xf32>
    %179 = arith.mulf %175, %178 : vector<8x256xf32>
    %180 = vector.broadcast %159 : vector<8x1xf32> to vector<8x256xf32>
    %181 = arith.mulf %179, %180 : vector<8x256xf32>
    %182 = vector.broadcast %160 : vector<8x1xf32> to vector<8x256xf32>
    %183 = arith.addf %181, %182 : vector<8x256xf32>
    %cst_72 = arith.constant 5.000000e-01 : f32
    %184 = vector.broadcast %cst_72 : f32 to vector<8x256xf32>
    %185 = arith.mulf %184, %183 : vector<8x256xf32>
    %cst_73 = arith.constant 0.707106769 : f32
    %186 = vector.broadcast %cst_73 : f32 to vector<8x256xf32>
    %187 = arith.mulf %183, %186 : vector<8x256xf32>
    %188 = math.erf %187 : vector<8x256xf32>
    %cst_74 = arith.constant 1.000000e+00 : f32
    %189 = vector.broadcast %cst_74 : f32 to vector<8x256xf32>
    %190 = arith.addf %189, %188 : vector<8x256xf32>
    %191 = arith.mulf %185, %190 : vector<8x256xf32>
    %c1_i32_75 = arith.constant 1 : i32
    %192 = tpu.dynamic_rotate %191 by %c1_i32_75 dim 1 : vector<8x256xf32>, i32 -> vector<8x256xf32>
    %193 = vector.broadcast %0 : vector<1x256xf32> to vector<8x256xf32>
    %194 = arith.mulf %192, %193 : vector<8x256xf32>
    %c255_i32_76 = arith.constant 255 : i32
    %195 = tpu.dynamic_rotate %191 by %c255_i32_76 dim 1 : vector<8x256xf32>, i32 -> vector<8x256xf32>
    %196 = vector.broadcast %1 : vector<1x256xf32> to vector<8x256xf32>
    %197 = arith.mulf %195, %196 : vector<8x256xf32>
    %c16_i32_77 = arith.constant 16 : i32
    %198 = tpu.dynamic_rotate %194 by %c16_i32_77 dim 1 : vector<8x256xf32>, i32 -> vector<8x256xf32>
    %199 = vector.broadcast %2 : vector<1x256xf32> to vector<8x256xf32>
    %200 = arith.mulf %198, %199 : vector<8x256xf32>
    %c16_i32_78 = arith.constant 16 : i32
    %201 = tpu.dynamic_rotate %191 by %c16_i32_78 dim 1 : vector<8x256xf32>, i32 -> vector<8x256xf32>
    %202 = vector.broadcast %2 : vector<1x256xf32> to vector<8x256xf32>
    %203 = arith.mulf %201, %202 : vector<8x256xf32>
    %c16_i32_79 = arith.constant 16 : i32
    %204 = tpu.dynamic_rotate %197 by %c16_i32_79 dim 1 : vector<8x256xf32>, i32 -> vector<8x256xf32>
    %205 = vector.broadcast %2 : vector<1x256xf32> to vector<8x256xf32>
    %206 = arith.mulf %204, %205 : vector<8x256xf32>
    %c240_i32_80 = arith.constant 240 : i32
    %207 = tpu.dynamic_rotate %194 by %c240_i32_80 dim 1 : vector<8x256xf32>, i32 -> vector<8x256xf32>
    %208 = vector.broadcast %3 : vector<1x256xf32> to vector<8x256xf32>
    %209 = arith.mulf %207, %208 : vector<8x256xf32>
    %c240_i32_81 = arith.constant 240 : i32
    %210 = tpu.dynamic_rotate %191 by %c240_i32_81 dim 1 : vector<8x256xf32>, i32 -> vector<8x256xf32>
    %211 = vector.broadcast %3 : vector<1x256xf32> to vector<8x256xf32>
    %212 = arith.mulf %210, %211 : vector<8x256xf32>
    %c240_i32_82 = arith.constant 240 : i32
    %213 = tpu.dynamic_rotate %197 by %c240_i32_82 dim 1 : vector<8x256xf32>, i32 -> vector<8x256xf32>
    %214 = vector.broadcast %3 : vector<1x256xf32> to vector<8x256xf32>
    %215 = arith.mulf %213, %214 : vector<8x256xf32>
    %216 = tpu.concatenate %200, %203, %206, %194, %191, %197, %209, %212, %215 in 0 : vector<8x256xf32>, vector<8x256xf32>, vector<8x256xf32>, vector<8x256xf32>, vector<8x256xf32>, vector<8x256xf32>, vector<8x256xf32>, vector<8x256xf32>, vector<8x256xf32> -> vector<72x256xf32>
    %c0_83 = arith.constant 0 : index
    %c0_84 = arith.constant 0 : index
    %217 = vector.load %arg8[%c0_83, %c0_84] : memref<4x72xf32, #tpu.memory_space<vmem>>, vector<4x72xf32>
    %cst_85 = arith.constant dense<0.000000e+00> : vector<4x256xf32>
    %218 = tpu.matmul %217, %216, %cst_85 {dimension_numbers = #tpu.dot_dimension_numbers<[1], [0], [0], [1], [0, 0, 1, 1], [], []>, precision = #tpu.contract_precision<fp32>} : vector<4x72xf32>, vector<72x256xf32>, vector<4x256xf32> -> vector<4x256xf32>
    %c0_86 = arith.constant 0 : index
    %c6 = arith.constant 6 : index
    %219 = vector.load %arg9[%c0_86, %c6] : memref<8x8xf32, #tpu.memory_space<vmem>>, vector<4x1xf32>
    %c0_87 = arith.constant 0 : index
    %c7 = arith.constant 7 : index
    %220 = vector.load %arg9[%c0_87, %c7] : memref<8x8xf32, #tpu.memory_space<vmem>>, vector<4x1xf32>
    %221 = vector.shape_cast %218 : vector<4x256xf32> to vector<1x4x256xf32>
    %cst_88 = arith.constant dense<0.000000e+00> : vector<1xf32>
    %222 = vector.multi_reduction <add>, %221, %cst_88 [1, 2] : vector<1x4x256xf32> to vector<1xf32>
    %223 = vector.shape_cast %222 : vector<1xf32> to vector<1x1x1xf32>
    %224 = vector.extract %223[0, 0, 0] : f32 from vector<1x1x1xf32>
    %225 = arith.mulf %218, %218 : vector<4x256xf32>
    %226 = vector.shape_cast %225 : vector<4x256xf32> to vector<1x4x256xf32>
    %cst_89 = arith.constant dense<0.000000e+00> : vector<1xf32>
    %227 = vector.multi_reduction <add>, %226, %cst_89 [1, 2] : vector<1x4x256xf32> to vector<1xf32>
    %228 = vector.shape_cast %227 : vector<1xf32> to vector<1x1x1xf32>
    %229 = vector.extract %228[0, 0, 0] : f32 from vector<1x1x1xf32>
    %cst_90 = arith.constant 9.765625E-4 : f32
    %230 = arith.mulf %224, %cst_90 : f32
    %cst_91 = arith.constant 9.765625E-4 : f32
    %231 = arith.mulf %229, %cst_91 : f32
    %232 = arith.mulf %230, %230 : f32
    %233 = arith.subf %231, %232 : f32
    %234 = vector.broadcast %230 : f32 to vector<4x256xf32>
    %235 = arith.subf %218, %234 : vector<4x256xf32>
    %cst_92 = arith.constant 9.99999974E-6 : f32
    %236 = arith.addf %233, %cst_92 : f32
    %237 = math.rsqrt %236 : f32
    %238 = vector.broadcast %237 : f32 to vector<4x256xf32>
    %239 = arith.mulf %235, %238 : vector<4x256xf32>
    %240 = vector.broadcast %219 : vector<4x1xf32> to vector<4x256xf32>
    %241 = arith.mulf %239, %240 : vector<4x256xf32>
    %242 = vector.broadcast %220 : vector<4x1xf32> to vector<4x256xf32>
    %243 = arith.addf %241, %242 : vector<4x256xf32>
    %c0_93 = arith.constant 0 : index
    %c0_94 = arith.constant 0 : index
    %c0_95 = arith.constant 0 : index
    %244 = vector.load %arg10[%c0_93, %c0_94, %c0_95] : memref<1x4x256xf32, #tpu.memory_space<vmem>>, vector<1x4x256xf32>
    %245 = vector.shape_cast %244 : vector<1x4x256xf32> to vector<4x256xf32>
    %246 = vector.shape_cast %243 : vector<4x256xf32> to vector<1x4x256xf32>
    tpu.vector_store %arg10[%c0_93, %c0_94, %c0_95], %246 {strides = array<i32>} : memref<1x4x256xf32, #tpu.memory_space<vmem>>, vector<1x4x256xf32>,
    return
  }
  func.func @transform_0(%arg0: i32) -> (i32, i32, i32) {
    %c0_i32 = arith.constant 0 : i32
    %c0_i32_0 = arith.constant 0 : i32
    %c0_i32_1 = arith.constant 0 : i32
    return %arg0, %c0_i32, %c0_i32_0 : i32, i32, i32
  }
  func.func @transform_1(%arg0: i32) -> (i32, i32, i32) {
    %c0_i32 = arith.constant 0 : i32
    %c0_i32_0 = arith.constant 0 : i32
    %c0_i32_1 = arith.constant 0 : i32
    return %arg0, %c0_i32, %c0_i32_0 : i32, i32, i32
  }
  func.func @transform_2(%arg0: i32) -> (i32, i32) {
    %c0_i32 = arith.constant 0 : i32
    %c0_i32_0 = arith.constant 0 : i32
    %c0_i32_1 = arith.constant 0 : i32
    return %c0_i32, %c0_i32_0 : i32, i32
  }
  func.func @transform_3(%arg0: i32) -> (i32, i32) {
    %c0_i32 = arith.constant 0 : i32
    %c0_i32_0 = arith.constant 0 : i32
    %c0_i32_1 = arith.constant 0 : i32
    return %c0_i32, %c0_i32_0 : i32, i32
  }
  func.func @transform_4(%arg0: i32) -> (i32, i32) {
    %c0_i32 = arith.constant 0 : i32
    %c0_i32_0 = arith.constant 0 : i32
    %c0_i32_1 = arith.constant 0 : i32
    return %c0_i32, %c0_i32_0 : i32, i32
  }
  func.func @transform_5(%arg0: i32) -> (i32, i32) {
    %c0_i32 = arith.constant 0 : i32
    %c0_i32_0 = arith.constant 0 : i32
    %c0_i32_1 = arith.constant 0 : i32
    return %c0_i32, %c0_i32_0 : i32, i32
  }
  func.func @transform_6(%arg0: i32) -> (i32, i32) {
    %c0_i32 = arith.constant 0 : i32
    %c0_i32_0 = arith.constant 0 : i32
    %c0_i32_1 = arith.constant 0 : i32
    return %c0_i32, %c0_i32_0 : i32, i32
  }
  func.func @transform_7(%arg0: i32) -> (i32, i32) {
    %c0_i32 = arith.constant 0 : i32
    %c0_i32_0 = arith.constant 0 : i32
    %c0_i32_1 = arith.constant 0 : i32
    return %c0_i32, %c0_i32_0 : i32, i32
  }
  func.func @transform_8(%arg0: i32) -> (i32, i32) {
    %c0_i32 = arith.constant 0 : i32
    %c0_i32_0 = arith.constant 0 : i32
    %c0_i32_1 = arith.constant 0 : i32
    return %c0_i32, %c0_i32_0 : i32, i32
  }
  func.func @transform_9(%arg0: i32) -> (i32, i32, i32) {
    %c0_i32 = arith.constant 0 : i32
    %c0_i32_0 = arith.constant 0 : i32
    %c0_i32_1 = arith.constant 0 : i32
    return %arg0, %c0_i32, %c0_i32_0 : i32, i32, i32
  }
}

</mosaic_0001>

<bundles_post_ra>
// kernel: up_forward.1
= control target key start
LH: loop header
LB: loop body
LE: loop exit
PB: predicated region body
PF: predicated region fallthrough
CT: control target
= control target key end

     0   :  { %s4512_s30 = smov 0   ;;  %s6473_s0 = inlined_call_operand.vmem [shape: f32[2,8,64], index: 0, kind: input, shape index: {}]   ;;  %s6474_s1 = inlined_call_operand.vmem [shape: f32[2,8,256], index: 1, kind: input, shape index: {}]   ;;  %s6475_s2 = inlined_call_operand.vmem [shape: f32[64,256], index: 2, kind: input, shape index: {}]   ;;  %s6476_s3 = inlined_call_operand.vmem [shape: f32[4,256], index: 3, kind: input, shape index: {}]   ;;  %s6477_s4 = inlined_call_operand.vmem [shape: f32[8,72], index: 4, kind: input, shape index: {}]   ;;  %s6478_s5 = inlined_call_operand.vmem [shape: f32[8,72], index: 5, kind: input, shape index: {}]   ;;  %s6479_s6 = inlined_call_operand.vmem [shape: f32[8,72], index: 6, kind: input, shape index: {}]   ;;  %s6480_s7 = inlined_call_operand.vmem [shape: f32[4,72], index: 7, kind: input, shape index: {}]   ;;  %s6481_s8 = inlined_call_operand.vmem [shape: f32[8,8], index: 8, kind: input, shape index: {}]   ;;  %s6482_s9 = inlined_call_operand.vmem [shape: f32[2,4,256], index: 9, kind: output, shape index: {}]  }
   0x1 LB: > { %s4349_s10 = sadd.s32 4294967295, %s4447_s30   ;;  %p4353_p0 = scmp.ge.s32.totalorder %s4447_s30, 1  ;;  %s4447_s30 = sphi %s4512_s30, %s19_s30  }
   0x2   : > { %p296_p1 = scmp.lt.s32.totalorder %s4447_s30, 3 }
   0x4   : > { %p297_p2 = pnand %p4353_p0, %p296_p1 }
   0x6   : > { %300 = sbr.rel (%p297_p2) target bundleno = 3507 (0xdb3), region = 56 }
   0xb   : > { %v375_v0 = vld [vmem:[%s6475_s2 + $0x78] sm:$0xff]  ;;  %v374_v1 = vld [vmem:[%s6475_s2 + $0x70] sm:$0xff]  ;;  %v373_v2 = vld [vmem:[%s6475_s2 + $0x68] sm:$0xff]  ;;  %p4531_p3 = scmp.lt.s32.totalorder %s4349_s10, 1  ;;  %v6492_v9 = vmov 0.0   ;;  %vm376_vm0 = vcmask 523264  }
   0xc   : > { %v4535_v3 = vand.u32 4294901760, %v375_v0  ;;  %v4537_v4 = vand.u32 4294901760, %v374_v1  ;;  %v4539_v5 = vand.u32 4294901760, %v373_v2  ;;  %v372_v6 = vld [vmem:[%s6475_s2 + $0x60] sm:$0xff]  ;;  %v371_v7 = vld [vmem:[%s6475_s2 + $0x58] sm:$0xff]  ;;  %v370_v8 = vld [vmem:[%s6475_s2 + $0x50] sm:$0xff]  ;;  %460 = vmatprep.mubr.f32.mxu0 %v6492_v9  ;;  %616 = vmatprep.mubr.f32.mxu1 %v6492_v9 }
   0xd   : > { %v4552_v10 = vand.u32 4294901760, %v372_v6  ;;  %v4554_v11 = vand.u32 4294901760, %v371_v7  ;;  %v4556_v12 = vand.u32 4294901760, %v370_v8  ;;  %v369_v13 = vld [vmem:[%s6475_s2 + $0x48] sm:$0xff]  ;;  %v368_v14 = vld [vmem:[%s6475_s2 + $0x40] sm:$0xff]  ;;  %v367_v15 = vld [vmem:[%s6475_s2 + $0x38] sm:$0xff] }
   0xe   : > { %397 = vmatprep.subr.mxu0 %v4535_v3  ;;  %v4568_v16 = vand.u32 4294901760, %v369_v13  ;;  %v4570_v17 = vand.u32 4294901760, %v368_v14  ;;  %v4572_v18 = vand.u32 4294901760, %v367_v15  ;;  %v4575_v19 = vsub.f32 %v375_v0, %v4535_v3  ;;  %v366_v20 = vld [vmem:[%s6475_s2 + $0x30] sm:$0xff]  ;;  %v4583_v21 = vld [vmem:[%s6475_s2 + $0x28] sm:$0xff]  ;;  %v4588_v22 = vld [vmem:[%s6475_s2 + $0x20] sm:$0xff] }
   0xf   : > { %399 = vmatpush1.msra.mxu0 %v4537_v4  ;;  %v4591_v23 = vand.u32 4294901760, %v366_v20  ;;  %v4594_v24 = vsub.f32 %v374_v1, %v4537_v4  ;;  %v4597_v25 = vand.u32 4294901760, %v4583_v21  ;;  %v4600_v26 = vsub.f32 %v373_v2, %v4539_v5  ;;  %v4605_v27 = vld [vmem:[%s6475_s2 + $0x18] sm:$0xff]  ;;  %v4610_v28 = vld [vmem:[%s6475_s2 + $0x10] sm:$0xff]  ;;  %v4615_v29 = vld [vmem:[%s6475_s2 + $0x8] sm:$0xff]  ;;  %s6606_s10 = smov (!%p4531_p3, %s4349_s10), 1 }
  0x10   : > { %401 = vmatprep.subr.mxu0 %v4539_v5  ;;  %v490_v30 = vand.u32 4294901760, %v4575_v19  ;;  %v4626_v31 = vand.u32 4294901760, %v4588_v22  ;;  %v4629_v32 = vsub.f32 %v372_v6, %v4552_v10  ;;  %v4632_v33 = vand.u32 4294901760, %v4605_v27  ;;  %v4646_v38 = vld [vmem:[%s6475_s2] sm:$0xff]  ;;  %s4354_s25 = sshll.u32 %s6606_s10, 3  ;;  %s4364_s29 = sshll.u32 %s6606_s10, 4 }
  0x11   : > { %403 = vmatpush1.msra.mxu0 %v4552_v10  ;;  %v496_v34 = vand.u32 4294901760, %v4594_v24  ;;  %v502_v35 = vand.u32 4294901760, %v4600_v26  ;;  %v4638_v36 = vsub.f32 %v371_v7, %v4554_v11  ;;  %v4641_v37 = vand.u32 4294901760, %v4610_v28  ;;  %s339_s28 = scalar_lea.vmem %s6473_s0, %s4354_s25  ;;  %s344_s13 = scalar_lea.vmem %s6474_s1, %s4364_s29 }
  0x12   : > { %405 = vmatprep.subr.mxu0 %v4554_v11  ;;  %v491_v39 = vsub.f32 %v4575_v19, %v490_v30  ;;  %v508_v40 = vand.u32 4294901760, %v4629_v32  ;;  %v4655_v41 = vsub.f32 %v370_v8, %v4556_v12  ;;  %v4658_v42 = vand.u32 4294901760, %v4615_v29  ;;  %v359_v51 = vld [vmem:[%s339_s28] sm:$0xff]  ;;  %s4450_s14 = smov 1   ;;  %s4451_s15 = smov 127  }
  0x13   : > { %407 = vmatpush1.msra.mxu0 %v4556_v12  ;;  %v497_v43 = vsub.f32 %v4594_v24, %v496_v34  ;;  %v503_v44 = vsub.f32 %v4600_v26, %v502_v35  ;;  %v514_v45 = vand.u32 4294901760, %v4638_v36  ;;  %v4674_v46 = vsub.f32 %v369_v13, %v4568_v16  ;;  %s4452_s16 = smov 112   ;;  %s4453_s22 = smov 16  }
  0x14   : > { %409 = vmatprep.subr.mxu0 %v4568_v16  ;;  %v492_v47 = vand.u32 4294901760, %v491_v39  ;;  %v509_v48 = vsub.f32 %v4629_v32, %v508_v40  ;;  %v520_v49 = vand.u32 4294901760, %v4655_v41  ;;  %v4682_v50 = vand.u32 4294901760, %v4646_v38 }
  0x15   : > { %411 = vmatpush1.msra.mxu0 %v4570_v17  ;;  %v498_v52 = vand.u32 4294901760, %v497_v43  ;;  %v504_v53 = vand.u32 4294901760, %v503_v44  ;;  %v515_v54 = vsub.f32 %v4638_v36, %v514_v45  ;;  %v526_v55 = vand.u32 4294901760, %v4674_v46 }
  0x16   : > { %413 = vmatprep.subr.mxu0 %v4572_v18  ;;  %493 = vmatprep.subr.mxu1 %v492_v47  ;;  %v510_v56 = vand.u32 4294901760, %v509_v48  ;;  %v521_v57 = vsub.f32 %v4655_v41, %v520_v49  ;;  %v4694_v58 = vsub.f32 %v368_v14, %v4570_v17  ;;  %v4697_v59 = vsub.f32 %v367_v15, %v4572_v18 }
  0x17   : > { %415 = vmatpush1.msra.mxu0 %v4591_v23  ;;  %499 = vmatpush1.msra.mxu1 %v498_v52  ;;  %v516_v60 = vand.u32 4294901760, %v515_v54  ;;  %v527_v61 = vsub.f32 %v4674_v46, %v526_v55  ;;  %v378_v62 = vsel %vm376_vm0, %v359_v51, 0  ;;  %v4705_v63 = vsub.f32 %v366_v20, %v4591_v23 }
  0x18   : > { %417 = vmatprep.subr.mxu0 %v4597_v25  ;;  %505 = vmatprep.subr.mxu1 %v504_v53  ;;  %v522_v0 = vand.u32 4294901760, %v521_v57  ;;  %v532_v1 = vand.u32 4294901760, %v4694_v58  ;;  %v538_v2 = vand.u32 4294901760, %v4697_v59  ;;  %v4710_v6 = vand.u32 4294901760, %v378_v62 }
  0x19   : > { %419 = vmatpush1.msra.mxu0 %v4626_v31  ;;  %511 = vmatpush1.msra.mxu1 %v510_v56  ;;  %v528_v7 = vand.u32 4294901760, %v527_v61  ;;  %v544_v8 = vand.u32 4294901760, %v4705_v63  ;;  %v4716_v13 = vsub.f32 %v4583_v21, %v4597_v25  ;;  %v4720_v14 = vsub.f32 %v4588_v22, %v4626_v31 }
  0x1a   : > { %421 = vmatprep.subr.mxu0 %v4632_v33  ;;  %517 = vmatprep.subr.mxu1 %v516_v60  ;;  %v533_v15 = vsub.f32 %v4694_v58, %v532_v1  ;;  %v539_v20 = vsub.f32 %v4697_v59, %v538_v2  ;;  %v4730_v39 = vsub.f32 %v378_v62, %v4710_v6  ;;  %vm1144_vm4 = vcmask 588800  }
  0x1b   : > { %423 = vmatpush1.msra.mxu0 %v4641_v37  ;;  %523 = vmatpush1.msra.mxu1 %v522_v0  ;;  %v545_v21 = vsub.f32 %v4705_v63, %v544_v8  ;;  %v550_v22 = vand.u32 4294901760, %v4716_v13  ;;  %v556_v43 = vand.u32 4294901760, %v4720_v14  ;;  %v4740_v44 = vsub.f32 %v4605_v27, %v4632_v33 }
  0x1c   : > { %425 = vmatprep.subr.mxu0 %v4658_v42  ;;  %529 = vmatprep.subr.mxu1 %v528_v7  ;;  %v534_v47 = vand.u32 4294901760, %v533_v15  ;;  %v540_v48 = vand.u32 4294901760, %v539_v20  ;;  %v463_v51 = vand.u32 4294901760, %v4730_v39  ;;  %v4746_v52 = vsub.f32 %v4610_v28, %v4641_v37 }
  0x1d   : > { %427 = vmatpush1.msra.mxu0 %v4682_v50  ;;  %v546_v53 = vand.u32 4294901760, %v545_v21  ;;  %v551_v54 = vsub.f32 %v4716_v13, %v550_v22  ;;  %v557_v27 = vsub.f32 %v4720_v14, %v556_v43  ;;  %v562_v56 = vand.u32 4294901760, %v4740_v44 }
  0x1e   : > { %535 = vmatpush1.msra.mxu1 %v534_v47  ;;  %642 = vmatprep.subr.mxu0 %v4575_v19  ;;  %v464_v28 = vsub.f32 %v4730_v39, %v463_v51  ;;  %v568_v57 = vand.u32 4294901760, %v4746_v52  ;;  %v4763_v60 = vsub.f32 %v4615_v29, %v4658_v42  ;;  %v4767_v61 = vsub.f32 %v4646_v38, %v4682_v50 }
  0x1f   : > { %541 = vmatprep.subr.mxu1 %v540_v48  ;;  %v552_v62 = vand.u32 4294901760, %v551_v54  ;;  %v558_v0 = vand.u32 4294901760, %v557_v27  ;;  %v563_v7 = vsub.f32 %v4740_v44, %v562_v56  ;;  %vm4223_vm6 = vcmask 1043456  }
  0x20   : > { %v465_v15 = vand.u32 4294901760, %v464_v28  ;;  %547 = vmatpush1.msra.mxu1 %v546_v53  ;;  %v569_v20 = vsub.f32 %v4746_v52, %v568_v57  ;;  %v574_v29 = vand.u32 4294901760, %v4763_v60  ;;  %v580_v21 = vand.u32 4294901760, %v4767_v61 }
  0x21   : > { %553 = vmatprep.subr.mxu1 %v552_v62  ;;  %v564_v38 = vand.u32 4294901760, %v563_v7 }
  0x22   : > { %466 = vmatmul.mubr.f32.vlgmr.msra.gmra.mxu0 %v465_v15  ;;  %559 = vmatpush1.msra.mxu1 %v558_v0  ;;  %v570_v47 = vand.u32 4294901760, %v569_v20  ;;  %v575_v48 = vsub.f32 %v4763_v60, %v574_v29  ;;  %v581_v53 = vsub.f32 %v4767_v61, %v580_v21 }
  0x23   : > { %645 = vmatpush1.msra.mxu0 %v4594_v24  ;;  %565 = vmatprep.subr.mxu1 %v564_v38 }
  0x24   : > { %648 = vmatprep.subr.mxu0 %v4600_v26  ;;  %571 = vmatpush1.msra.mxu1 %v570_v47  ;;  %v576_v54 = vand.u32 4294901760, %v575_v48  ;;  %v582_v27 = vand.u32 4294901760, %v581_v53 }
  0x25   : > { %651 = vmatpush1.msra.mxu0 %v4629_v32  ;;  %720 = vmatprep.mubr.f32.mxu0 %v6492_v9 }
  0x26   : > { %654 = vmatprep.subr.mxu0 %v4638_v36  ;;  %577 = vmatprep.subr.mxu1 %v576_v54 }
  0x27   : > { %657 = vmatpush1.msra.mxu0 %v4655_v41  ;;  %583 = vmatpush1.msra.mxu1 %v582_v27 }
  0x28   : > { %660 = vmatprep.subr.mxu0 %v4674_v46  ;;  %618 = vmatmul.mubr.f32.vlgmr.msra.gmra.mxu1 %v4710_v6  ;;  %v1033_v46 = vlaneseq }
  0x29   : > { %663 = vmatpush1.msra.mxu0 %v4694_v58  ;;  %746 = vmatprep.subr.mxu1 %v4535_v3 }
  0x2a   : > { %666 = vmatprep.subr.mxu0 %v4697_v59  ;;  %748 = vmatpush1.msra.mxu1 %v4537_v4  ;;  %v4359_v59 = vld [vmem:[%s6476_s3 + $0x1] ss:$4 sm:$0x3] }
  0x2b   : > { %669 = vmatpush1.msra.mxu0 %v4705_v63  ;;  %750 = vmatprep.subr.mxu1 %v4539_v5 }
  0x2c   : > { %672 = vmatprep.subr.mxu0 %v4716_v13  ;;  %752 = vmatpush1.msra.mxu1 %v4552_v10 }
  0x2d   : > { %675 = vmatpush1.msra.mxu0 %v4720_v14  ;;  %754 = vmatprep.subr.mxu1 %v4554_v11 }
  0x2e   : > { %678 = vmatprep.subr.mxu0 %v4740_v44  ;;  %756 = vmatpush1.msra.mxu1 %v4556_v12 }
  0x2f   : > { %681 = vmatpush1.msra.mxu0 %v4746_v52  ;;  %758 = vmatprep.subr.mxu1 %v4568_v16 }
  0x30   : > { %684 = vmatprep.subr.mxu0 %v4763_v60  ;;  %760 = vmatpush1.msra.mxu1 %v4570_v17 }
  0x31   : > { %687 = vmatpush1.msra.mxu0 %v4767_v61  ;;  %762 = vmatprep.subr.mxu1 %v4572_v18  ;;  %v4361_v61 = vld [vmem:[%s6476_s3 + $0x3] ss:$4 sm:$0x3] }
  0x32   : > { %723 = vmatmul.mubr.f32.vlgmr.msra.gmra.mxu0 %v4730_v39  ;;  %838 = vmatprep.subr.mxu0 %v490_v30 }
  0x33   : > { %764 = vmatpush1.msra.mxu1 %v4591_v23  ;;  %842 = vmatpush1.msra.mxu0 %v496_v34 }
  0x34   : > { %766 = vmatprep.subr.mxu1 %v4597_v25  ;;  %846 = vmatprep.subr.mxu0 %v502_v35 }
  0x35   : > { %768 = vmatpush1.msra.mxu1 %v4626_v31  ;;  %850 = vmatpush1.msra.mxu0 %v508_v40 }
  0x36   : > { %770 = vmatprep.subr.mxu1 %v4632_v33  ;;  %854 = vmatprep.subr.mxu0 %v514_v45 }
  0x37   : > { %772 = vmatpush1.msra.mxu1 %v4641_v37  ;;  %858 = vmatpush1.msra.mxu0 %v520_v49  ;;  %v1040_v49 = vshrl.u32 %v1033_v46, 7 }
  0x38   : > { %774 = vmatprep.subr.mxu1 %v4658_v42  ;;  %862 = vmatprep.subr.mxu0 %v526_v55 }
  0x39   : > { %776 = vmatpush1.msra.mxu1 %v4682_v50  ;;  %809 = vmatprep.mubr.f32.mxu1 %v6492_v9  ;;  %v1041_v55 = vsub.s32 0, %v1040_v49  ;;  %v4896_v58 = vsub.s32 1, %v1040_v49 }
  0x3a   : > { %866 = vmatpush1.msra.mxu0 %v532_v1  ;;  %813 = vmatmul.mubr.f32.vlgmr.msra.gmra.mxu1 %v463_v51 }
  0x3b   : > { %870 = vmatprep.subr.mxu0 %v538_v2  ;;  %956 = vmatprep.subr.mxu1 %v4535_v3  ;;  %v4902_v2 = vrot.slane %v4359_v59, %v1041_v55  ;;  %v4947_v15 = vrot.slane %v4361_v61, %v1041_v55  ;;  %v4950_v20 = vrot.slane %v4361_v61, %v4896_v58 }
  0x3c   : > { %874 = vmatpush1.msra.mxu0 %v544_v8  ;;  %958 = vmatpush1.msra.mxu1 %v4537_v4  ;;  %v350_v8 = vld [vmem:[%s6476_s3] ss:$4 sm:$0x3] }
  0x3d   : > { %878 = vmatprep.subr.mxu0 %v550_v22  ;;  %960 = vmatprep.subr.mxu1 %v4539_v5  ;;  %v4918_v44 = vrot.slane %v350_v8, %v4896_v58 }
  0x3e   : > { %882 = vmatpush1.msra.mxu0 %v556_v43  ;;  %962 = vmatpush1.msra.mxu1 %v4552_v10  ;;  %v4915_v43 = vrot.slane %v350_v8, %v1041_v55 }
  0x3f   : > { %886 = vmatprep.subr.mxu0 %v562_v56  ;;  %964 = vmatprep.subr.mxu1 %v4554_v11 }
  0x40   : > { %890 = vmatpush1.msra.mxu0 %v568_v57  ;;  %966 = vmatpush1.msra.mxu1 %v4556_v12 }
  0x41   : > { %894 = vmatprep.subr.mxu0 %v574_v29  ;;  %968 = vmatprep.subr.mxu1 %v4568_v16 }
  0x42   : > { %898 = vmatpush1.msra.mxu0 %v580_v21  ;;  %931 = vmatprep.mubr.f32.mxu0 %v6492_v9 }
  0x43   : > { %970 = vmatpush1.msra.mxu1 %v4570_v17  ;;  %933 = vmatmul.mubr.f32.vlgmr.msra.gmra.mxu0 %v4710_v6 }
  0x44   : > { %972 = vmatprep.subr.mxu1 %v4572_v18  ;;  %1019 = vmatprep.mubr.f32.mxu1 %v6492_v9 }
  0x45   : > { %974 = vmatpush1.msra.mxu1 %v4591_v23  ;;  %1230 = vmatprep.mubr.f32.mxu0 %v6492_v9 }
  0x46   : > { %976 = vmatprep.subr.mxu1 %v4597_v25 }
  0x47   : > { %978 = vmatpush1.msra.mxu1 %v4626_v31 }
  0x48   : > { %980 = vmatprep.subr.mxu1 %v4632_v33  ;;  %v357_v33 = vld [vmem:[%s344_s13] sm:$0xff] }
  0x49   : > { %982 = vmatpush1.msra.mxu1 %v4641_v37 }
  0x4a   : > { %984 = vmatprep.subr.mxu1 %v4658_v42  ;;  %v358_v42 = vld [vmem:[%s344_s13 + $0x8] sm:$0xff] }
  0x4b   : > { %986 = vmatpush1.msra.mxu1 %v4682_v50  ;;  %v4894_v50 = vand.u32 127, %v1033_v46 }
  0x4c   : > { %1021 = vmatmul.mubr.f32.vlgmr.msra.gmra.mxu1 %v4710_v6  ;;  %v4905_v6 = vrot.slane %v4359_v59, %v4896_v58 }
  0x4d   : > { %1396 = vmatprep.mubr.f32.mxu1 %v6492_v9  ;;  %vm1055_vm1 = vcmp.lt.s32.totalorder %v4894_v50, 127  ;;  %vm1035_vm2 = vcmp.lt.s32.totalorder %v4894_v50, 1  ;;  %vm1111_vm3 = vcmp.lt.s32.totalorder %v4894_v50, 112  ;;  %vm1075_vm5 = vcmp.lt.s32.totalorder %v4894_v50, 16 }
  0xe2   : > { %v467_v3 = vpop.f32.mrf.mxu0 }
  0xe4   : > { %v469_v4 = vpop.f32.mrf.mxu0 }
  0xe8   : > { %v619_v5 = vpop.f32.mrf.mxu1 }
  0xe9   : > { %v620_v17 = vadd.f32 %v619_v5, %v467_v3  ;;  %v1143_v3 = vld [vmem:[%s6477_s4] sm:$0xff] }
  0xea   : > { %v621_v11 = vpop.f32.mrf.mxu1 }
  0xeb   : > { %v622_v19 = vadd.f32 %v621_v11, %v469_v4 }
  0xf2   : > { %v724_v10 = vpop.f32.mrf.mxu0 }
  0xf3   : > { %v725_v23 = vadd.f32 %v724_v10, %v620_v17  ;;  %v4360_v10 = vld [vmem:[%s6476_s3 + $0x2] ss:$4 sm:$0x3] }
  0xf4   : > { %v726_v12 = vpop.f32.mrf.mxu0 }
  0xf5   : > { %v727_v25 = vadd.f32 %v726_v12, %v622_v19 }
  0xfa   : > { %v814_v16 = vpop.f32.mrf.mxu1 }
  0xfb   : > { %v815_v26 = vadd.f32 %v814_v16, %v725_v23  ;;  %v1146_v16 = vsel %vm1144_vm4, %v1143_v3, 0 }
  0xfc   : > { %v816_v24 = vpop.f32.mrf.mxu1 }
  0xfd   : > { %v817_v31 = vadd.f32 %v816_v24, %v727_v25  ;;  %v4996_v24 = vrot.slane %v4360_v10, %v1041_v55 }
 0x103   : > { %v934_v18 = vpop.f32.mrf.mxu0 }
 0x104   : > { %v935_v32 = vadd.f32 %v934_v18, %v815_v26 }
 0x105   : > { %v936_v30 = vpop.f32.mrf.mxu0 }
 0x106   : > { %v937_v35 = vadd.f32 %v936_v30, %v817_v31 }
 0x10c   : > { %v1022_v34 = vpop.f32.mrf.mxu1 }
 0x10d   : > { %v1023_v36 = vadd.f32 %v1022_v34, %v935_v32  ;;  %v5006_v34 = vand.u32 4294901760, %v1146_v16 }
 0x10e   : > { %v1024_v37 = vpop.f32.mrf.mxu1 }
 0x10f   : > { %v4878_v40 = vadd.f32 %v1023_v36, %v357_v33  ;;  %v1025_v41 = vadd.f32 %v1024_v37, %v937_v35  ;;  %v5012_v36 = vrot.slane %v4360_v10, %v4896_v58 }
 0x111   : > { %6537 = vst [vmem:[#allocation2_spill] sm:$0xff] %v4878_v40  ;;  %1029 = vrot.lane.b32.xlu1 %v4878_v40, %s4450_s14  ;;  %1051 = vrot.lane.b32.xlu0 %v4878_v40, %s4451_s15  ;;  %v4884_v45 = vadd.f32 %v1025_v41, %v358_v42  ;;  %v4945_v7 = vand.u32 4294901760, %v4878_v40  ;;  %6539 = vst [vmem:[#allocation4_spill] sm:$0xff] %v5012_v36 }
 0x113   : > { %6538 = vst [vmem:[#allocation3_spill] sm:$0xff] %v4884_v45  ;;  %v4957_v38 = vand.u32 4294901760, %v4884_v45  ;;  %v4963_v48 = vsub.f32 %v4878_v40, %v4945_v7 }
 0x115   : > { %1031 = vrot.lane.b32.xlu1 %v4884_v45, %s4450_s14  ;;  %1053 = vrot.lane.b32.xlu0 %v4884_v45, %s4451_s15  ;;  %v4976_v5 = vsub.f32 %v4884_v45, %v4957_v38  ;;  %v6484_v12 = vand.u32 4294901760, %v4963_v48 }
 0x117   : > { %v6485_v30 = vand.u32 4294901760, %v4976_v5  ;;  %v5019_v42 = vsub.f32 %v4963_v48, %v6484_v12 }
 0x119   : > { %1129 = vrot.lane.b32.xlu1 %v4884_v45, %s4452_s16  ;;  %1127 = vrot.lane.b32.xlu0 %v4878_v40, %s4452_s16 }
 0x183   : > { %v1030_v63 = vpop.permute.xlu1 %1029  ;;  %v1052_v1 = vpop.permute.xlu0 %1051 }
 0x187   : > { %v1032_v13 = vpop.permute.xlu1 %1031  ;;  %v1054_v14 = vpop.permute.xlu0 %1053 }
 0x188   : > { %v1056_v39 = vsel %vm1055_vm1, %v1052_v1, %v1054_v14  ;;  %v1057_v22 = vsel %vm1055_vm1, %v1054_v14, %v1052_v1  ;;  %v1036_v56 = vsel %vm1035_vm2, %v1030_v63, %v1032_v13  ;;  %v1037_v28 = vsel %vm1035_vm2, %v1032_v13, %v1030_v63 }
 0x189   : > { %v1069_v51 = vmul.f32 %v4902_v2, %v1056_v39  ;;  %v1070_v52 = vmul.f32 %v4905_v6, %v1057_v22  ;;  %v1049_v57 = vmul.f32 %v4915_v43, %v1037_v28  ;;  %v1050_v60 = vmul.f32 %v4918_v44, %v1036_v56 }
 0x18a   : > { %v5036_v13 = vsub.f32 %v4976_v5, %v6485_v30 }
 0x18b   : > { %1137 = vrot.lane.b32.xlu1 %v1070_v52, %s4452_s16  ;;  %1135 = vrot.lane.b32.xlu0 %v1069_v51, %s4452_s16  ;;  %v1130_v62 = vpop.permute.xlu1 %1129  ;;  %v1128_v0 = vpop.permute.xlu0 %1127  ;;  %v4959_v47 = vand.u32 4294901760, %v1070_v52  ;;  %v4967_v27 = vand.u32 4294901760, %v1069_v51  ;;  %v4972_v4 = vand.u32 4294901760, %v1050_v60  ;;  %v4981_v11 = vand.u32 4294901760, %v1049_v57 }
 0x18c   : > { %v1131_v29 = vsel %vm1111_vm3, %v1128_v0, %v1130_v62  ;;  %v1132_v21 = vsel %vm1111_vm3, %v1130_v62, %v1128_v0 }
 0x18d   : > { %v1133_v53 = vmul.f32 %v1131_v29, %v4947_v15  ;;  %v1134_v54 = vmul.f32 %v1132_v21, %v4950_v20  ;;  %v4990_v19 = vsub.f32 %v1070_v52, %v4959_v47  ;;  %v4993_v23 = vsub.f32 %v1069_v51, %v4967_v27 }
 0x18e   : > { %v5000_v31 = vsub.f32 %v1050_v60, %v4972_v4  ;;  %v5009_v35 = vsub.f32 %v1049_v57, %v4981_v11 }
 0x18f   : > { %1109 = vrot.lane.b32.xlu1 %v1050_v60, %s4452_s16  ;;  %1107 = vrot.lane.b32.xlu0 %v1049_v57, %s4452_s16  ;;  %v4985_v17 = vand.u32 4294901760, %v1134_v54  ;;  %v4987_v18 = vand.u32 4294901760, %v1133_v53  ;;  %v6487_v55 = vand.u32 4294901760, %v4990_v19  ;;  %v6486_v58 = vand.u32 4294901760, %v4993_v23 }
 0x190   : > { %v6483_v14 = vand.u32 4294901760, %v5000_v31 }
 0x191   : > { %v5022_v46 = vsub.f32 %v1134_v54, %v4985_v17  ;;  %v5025_v49 = vsub.f32 %v1133_v53, %v4987_v18  ;;  %v5062_v0 = vsub.f32 %v4990_v19, %v6487_v55  ;;  %v5067_v29 = vsub.f32 %v4993_v23, %v6486_v58 }
 0x193   : > { %1093 = vrot.lane.b32.xlu1 %v4884_v45, %s4453_s22  ;;  %1091 = vrot.lane.b32.xlu0 %v4878_v40, %s4453_s22  ;;  %v6488_v61 = vand.u32 4294901760, %v5025_v49  ;;  %v6489_v62 = vand.u32 4294901760, %v5022_v46 }
 0x197   : > { %1101 = vrot.lane.b32.xlu1 %v1070_v52, %s4453_s22  ;;  %1099 = vrot.lane.b32.xlu0 %v1069_v51, %s4453_s22  ;;  %v5044_v51 = vsub.f32 %v1146_v16, %v5006_v34  ;;  %v6494_v52 = vand.u32 4294901760, %v5009_v35 }
 0x199   : > { %v5130_v9 = vsub.f32 %v5009_v35, %v6494_v52 }
 0x19b   : > { %1073 = vrot.lane.b32.xlu1 %v1050_v60, %s4453_s22  ;;  %1071 = vrot.lane.b32.xlu0 %v1049_v57, %s4453_s22 }
 0x1fd   : > { %v1138_v25 = vpop.permute.xlu1 %1137  ;;  %v1136_v26 = vpop.permute.xlu0 %1135 }
 0x1fe   : > { %v1139_v32 = vsel %vm1111_vm3, %v1136_v26, %v1138_v25  ;;  %v1140_v33 = vsel %vm1111_vm3, %v1138_v25, %v1136_v26 }
 0x1ff   : > { %v1141_v37 = vmul.f32 %v1139_v32, %v4947_v15  ;;  %v1142_v41 = vmul.f32 %v1140_v33, %v4950_v20  ;;  %v5084_v32 = vsub.f32 %v5000_v31, %v6483_v14  ;;  %v6499_v33 = vand.u32 4294901760, %v5044_v51 }
 0x201   : > { %v5029_v59 = vand.u32 4294901760, %v1142_v41  ;;  %v5031_v63 = vand.u32 4294901760, %v1141_v37  ;;  %v1110_v1 = vpop.permute.xlu1 %1109  ;;  %v1108_v8 = vpop.permute.xlu0 %1107 }
 0x202   : > { %v1112_v39 = vsel %vm1111_vm3, %v1108_v8, %v1110_v1  ;;  %v1113_v22 = vsel %vm1111_vm3, %v1110_v1, %v1108_v8 }
 0x203   : > { %v5048_v56 = vsub.f32 %v1142_v41, %v5029_v59  ;;  %v5051_v28 = vsub.f32 %v1141_v37, %v5031_v63  ;;  %v1125_v57 = vmul.f32 %v4947_v15, %v1112_v39  ;;  %v1126_v60 = vmul.f32 %v4950_v20, %v1113_v22  ;;  %1163 = vmatprep.subr.mxu0 %v5029_v59 }
 0x204   : > { %1165 = vmatpush1.msra.mxu0 %v5031_v63 }
 0x205   : > { %v6490_v21 = vand.u32 4294901760, %v5051_v28  ;;  %v5070_v53 = vand.u32 4294901760, %v1126_v60  ;;  %v5072_v54 = vand.u32 4294901760, %v1125_v57  ;;  %v1094_v3 = vpop.permute.xlu1 %1093  ;;  %1167 = vmatprep.subr.mxu0 %v4985_v17  ;;  %v1092_v10 = vpop.permute.xlu0 %1091  ;;  %v6491_v16 = vand.u32 4294901760, %v5048_v56 }
 0x206   : > { %v1095_v25 = vsel %vm1075_vm5, %v1092_v10, %v1094_v3  ;;  %v1096_v26 = vsel %vm1075_vm5, %v1094_v3, %v1092_v10  ;;  %1169 = vmatpush1.msra.mxu0 %v4987_v18 }
 0x207   : > { %v5088_v37 = vsub.f32 %v1126_v60, %v5070_v53  ;;  %v5091_v41 = vsub.f32 %v1125_v57, %v5072_v54  ;;  %v1097_v1 = vmul.f32 %v1096_v26, %v4996_v24  ;;  %v1098_v8 = vmul.f32 %v1095_v25, %v5012_v36  ;;  %1171 = vmatprep.subr.mxu0 %v5070_v53 }
 0x208   : > { %1173 = vmatpush1.msra.mxu0 %v5072_v54  ;;  %v1259_v39 = vsub.f32 %v5048_v56, %v6491_v16  ;;  %v1265_v22 = vsub.f32 %v5051_v28, %v6490_v21  ;;  %v1271_v57 = vsub.f32 %v5022_v46, %v6489_v62  ;;  %v1277_v60 = vsub.f32 %v5025_v49, %v6488_v61 }
 0x209   : > { %v6495_v3 = vand.u32 4294901760, %v5091_v41  ;;  %v5110_v10 = vand.u32 4294901760, %v1098_v8  ;;  %v5112_v25 = vand.u32 4294901760, %v1097_v1  ;;  %v1102_v26 = vpop.permute.xlu1 %1101  ;;  %1175 = vmatprep.subr.mxu0 %v4959_v47  ;;  %v1100_v14 = vpop.permute.xlu0 %1099  ;;  %v6496_v12 = vand.u32 4294901760, %v5088_v37 }
 0x20a   : > { %v1103_v30 = vsel %vm1075_vm5, %v1100_v14, %v1102_v26  ;;  %v1104_v58 = vsel %vm1075_vm5, %v1102_v26, %v1100_v14  ;;  %1177 = vmatpush1.msra.mxu0 %v4967_v27  ;;  %v1260_v55 = vand.u32 4294901760, %v1259_v39  ;;  %v1266_v61 = vand.u32 4294901760, %v1265_v22 }
 0x20b   : > { %v5122_v62 = vsub.f32 %v1098_v8, %v5110_v10  ;;  %v1105_v21 = vmul.f32 %v1104_v58, %v4996_v24  ;;  %v1106_v16 = vmul.f32 %v1103_v30, %v5012_v36  ;;  %1179 = vmatprep.subr.mxu0 %v4957_v38  ;;  %v5133_v14 = vsub.f32 %v1097_v1, %v5112_v25 }
 0x20c   : > { %1261 = vmatprep.subr.mxu1 %v1260_v55  ;;  %1181 = vmatpush1.msra.mxu0 %v4945_v7  ;;  %v1272_v39 = vand.u32 4294901760, %v1271_v57  ;;  %v1283_v58 = vsub.f32 %v5088_v37, %v6496_v12  ;;  %v1289_v30 = vsub.f32 %v5091_v41, %v6495_v3  ;;  %v1278_v55 = vand.u32 4294901760, %v1277_v60 }
 0x20d   : > { %v5142_v8 = vand.u32 4294901760, %v1106_v16  ;;  %v5144_v22 = vand.u32 4294901760, %v1105_v21  ;;  %1267 = vmatpush1.msra.mxu1 %v1266_v61  ;;  %v1074_v26 = vpop.permute.xlu1 %1073  ;;  %v1072_v1 = vpop.permute.xlu0 %1071  ;;  %1183 = vmatprep.subr.mxu0 %v4972_v4  ;;  %v1234_v57 = vsub.f32 %v5044_v51, %v6499_v33  ;;  %v6500_v33 = vand.u32 4294901760, %v5133_v14 }
 0x20e   : > { %1273 = vmatprep.subr.mxu1 %v1272_v39  ;;  %v1076_v52 = vsel %vm1075_vm5, %v1072_v1, %v1074_v26  ;;  %v1077_v3 = vsel %vm1075_vm5, %v1074_v26, %v1072_v1  ;;  %1185 = vmatpush1.msra.mxu0 %v4981_v11  ;;  %v1284_v12 = vand.u32 4294901760, %v1283_v58  ;;  %v1290_v61 = vand.u32 4294901760, %v1289_v30 }
 0x20f   : > { %v5156_v45 = vsub.f32 %v1106_v16, %v5142_v8  ;;  %v5159_v60 = vsub.f32 %v1105_v21, %v5144_v22  ;;  %v1089_v40 = vmul.f32 %v4996_v24, %v1077_v3  ;;  %v1090_v39 = vmul.f32 %v5012_v36, %v1076_v52  ;;  %1279 = vmatpush1.msra.mxu1 %v1278_v55 }
 0x210   : > { %1187 = vmatprep.subr.mxu0 %v5142_v8  ;;  %1285 = vmatprep.subr.mxu1 %v1284_v12  ;;  %v1296_v26 = vand.u32 4294901760, %v5062_v0  ;;  %v1302_v58 = vand.u32 4294901760, %v5067_v29  ;;  %v1342_v16 = vand.u32 4294901760, %v5122_v62  ;;  %v1308_v12 = vand.u32 4294901760, %v5036_v13 }
 0x211   : > { %v1336_v30 = vand.u32 4294901760, %v5159_v60  ;;  %v5169_v21 = vand.u32 4294901760, %v1090_v39  ;;  %v5171_v1 = vand.u32 4294901760, %v1089_v40  ;;  %1189 = vmatpush1.msra.mxu0 %v5144_v22  ;;  %1291 = vmatpush1.msra.mxu1 %v1290_v61  ;;  %v1330_v52 = vand.u32 4294901760, %v5156_v45 }
 0x212   : > { %1191 = vmatprep.subr.mxu0 %v5110_v10  ;;  %1297 = vmatprep.subr.mxu1 %v1296_v26  ;;  %v1314_v0 = vand.u32 4294901760, %v5019_v42  ;;  %v1235_v55 = vand.u32 4294901760, %v1234_v57  ;;  %v1320_v13 = vand.u32 4294901760, %v5084_v32  ;;  %v1326_v42 = vand.u32 4294901760, %v5130_v9 }
 0x213   : > { %v5179_v29 = vsub.f32 %v1090_v39, %v5169_v21  ;;  %v5182_v3 = vsub.f32 %v1089_v40, %v5171_v1  ;;  %1193 = vmatpush1.msra.mxu0 %v5112_v25  ;;  %1303 = vmatpush1.msra.mxu1 %v1302_v58  ;;  %v1331_v61 = vsub.f32 %v5156_v45, %v1330_v52 }
 0x214   : > { %1195 = vmatprep.subr.mxu0 %v5169_v21  ;;  %1309 = vmatprep.subr.mxu1 %v1308_v12  ;;  %v1337_v40 = vsub.f32 %v5159_v60, %v1336_v30  ;;  %v1343_v39 = vsub.f32 %v5122_v62, %v1342_v16  ;;  %v1349_v32 = vsub.f32 %v5133_v14, %v6500_v33 }
 0x215   : > { %v1360_v57 = vand.u32 4294901760, %v5182_v3  ;;  %1197 = vmatpush1.msra.mxu0 %v5171_v1  ;;  %1315 = vmatpush1.msra.mxu1 %v1314_v0  ;;  %v1332_v26 = vand.u32 4294901760, %v1331_v61  ;;  %v1354_v9 = vand.u32 4294901760, %v5179_v29 }
 0x216   : > { %1321 = vmatprep.subr.mxu1 %v1320_v13  ;;  %1420 = vmatprep.subr.mxu0 %v5048_v56  ;;  %v1338_v58 = vand.u32 4294901760, %v1337_v40  ;;  %v1344_v61 = vand.u32 4294901760, %v1343_v39  ;;  %v1350_v13 = vand.u32 4294901760, %v1349_v32  ;;  %v6543_v39 = vand.u32 4294901760, %v5022_v46 }
 0x217   : > { %1236 = vmatmul.mubr.f32.vlgmr.msra.gmra.mxu0 %v1235_v55  ;;  %1327 = vmatpush1.msra.mxu1 %v1326_v42  ;;  %v1355_v12 = vsub.f32 %v5179_v29, %v1354_v9  ;;  %v1361_v0 = vsub.f32 %v5182_v3, %v1360_v57  ;;  %v6541_v55 = vand.u32 4294901760, %v5048_v56  ;;  %v6542_v42 = vand.u32 4294901760, %v5051_v28 }
 0x218   : > { %1423 = vmatpush1.msra.mxu0 %v5051_v28  ;;  %1333 = vmatprep.subr.mxu1 %v1332_v26  ;;  %v6544_v26 = vand.u32 4294901760, %v5025_v49  ;;  %v6545_v56 = vand.u32 4294901760, %v5088_v37  ;;  %v6546_v28 = vand.u32 4294901760, %v5091_v41  ;;  %v6550_v32 = vand.u32 4294901760, %v4976_v5 }
 0x219   : > { %1426 = vmatprep.subr.mxu0 %v5022_v46  ;;  %1339 = vmatpush1.msra.mxu1 %v1338_v58  ;;  %v1356_v33 = vand.u32 4294901760, %v1355_v12  ;;  %v1362_v40 = vand.u32 4294901760, %v1361_v0  ;;  %v6547_v46 = vand.u32 4294901760, %v4990_v19 }
 0x21a   : > { %1429 = vmatpush1.msra.mxu0 %v5025_v49  ;;  %1345 = vmatprep.subr.mxu1 %v1344_v61  ;;  %v6548_v49 = vand.u32 4294901760, %v4993_v23 }
 0x21b   : > { %1432 = vmatprep.subr.mxu0 %v5088_v37  ;;  %1351 = vmatpush1.msra.mxu1 %v1350_v13  ;;  %v6549_v37 = vand.u32 4294901760, %v5044_v51 }
 0x21c   : > { %1435 = vmatpush1.msra.mxu0 %v5091_v41  ;;  %1357 = vmatprep.subr.mxu1 %v1356_v33  ;;  %v6540_v33 = vmov 0.0   ;;  %v6551_v41 = vand.u32 4294901760, %v4963_v48 }
 0x21d   : > { %1438 = vmatprep.subr.mxu0 %v4990_v19  ;;  %1363 = vmatpush1.msra.mxu1 %v1362_v40  ;;  %v6552_v19 = vand.u32 4294901760, %v5000_v31 }
 0x21e   : > { %1441 = vmatpush1.msra.mxu0 %v4993_v23  ;;  %1398 = vmatmul.mubr.f32.vlgmr.msra.gmra.mxu1 %v5006_v34  ;;  %v6553_v23 = vand.u32 4294901760, %v5009_v35 }
 0x21f   : > { %1444 = vmatprep.subr.mxu0 %v4976_v5  ;;  %1528 = vmatprep.subr.mxu1 %v5029_v59 }
 0x220   : > { %1447 = vmatpush1.msra.mxu0 %v4963_v48  ;;  %1530 = vmatpush1.msra.mxu1 %v5031_v63  ;;  %v6554_v48 = vand.u32 4294901760, %v5133_v14 }
 0x221   : > { %1450 = vmatprep.subr.mxu0 %v5000_v31  ;;  %1532 = vmatprep.subr.mxu1 %v4985_v17 }
 0x222   : > { %1453 = vmatpush1.msra.mxu0 %v5009_v35  ;;  %1534 = vmatpush1.msra.mxu1 %v4987_v18 }
 0x223   : > { %1456 = vmatprep.subr.mxu0 %v5156_v45  ;;  %1536 = vmatprep.subr.mxu1 %v5070_v53 }
 0x224   : > { %1459 = vmatpush1.msra.mxu0 %v5159_v60  ;;  %1538 = vmatpush1.msra.mxu1 %v5072_v54 }
 0x225   : > { %1462 = vmatprep.subr.mxu0 %v5122_v62  ;;  %1540 = vmatprep.subr.mxu1 %v4959_v47 }
 0x226   : > { %1465 = vmatpush1.msra.mxu0 %v5133_v14  ;;  %1542 = vmatpush1.msra.mxu1 %v4967_v27 }
 0x227   : > { %1468 = vmatprep.subr.mxu0 %v5179_v29  ;;  %1544 = vmatprep.subr.mxu1 %v4957_v38 }
 0x228   : > { %1471 = vmatpush1.msra.mxu0 %v5182_v3  ;;  %1504 = vmatprep.mubr.f32.mxu0 %v6540_v33 }
 0x229   : > { %1546 = vmatpush1.msra.mxu1 %v4945_v7  ;;  %1507 = vmatmul.mubr.f32.vlgmr.msra.gmra.mxu0 %v5044_v51 }
 0x22a   : > { %1548 = vmatprep.subr.mxu1 %v4972_v4  ;;  %1622 = vmatprep.subr.mxu0 %v6541_v55 }
 0x22b   : > { %1550 = vmatpush1.msra.mxu1 %v4981_v11  ;;  %1626 = vmatpush1.msra.mxu0 %v6542_v42 }
 0x22c   : > { %1552 = vmatprep.subr.mxu1 %v5142_v8  ;;  %1630 = vmatprep.subr.mxu0 %v6543_v39 }
 0x22d   : > { %1554 = vmatpush1.msra.mxu1 %v5144_v22  ;;  %1634 = vmatpush1.msra.mxu0 %v6544_v26 }
 0x22e   : > { %1556 = vmatprep.subr.mxu1 %v5110_v10  ;;  %1638 = vmatprep.subr.mxu0 %v6545_v56 }
 0x22f   : > { %1558 = vmatpush1.msra.mxu1 %v5112_v25  ;;  %1642 = vmatpush1.msra.mxu0 %v6546_v28 }
 0x230   : > { %1560 = vmatprep.subr.mxu1 %v5169_v21  ;;  %1646 = vmatprep.subr.mxu0 %v6547_v46 }
 0x231   : > { %1562 = vmatpush1.msra.mxu1 %v5171_v1  ;;  %1595 = vmatprep.mubr.f32.mxu1 %v6540_v33 }
 0x232   : > { %1650 = vmatpush1.msra.mxu0 %v6548_v49  ;;  %1599 = vmatmul.mubr.f32.vlgmr.msra.gmra.mxu1 %v6549_v37 }
 0x233   : > { %1654 = vmatprep.subr.mxu0 %v6550_v32  ;;  %1746 = vmatprep.subr.mxu1 %v5029_v59 }
 0x234   : > { %1658 = vmatpush1.msra.mxu0 %v6551_v41  ;;  %1748 = vmatpush1.msra.mxu1 %v5031_v63 }
 0x235   : > { %1662 = vmatprep.subr.mxu0 %v6552_v19  ;;  %1750 = vmatprep.subr.mxu1 %v4985_v17 }
 0x236   : > { %1666 = vmatpush1.msra.mxu0 %v6553_v23  ;;  %1752 = vmatpush1.msra.mxu1 %v4987_v18 }
 0x237   : > { %1670 = vmatprep.subr.mxu0 %v1330_v52  ;;  %1754 = vmatprep.subr.mxu1 %v5070_v53 }
 0x238   : > { %1674 = vmatpush1.msra.mxu0 %v1336_v30  ;;  %1756 = vmatpush1.msra.mxu1 %v5072_v54  ;;  %v5314_v30 = vld [vmem:[%s6481_s8] sm:$0xff] }
 0x239   : > { %1678 = vmatprep.subr.mxu0 %v1342_v16  ;;  %1758 = vmatprep.subr.mxu1 %v4959_v47 }
 0x23a   : > { %1682 = vmatpush1.msra.mxu0 %v6554_v48  ;;  %1760 = vmatpush1.msra.mxu1 %v4967_v27 }
 0x23b   : > { %1686 = vmatprep.subr.mxu0 %v1354_v9  ;;  %1762 = vmatprep.subr.mxu1 %v4957_v38 }
 0x23c   : > { %1690 = vmatpush1.msra.mxu0 %v1360_v57  ;;  %1723 = vmatprep.mubr.f32.mxu0 %v6540_v33 }
 0x23d   : > { %1764 = vmatpush1.msra.mxu1 %v4945_v7  ;;  %1725 = vmatmul.mubr.f32.vlgmr.msra.gmra.mxu0 %v5006_v34 }
 0x23e   : > { %1766 = vmatprep.subr.mxu1 %v4972_v4  ;;  %1813 = vmatprep.mubr.f32.mxu1 %v6540_v33 }
 0x23f   : > { %1768 = vmatpush1.msra.mxu1 %v4981_v11  ;;  %2031 = vmatprep.mubr.f32.mxu0 %v6540_v33 }
 0x240   : > { %1770 = vmatprep.subr.mxu1 %v5142_v8 }
 0x241   : > { %1772 = vmatpush1.msra.mxu1 %v5144_v22 }
 0x242   : > { %1774 = vmatprep.subr.mxu1 %v5110_v10 }
 0x243   : > { %1776 = vmatpush1.msra.mxu1 %v5112_v25 }
 0x244   : > { %1778 = vmatprep.subr.mxu1 %v5169_v21  ;;  %v4454_v21 = vmov 0  }
 0x245   : > { %1780 = vmatpush1.msra.mxu1 %v5171_v1  ;;  %4411 = vset.pattern.permute.xlu0 %v4454_v21  ;;  %v4455_v1 = vmov 1  }
 0x246   : > { %1815 = vmatmul.mubr.f32.vlgmr.msra.gmra.mxu1 %v5006_v34  ;;  %4412 = vset.pattern.permute.xlu1 %v4455_v1 }
 0x247   : > { %2197 = vmatprep.mubr.f32.mxu1 %v6540_v33 }
 0x2d7   : > { %v1237_v45 = vpop.f32.mrf.mxu0 }
 0x2d9   : > { %v1239_v7 = vpop.f32.mrf.mxu0 }
 0x2de   : > { %v1399_v38 = vpop.f32.mrf.mxu1 }
 0x2df   : > { %v1400_v11 = vadd.f32 %v1399_v38, %v1237_v45 }
 0x2e0   : > { %v1401_v27 = vpop.f32.mrf.mxu1 }
 0x2e1   : > { %v1402_v18 = vadd.f32 %v1401_v27, %v1239_v7 }
 0x2e9   : > { %v1508_v47 = vpop.f32.mrf.mxu0 }
 0x2ea   : > { %v1509_v31 = vadd.f32 %v1508_v47, %v1400_v11 }
 0x2eb   : > { %v1510_v4 = vpop.f32.mrf.mxu0 }
 0x2ec   : > { %v1511_v59 = vadd.f32 %v1510_v4, %v1402_v18 }
 0x2f2   : > { %v1600_v5 = vpop.f32.mrf.mxu1 }
 0x2f3   : > { %v1601_v63 = vadd.f32 %v1600_v5, %v1509_v31 }
 0x2f4   : > { %v1602_v35 = vpop.f32.mrf.mxu1 }
 0x2f5   : > { %v1603_v62 = vadd.f32 %v1602_v35, %v1511_v59 }
 0x2fd   : > { %v1726_v17 = vpop.f32.mrf.mxu0 }
 0x2fe   : > { %v1727_v53 = vadd.f32 %v1726_v17, %v1601_v63 }
 0x2ff   : > { %v1728_v51 = vpop.f32.mrf.mxu0 }
 0x300   : > { %v1729_v54 = vadd.f32 %v1728_v51, %v1603_v62 }
 0x306   : > { %v1816_v34 = vpop.f32.mrf.mxu1 }
 0x307   : > { %v1817_v10 = vadd.f32 %v1816_v34, %v1727_v53 }
 0x308   : > { %v1818_v25 = vpop.f32.mrf.mxu1 }
 0x309   : > { %v1819_v14 = vadd.f32 %v1818_v25, %v1729_v54  ;;  %v1832_v22 = vmul.f32 %v1817_v10, %v1817_v10 }
 0x30b   : > { %v1822_v8 = vadd.f32 %v1819_v14, %v1817_v10  ;;  %v1833_v60 = vmul.f32 %v1819_v14, %v1819_v14 }
 0x30d   : > { %1823 = vadd.xlane.f32.xlu0 %v1822_v8  ;;  %v1834_v16 = vadd.f32 %v1833_v60, %v1832_v22 }
 0x30f   : > { %1835 = vadd.xlane.f32.xlu1 %v1834_v16 }
 0x320   : > { %1866 = vperm.xlu1 %4412, %v5314_v30  }
 0x323   : > { %1860 = vperm.xlu0 %4411, %v5314_v30  }
 0x396   : > { %v1824_v52 = vpop.xlane.xlu0 %1823 }
 0x397   : > { %v1825_v29 = vrot.slane %v1824_v52, 4 }
 0x398   : > { %v1836_v3 = vpop.xlane.xlu1 %1835 }
 0x399   : > { %v1826_v57 = vadd.f32 %v1825_v29, %v1824_v52  ;;  %v1837_v9 = vrot.slane %v1836_v3, 4 }
 0x39b   : > { %v1827_v58 = vrot.slane %v1826_v57, 2  ;;  %v1838_v12 = vadd.f32 %v1837_v9, %v1836_v3 }
 0x39c   : > { %v1867_v23 = vpop.permute.xlu1 %1866 }
 0x39d   : > { %v1839_v0 = vrot.slane %v1838_v12, 2  ;;  %v1828_v61 = vadd.f32 %v1827_v58, %v1826_v57 }
 0x39e   : > { %v1861_v32 = vpop.permute.xlu0 %1860 }
 0x39f   : > { %v1829_v13 = vrot.slane %v1828_v61, 1  ;;  %v1840_v40 = vadd.f32 %v1839_v0, %v1838_v12 }
 0x3a1   : > { %v1830_v55 = vadd.f32 %v1829_v13, %v1828_v61  ;;  %v1841_v42 = vrot.slane %v1840_v40, 1 }
 0x3a3   : > { %4366 = vpush %v1830_v55  ;;  %v1842_v39 = vadd.f32 %v1841_v42, %v1840_v40  ;;  %v1945_v40 = vld [vmem:[%s6478_s5] sm:$0xff] }
 0x3a5   : > { %4368 = vpush %v1842_v39 }
 0x3d4   : > { %s4367_s12 = spop %4366 }
 0x3d5   : > { %s1844_s13 = smul.f32 0.00048828125, %s4367_s12 }
 0x3d6   : > { %s4369_s18 = spop %4368 }
 0x3d7   : > { %s1846_s19 = smul.f32 %s1844_s13, %s1844_s13  ;;  %v1848_v28 = vstv %s1844_s13 }
 0x3d8   : > { %s1845_s20 = smul.f32 0.00048828125, %s4369_s18  ;;  %v1849_v46 = vsub.f32 %v1817_v10, %v1848_v28  ;;  %v1850_v49 = vsub.f32 %v1819_v14, %v1848_v28 }
 0x3da   : > { %s1847_s21 = ssub.f32 %s1845_s20, %s1846_s19 }
 0x3dc   : > { %s1851_s23 = sadd.f32 1e-05, %s1847_s21 }
 0x3de   : > { %v1852_v26 = vstv %s1851_s23 }
 0x3df   : > { %4420 = vrsqrt.f32 %v1852_v26 }
 0x3ec   : > { %v4421_v56 = vpop.eup %4420 }
 0x3ed   : > { %4370 = vpush %v4421_v56  ;;  %v1947_v56 = vsel %vm1144_vm4, %v1945_v40, 0 }
 0x41e   : > { %s4371_s17 = spop %4370 }
 0x41f   : > { %v1855_v37 = vstv %s4371_s17 }
 0x420   : > { %v1856_v41 = vmul.f32 %v1855_v37, %v1849_v46  ;;  %v1857_v19 = vmul.f32 %v1855_v37, %v1850_v49 }
 0x422   : > { %v1863_v48 = vmul.f32 %v1861_v32, %v1856_v41  ;;  %v1864_v45 = vmul.f32 %v1861_v32, %v1857_v19 }
 0x424   : > { %v1869_v7 = vadd.f32 %v1867_v23, %v1863_v48  ;;  %v1870_v38 = vadd.f32 %v1867_v23, %v1864_v45  ;;  %v5399_v45 = vand.u32 4294901760, %v1947_v56 }
 0x426   : > { %v1873_v47 = vmul.f32 0.70710677, %v1869_v7  ;;  %v1874_v27 = vmul.f32 0.70710677, %v1870_v38  ;;  %v1871_v11 = vmul.f32 0.5, %v1869_v7  ;;  %v1872_v35 = vmul.f32 0.5, %v1870_v38 }
 0x428   : > { %4422 = verf.f32 %v1873_v47 }
 0x429   : > { %4424 = verf.f32 %v1874_v27 }
 0x435   : > { %v4423_v4 = vpop.eup %4422 }
 0x436   : > { %v4425_v5 = vpop.eup %4424  ;;  %v1877_v17 = vadd.f32 1.0, %v4423_v4 }
 0x437   : > { %v1878_v18 = vadd.f32 1.0, %v4425_v5 }
 0x438   : > { %v1879_v31 = vmul.f32 %v1877_v17, %v1871_v11 }
 0x439   : > { %v1880_v59 = vmul.f32 %v1878_v18, %v1872_v35 }
 0x43a   : > { %1929 = vrot.lane.b32.xlu0 %v1879_v31, %s4452_s16  ;;  %1889 = vrot.lane.b32.xlu1 %v1879_v31, %s4451_s15  ;;  %v5352_v1 = vand.u32 4294901760, %v1879_v31 }
 0x43b   : > { %v5360_v9 = vand.u32 4294901760, %v1880_v59 }
 0x43c   : > { %v5366_v12 = vsub.f32 %v1879_v31, %v5352_v1 }
 0x43d   : > { %v5378_v39 = vsub.f32 %v1880_v59, %v5360_v9 }
 0x43e   : > { %1891 = vrot.lane.b32.xlu1 %v1880_v59, %s4451_s15  ;;  %v6501_v26 = vand.u32 4294901760, %v5366_v12 }
 0x43f   : > { %v6502_v41 = vand.u32 4294901760, %v5378_v39 }
 0x440   : > { %v5406_v47 = vsub.f32 %v5366_v12, %v6501_v26 }
 0x442   : > { %1881 = vrot.lane.b32.xlu1 %v1879_v31, %s4450_s14 }
 0x446   : > { %1883 = vrot.lane.b32.xlu1 %v1880_v59, %s4450_s14 }
 0x44a   : > { %1931 = vrot.lane.b32.xlu1 %v1880_v59, %s4452_s16 }
 0x4ac   : > { %v1890_v63 = vpop.permute.xlu1 %1889  ;;  %v1930_v52 = vpop.permute.xlu0 %1929 }
 0x4b0   : > { %v1892_v51 = vpop.permute.xlu1 %1891 }
 0x4b1   : > { %v1893_v62 = vsel %vm1055_vm1, %v1890_v63, %v1892_v51  ;;  %v1894_v34 = vsel %vm1055_vm1, %v1892_v51, %v1890_v63  ;;  %v5430_v63 = vsub.f32 %v5378_v39, %v6502_v41 }
 0x4b2   : > { %v1895_v53 = vmul.f32 %v1893_v62, %v4902_v2  ;;  %v1896_v10 = vmul.f32 %v1894_v34, %v4905_v6  ;;  %v5440_v34 = vsub.f32 %v1947_v56, %v5399_v45 }
 0x4b4   : > { %1937 = vrot.lane.b32.xlu1 %v1895_v53, %s4452_s16  ;;  %v1882_v54 = vpop.permute.xlu1 %1881  ;;  %v5350_v16 = vand.u32 4294901760, %v1896_v10  ;;  %v5354_v29 = vand.u32 4294901760, %v1895_v53 }
 0x4b6   : > { %v5363_v58 = vsub.f32 %v1896_v10, %v5350_v16  ;;  %v5371_v13 = vsub.f32 %v1895_v53, %v5354_v29 }
 0x4b8   : > { %1939 = vrot.lane.b32.xlu1 %v1896_v10, %s4452_s16  ;;  %v1884_v25 = vpop.permute.xlu1 %1883  ;;  %v6504_v42 = vand.u32 4294901760, %v5363_v58  ;;  %v6503_v49 = vand.u32 4294901760, %v5371_v13 }
 0x4b9   : > { %v1885_v14 = vsel %vm1035_vm2, %v1882_v54, %v1884_v25  ;;  %v1886_v8 = vsel %vm1035_vm2, %v1884_v25, %v1882_v54 }
 0x4ba   : > { %v5337_v22 = vmul.f32 %v1886_v8, %v4915_v43  ;;  %v1888_v60 = vmul.f32 %v1885_v14, %v4918_v44  ;;  %v5390_v32 = vsub.f32 %v5363_v58, %v6504_v42  ;;  %v5420_v11 = vsub.f32 %v5371_v13, %v6503_v49 }
 0x4bc   : > { %1921 = vrot.lane.b32.xlu0 %v5337_v22, %s4452_s16  ;;  %1923 = vrot.lane.b32.xlu1 %v1888_v60, %s4452_s16  ;;  %v1932_v21 = vpop.permute.xlu1 %1931  ;;  %v5397_v48 = vand.u32 4294901760, %v1888_v60  ;;  %v5415_v5 = vand.u32 4294901760, %v5337_v22 }
 0x4bd   : > { %v1933_v3 = vsel %vm1111_vm3, %v1930_v52, %v1932_v21  ;;  %v1934_v57 = vsel %vm1111_vm3, %v1932_v21, %v1930_v52 }
 0x4be   : > { %v1935_v0 = vmul.f32 %v1933_v3, %v4947_v15  ;;  %v1936_v61 = vmul.f32 %v1934_v57, %v4950_v20  ;;  %v5457_v52 = vsub.f32 %v5337_v22, %v5415_v5 }
 0x4c0   : > { %1905 = vrot.lane.b32.xlu0 %v1879_v31, %s4453_s22  ;;  %1907 = vrot.lane.b32.xlu1 %v1880_v59, %s4453_s22  ;;  %v5382_v28 = vand.u32 4294901760, %v1936_v61  ;;  %v5384_v46 = vand.u32 4294901760, %v1935_v0 }
 0x4c2   : > { %v5409_v27 = vsub.f32 %v1936_v61, %v5382_v28  ;;  %v5412_v4 = vsub.f32 %v1935_v0, %v5384_v46 }
 0x4c4   : > { %1913 = vrot.lane.b32.xlu0 %v1895_v53, %s4453_s22  ;;  %1915 = vrot.lane.b32.xlu1 %v1896_v10, %s4453_s22  ;;  %v5437_v53 = vsub.f32 %v1888_v60, %v5397_v48  ;;  %v6505_v8 = vand.u32 4294901760, %v5412_v4 }
 0x4c8   : > { %1897 = vrot.lane.b32.xlu0 %v5337_v22, %s4453_s22  ;;  %1899 = vrot.lane.b32.xlu1 %v1888_v60, %s4453_s22  ;;  %v6506_v60 = vand.u32 4294901760, %v5409_v27 }
 0x526   : > { %v1938_v55 = vpop.permute.xlu1 %1937 }
 0x52a   : > { %v1940_v37 = vpop.permute.xlu1 %1939 }
 0x52b   : > { %v1941_v19 = vsel %vm1111_vm3, %v1938_v55, %v1940_v37  ;;  %v1942_v23 = vsel %vm1111_vm3, %v1940_v37, %v1938_v55 }
 0x52c   : > { %v1943_v7 = vmul.f32 %v1941_v19, %v4947_v15  ;;  %v1944_v38 = vmul.f32 %v1942_v23, %v4950_v20  ;;  %v6511_v19 = vand.u32 4294901760, %v5440_v34 }
 0x52e   : > { %v5422_v17 = vand.u32 4294901760, %v1944_v38  ;;  %v5424_v18 = vand.u32 4294901760, %v1943_v7  ;;  %v1922_v31 = vpop.permute.xlu0 %1921  ;;  %v1924_v35 = vpop.permute.xlu1 %1923 }
 0x52f   : > { %v1925_v51 = vsel %vm1111_vm3, %v1922_v31, %v1924_v35  ;;  %v1926_v62 = vsel %vm1111_vm3, %v1924_v35, %v1922_v31 }
 0x530   : > { %v5443_v54 = vsub.f32 %v1944_v38, %v5422_v17  ;;  %v5446_v10 = vsub.f32 %v1943_v7, %v5424_v18  ;;  %v1927_v25 = vmul.f32 %v1925_v51, %v4947_v15  ;;  %v1928_v14 = vmul.f32 %v1926_v62, %v4950_v20  ;;  %1964 = vmatprep.subr.mxu0 %v5422_v17 }
 0x531   : > { %1966 = vmatpush1.msra.mxu0 %v5424_v18  ;;  %v2072_v62 = vsub.f32 %v5409_v27, %v6506_v60 }
 0x532   : > { %v6507_v3 = vand.u32 4294901760, %v5446_v10  ;;  %v5460_v57 = vand.u32 4294901760, %v1928_v14  ;;  %v5462_v0 = vand.u32 4294901760, %v1927_v25  ;;  %v1906_v61 = vpop.permute.xlu0 %1905  ;;  %1968 = vmatprep.subr.mxu0 %v5382_v28  ;;  %v1908_v40 = vpop.permute.xlu1 %1907  ;;  %v6508_v55 = vand.u32 4294901760, %v5443_v54 }
 0x533   : > { %v1909_v56 = vsel %vm1075_vm5, %v1906_v61, %v1908_v40  ;;  %v1910_v37 = vsel %vm1075_vm5, %v1908_v40, %v1906_v61  ;;  %1970 = vmatpush1.msra.mxu0 %v5384_v46 }
 0x534   : > { %v5474_v23 = vsub.f32 %v1928_v14, %v5460_v57  ;;  %v5477_v7 = vsub.f32 %v1927_v25, %v5462_v0  ;;  %v1911_v38 = vmul.f32 %v1910_v37, %v4996_v24  ;;  %v1912_v31 = vmul.f32 %v1909_v56, %v5012_v36  ;;  %1972 = vmatprep.subr.mxu0 %v5460_v57 }
 0x535   : > { %1974 = vmatpush1.msra.mxu0 %v5462_v0  ;;  %v2060_v35 = vsub.f32 %v5443_v54, %v6508_v55  ;;  %v2066_v51 = vsub.f32 %v5446_v10, %v6507_v3  ;;  %v2078_v25 = vsub.f32 %v5412_v4, %v6505_v8 }
 0x536   : > { %v6509_v14 = vand.u32 4294901760, %v5477_v7  ;;  %v5496_v61 = vand.u32 4294901760, %v1912_v31  ;;  %v5498_v40 = vand.u32 4294901760, %v1911_v38  ;;  %v1914_v56 = vpop.permute.xlu0 %1913  ;;  %1976 = vmatprep.subr.mxu0 %v5350_v16  ;;  %v1916_v37 = vpop.permute.xlu1 %1915  ;;  %v6510_v26 = vand.u32 4294901760, %v5474_v23 }
 0x537   : > { %v1917_v41 = vsel %vm1075_vm5, %v1914_v56, %v1916_v37  ;;  %v1918_v49 = vsel %vm1075_vm5, %v1916_v37, %v1914_v56  ;;  %1978 = vmatpush1.msra.mxu0 %v5354_v29  ;;  %v2061_v42 = vand.u32 4294901760, %v2060_v35  ;;  %v2067_v8 = vand.u32 4294901760, %v2066_v51 }
 0x538   : > { %v5508_v60 = vsub.f32 %v1912_v31, %v5496_v61  ;;  %v1919_v3 = vmul.f32 %v1918_v49, %v4996_v24  ;;  %v1920_v55 = vmul.f32 %v1917_v41, %v5012_v36  ;;  %1980 = vmatprep.subr.mxu0 %v5360_v9  ;;  %v5515_v59 = vsub.f32 %v1911_v38, %v5498_v40 }
 0x539   : > { %2062 = vmatprep.subr.mxu1 %v2061_v42  ;;  %1982 = vmatpush1.msra.mxu0 %v5352_v1  ;;  %v2073_v56 = vand.u32 4294901760, %v2072_v62  ;;  %v2084_v31 = vsub.f32 %v5474_v23, %v6510_v26  ;;  %v2090_v49 = vsub.f32 %v5477_v7, %v6509_v14  ;;  %v2079_v42 = vand.u32 4294901760, %v2078_v25 }
 0x53a   : > { %v5524_v41 = vand.u32 4294901760, %v1920_v55  ;;  %v5526_v35 = vand.u32 4294901760, %v1919_v3  ;;  %2068 = vmatpush1.msra.mxu1 %v2067_v8  ;;  %v1898_v51 = vpop.permute.xlu0 %1897  ;;  %v1900_v38 = vpop.permute.xlu1 %1899  ;;  %1984 = vmatprep.subr.mxu0 %v5397_v48  ;;  %v2035_v62 = vsub.f32 %v5440_v34, %v6511_v19 }
 0x53b   : > { %2074 = vmatprep.subr.mxu1 %v2073_v56  ;;  %v1901_v37 = vsel %vm1075_vm5, %v1898_v51, %v1900_v38  ;;  %v1902_v14 = vsel %vm1075_vm5, %v1900_v38, %v1898_v51  ;;  %1986 = vmatpush1.msra.mxu0 %v5415_v5  ;;  %v2085_v26 = vand.u32 4294901760, %v2084_v31  ;;  %v2091_v8 = vand.u32 4294901760, %v2090_v49 }
 0x53c   : > { %v5538_v21 = vsub.f32 %v1920_v55, %v5524_v41  ;;  %v5541_v25 = vsub.f32 %v1919_v3, %v5526_v35  ;;  %v1903_v22 = vmul.f32 %v1902_v14, %v4996_v24  ;;  %v1904_v56 = vmul.f32 %v1901_v37, %v5012_v36  ;;  %2080 = vmatpush1.msra.mxu1 %v2079_v42 }
 0x53d   : > { %1988 = vmatprep.subr.mxu0 %v5524_v41  ;;  %2086 = vmatprep.subr.mxu1 %v2085_v26  ;;  %v6555_v51 = vand.u32 4294901760, %v5437_v53  ;;  %v6556_v55 = vand.u32 4294901760, %v5457_v52  ;;  %v6557_v37 = vand.u32 4294901760, %v5390_v32  ;;  %v2036_v14 = vand.u32 4294901760, %v2035_v62 }
 0x53e   : > { %v5555_v38 = vand.u32 4294901760, %v1904_v56  ;;  %v5557_v42 = vand.u32 4294901760, %v1903_v22  ;;  %1990 = vmatpush1.msra.mxu0 %v5526_v35  ;;  %2092 = vmatpush1.msra.mxu1 %v2091_v8  ;;  %v2131_v26 = vand.u32 4294901760, %v5538_v21  ;;  %v6558_v8 = vand.u32 4294901760, %v5420_v11 }
 0x53f   : > { %v2120_v31 = vsub.f32 %v5437_v53, %v6555_v51  ;;  %v2126_v49 = vsub.f32 %v5457_v52, %v6556_v55  ;;  %1992 = vmatprep.subr.mxu0 %v5496_v61  ;;  %2098 = vmatprep.subr.mxu1 %v6557_v37  ;;  %v2109_v51 = vand.u32 4294901760, %v5430_v63  ;;  %v2115_v55 = vand.u32 4294901760, %v5406_v47 }
 0x540   : > { %v5567_v19 = vsub.f32 %v1904_v56, %v5555_v38  ;;  %v5570_v3 = vsub.f32 %v1903_v22, %v5557_v42  ;;  %1994 = vmatpush1.msra.mxu0 %v5498_v40  ;;  %2104 = vmatpush1.msra.mxu1 %v6558_v8  ;;  %v2132_v32 = vsub.f32 %v5538_v21, %v2131_v26  ;;  %v6559_v56 = vand.u32 4294901760, %v5541_v25 }
 0x541   : > { %1996 = vmatprep.subr.mxu0 %v5555_v38  ;;  %2110 = vmatprep.subr.mxu1 %v2109_v51  ;;  %v2121_v47 = vand.u32 4294901760, %v2120_v31  ;;  %v2127_v63 = vand.u32 4294901760, %v2126_v49  ;;  %v6560_v37 = vand.u32 4294901760, %v5508_v60  ;;  %v6561_v8 = vand.u32 4294901760, %v5515_v59 }
 0x542   : > { %v2138_v22 = vsub.f32 %v5541_v25, %v6559_v56  ;;  %v2161_v11 = vand.u32 4294901760, %v5570_v3  ;;  %1998 = vmatpush1.msra.mxu0 %v5557_v42  ;;  %2116 = vmatpush1.msra.mxu1 %v2115_v55  ;;  %v2133_v62 = vand.u32 4294901760, %v2132_v32  ;;  %v2155_v31 = vand.u32 4294901760, %v5567_v19 }
 0x543   : > { %v2144_v36 = vsub.f32 %v5508_v60, %v6560_v37  ;;  %v2150_v51 = vsub.f32 %v5515_v59, %v6561_v8  ;;  %2122 = vmatprep.subr.mxu1 %v2121_v47  ;;  %2221 = vmatprep.subr.mxu0 %v5443_v54  ;;  %v6571_v8 = vand.u32 4294901760, %v5378_v39 }
 0x544   : > { %v2139_v49 = vand.u32 4294901760, %v2138_v22  ;;  %2037 = vmatmul.mubr.f32.vlgmr.msra.gmra.mxu0 %v2036_v14  ;;  %2128 = vmatpush1.msra.mxu1 %v2127_v63  ;;  %v2156_v56 = vsub.f32 %v5567_v19, %v2155_v31  ;;  %v2162_v55 = vsub.f32 %v5570_v3, %v2161_v11  ;;  %v6563_v14 = vand.u32 4294901760, %v5446_v10 }
 0x545   : > { %2224 = vmatpush1.msra.mxu0 %v5446_v10  ;;  %2134 = vmatprep.subr.mxu1 %v2133_v62  ;;  %v2145_v32 = vand.u32 4294901760, %v2144_v36  ;;  %v2151_v47 = vand.u32 4294901760, %v2150_v51  ;;  %v6562_v36 = vand.u32 4294901760, %v5443_v54  ;;  %v6564_v63 = vand.u32 4294901760, %v5409_v27 }
 0x546   : > { %2227 = vmatprep.subr.mxu0 %v5409_v27  ;;  %2140 = vmatpush1.msra.mxu1 %v2139_v49  ;;  %v2157_v37 = vand.u32 4294901760, %v2156_v56  ;;  %v2163_v22 = vand.u32 4294901760, %v2162_v55  ;;  %v6565_v62 = vand.u32 4294901760, %v5412_v4  ;;  %v6566_v54 = vand.u32 4294901760, %v5474_v23 }
 0x547   : > { %2230 = vmatpush1.msra.mxu0 %v5412_v4  ;;  %2146 = vmatprep.subr.mxu1 %v2145_v32  ;;  %v6567_v10 = vand.u32 4294901760, %v5477_v7  ;;  %v6568_v27 = vand.u32 4294901760, %v5363_v58  ;;  %v6569_v4 = vand.u32 4294901760, %v5371_v13 }
 0x548   : > { %2233 = vmatprep.subr.mxu0 %v5474_v23  ;;  %2152 = vmatpush1.msra.mxu1 %v2151_v47  ;;  %v6570_v23 = vand.u32 4294901760, %v5440_v34 }
 0x549   : > { %2236 = vmatpush1.msra.mxu0 %v5477_v7  ;;  %2158 = vmatprep.subr.mxu1 %v2157_v37  ;;  %v6572_v7 = vand.u32 4294901760, %v5366_v12 }
 0x54a   : > { %2239 = vmatprep.subr.mxu0 %v5363_v58  ;;  %2164 = vmatpush1.msra.mxu1 %v2163_v22  ;;  %v6573_v58 = vand.u32 4294901760, %v5437_v53 }
 0x54b   : > { %2242 = vmatpush1.msra.mxu0 %v5371_v13  ;;  %2199 = vmatmul.mubr.f32.vlgmr.msra.gmra.mxu1 %v5399_v45  ;;  %v6574_v13 = vand.u32 4294901760, %v5457_v52 }
 0x54c   : > { %2245 = vmatprep.subr.mxu0 %v5378_v39  ;;  %2329 = vmatprep.subr.mxu1 %v5422_v17  ;;  %v6576_v39 = vand.u32 4294901760, %v5508_v60 }
 0x54d   : > { %2248 = vmatpush1.msra.mxu0 %v5366_v12  ;;  %2331 = vmatpush1.msra.mxu1 %v5424_v18  ;;  %v6575_v12 = vand.u32 4294901760, %v5541_v25 }
 0x54e   : > { %2251 = vmatprep.subr.mxu0 %v5437_v53  ;;  %2333 = vmatprep.subr.mxu1 %v5382_v28 }
 0x54f   : > { %2254 = vmatpush1.msra.mxu0 %v5457_v52  ;;  %2335 = vmatpush1.msra.mxu1 %v5384_v46 }
 0x550   : > { %2257 = vmatprep.subr.mxu0 %v5538_v21  ;;  %2337 = vmatprep.subr.mxu1 %v5460_v57 }
 0x551   : > { %2260 = vmatpush1.msra.mxu0 %v5541_v25  ;;  %2339 = vmatpush1.msra.mxu1 %v5462_v0 }
 0x552   : > { %2263 = vmatprep.subr.mxu0 %v5508_v60  ;;  %2341 = vmatprep.subr.mxu1 %v5350_v16 }
 0x553   : > { %2266 = vmatpush1.msra.mxu0 %v5515_v59  ;;  %2343 = vmatpush1.msra.mxu1 %v5354_v29 }
 0x554   : > { %2269 = vmatprep.subr.mxu0 %v5567_v19  ;;  %2345 = vmatprep.subr.mxu1 %v5360_v9 }
 0x555   : > { %2272 = vmatpush1.msra.mxu0 %v5570_v3  ;;  %2305 = vmatprep.mubr.f32.mxu0 %v6540_v33 }
 0x556   : > { %2347 = vmatpush1.msra.mxu1 %v5352_v1  ;;  %2308 = vmatmul.mubr.f32.vlgmr.msra.gmra.mxu0 %v5440_v34 }
 0x557   : > { %2349 = vmatprep.subr.mxu1 %v5397_v48  ;;  %2423 = vmatprep.subr.mxu0 %v6562_v36 }
 0x558   : > { %2351 = vmatpush1.msra.mxu1 %v5415_v5  ;;  %2427 = vmatpush1.msra.mxu0 %v6563_v14 }
 0x559   : > { %2353 = vmatprep.subr.mxu1 %v5524_v41  ;;  %2431 = vmatprep.subr.mxu0 %v6564_v63 }
 0x55a   : > { %2355 = vmatpush1.msra.mxu1 %v5526_v35  ;;  %2435 = vmatpush1.msra.mxu0 %v6565_v62 }
 0x55b   : > { %2357 = vmatprep.subr.mxu1 %v5496_v61  ;;  %2439 = vmatprep.subr.mxu0 %v6566_v54 }
 0x55c   : > { %2359 = vmatpush1.msra.mxu1 %v5498_v40  ;;  %2443 = vmatpush1.msra.mxu0 %v6567_v10 }
 0x55d   : > { %2361 = vmatprep.subr.mxu1 %v5555_v38  ;;  %2447 = vmatprep.subr.mxu0 %v6568_v27 }
 0x55e   : > { %2363 = vmatpush1.msra.mxu1 %v5557_v42  ;;  %2396 = vmatprep.mubr.f32.mxu1 %v6540_v33 }
 0x55f   : > { %2451 = vmatpush1.msra.mxu0 %v6569_v4  ;;  %2400 = vmatmul.mubr.f32.vlgmr.msra.gmra.mxu1 %v6570_v23 }
 0x560   : > { %2455 = vmatprep.subr.mxu0 %v6571_v8  ;;  %2547 = vmatprep.subr.mxu1 %v5422_v17 }
 0x561   : > { %2459 = vmatpush1.msra.mxu0 %v6572_v7  ;;  %2549 = vmatpush1.msra.mxu1 %v5424_v18 }
 0x562   : > { %2463 = vmatprep.subr.mxu0 %v6573_v58  ;;  %2551 = vmatprep.subr.mxu1 %v5382_v28  ;;  %v6577_v28 = vand.u32 4294901760, %v5515_v59 }
 0x563   : > { %2467 = vmatpush1.msra.mxu0 %v6574_v13  ;;  %2553 = vmatpush1.msra.mxu1 %v5384_v46 }
 0x564   : > { %2471 = vmatprep.subr.mxu0 %v2131_v26  ;;  %2555 = vmatprep.subr.mxu1 %v5460_v57  ;;  %v4457_v26 = vmov 3  }
 0x565   : > { %2475 = vmatpush1.msra.mxu0 %v6575_v12  ;;  %2557 = vmatpush1.msra.mxu1 %v5462_v0 }
 0x566   : > { %2479 = vmatprep.subr.mxu0 %v6576_v39  ;;  %2559 = vmatprep.subr.mxu1 %v5350_v16 }
 0x567   : > { %2483 = vmatpush1.msra.mxu0 %v6577_v28  ;;  %2561 = vmatpush1.msra.mxu1 %v5354_v29 }
 0x568   : > { %2487 = vmatprep.subr.mxu0 %v2155_v31  ;;  %2563 = vmatprep.subr.mxu1 %v5360_v9 }
 0x569   : > { %2491 = vmatpush1.msra.mxu0 %v2161_v11  ;;  %2524 = vmatprep.mubr.f32.mxu0 %v6540_v33 }
 0x56a   : > { %2565 = vmatpush1.msra.mxu1 %v5352_v1  ;;  %2526 = vmatmul.mubr.f32.vlgmr.msra.gmra.mxu0 %v5399_v45 }
 0x56b   : > { %2567 = vmatprep.subr.mxu1 %v5397_v48  ;;  %2614 = vmatprep.mubr.f32.mxu1 %v6540_v33 }
 0x56c   : > { %2569 = vmatpush1.msra.mxu1 %v5415_v5  ;;  %2832 = vmatprep.mubr.f32.mxu0 %v6540_v33 }
 0x56d   : > { %2571 = vmatprep.subr.mxu1 %v5524_v41  ;;  %4414 = vset.pattern.permute.xlu1 %v4457_v26 }
 0x56e   : > { %2573 = vmatpush1.msra.mxu1 %v5526_v35 }
 0x56f   : > { %2575 = vmatprep.subr.mxu1 %v5496_v61 }
 0x570   : > { %2577 = vmatpush1.msra.mxu1 %v5498_v40 }
 0x571   : > { %2579 = vmatprep.subr.mxu1 %v5555_v38 }
 0x572   : > { %2581 = vmatpush1.msra.mxu1 %v5557_v42  ;;  %v4456_v42 = vmov 2  }
 0x573   : > { %2616 = vmatmul.mubr.f32.vlgmr.msra.gmra.mxu1 %v5399_v45  ;;  %4413 = vset.pattern.permute.xlu0 %v4456_v42 }
 0x574   : > { %2998 = vmatprep.mubr.f32.mxu1 %v6540_v33 }
 0x604   : > { %v2038_v16 = vpop.f32.mrf.mxu0 }
 0x606   : > { %v2040_v1 = vpop.f32.mrf.mxu0 }
 0x60b   : > { %v2200_v29 = vpop.f32.mrf.mxu1 }
 0x60c   : > { %v2201_v17 = vadd.f32 %v2200_v29, %v2038_v16 }
 0x60d   : > { %v2202_v46 = vpop.f32.mrf.mxu1 }
 0x60e   : > { %v2203_v59 = vadd.f32 %v2202_v46, %v2040_v1  ;;  %v6578_v1 = vld [vmem:[#allocation2_spill] sm:$0xff] }
 0x616   : > { %v2309_v9 = vpop.f32.mrf.mxu0 }
 0x617   : > { %v2310_v53 = vadd.f32 %v2309_v9, %v2201_v17  ;;  %v6579_v9 = vld [vmem:[#allocation3_spill] sm:$0xff] }
 0x618   : > { %v2311_v48 = vpop.f32.mrf.mxu0 }
 0x619   : > { %v2312_v60 = vadd.f32 %v2311_v48, %v2203_v59 }
 0x61f   : > { %v2401_v5 = vpop.f32.mrf.mxu1 }
 0x620   : > { %v2402_v21 = vadd.f32 %v2401_v5, %v2310_v53 }
 0x621   : > { %v2403_v34 = vpop.f32.mrf.mxu1 }
 0x622   : > { %v2404_v57 = vadd.f32 %v2403_v34, %v2312_v60 }
 0x62a   : > { %v2527_v18 = vpop.f32.mrf.mxu0 }
 0x62b   : > { %v2528_v0 = vadd.f32 %v2527_v18, %v2402_v21 }
 0x62c   : > { %v2529_v52 = vpop.f32.mrf.mxu0 }
 0x62d   : > { %v2530_v19 = vadd.f32 %v2529_v52, %v2404_v57 }
 0x633   : > { %v2617_v45 = vpop.f32.mrf.mxu1 }
 0x634   : > { %v2618_v61 = vadd.f32 %v2617_v45, %v2528_v0 }
 0x635   : > { %v2619_v40 = vpop.f32.mrf.mxu1 }
 0x636   : > { %v2620_v41 = vadd.f32 %v2619_v40, %v2530_v19  ;;  %v2632_v25 = vmul.f32 %v2618_v61, %v2618_v61 }
 0x638   : > { %v2622_v35 = vadd.f32 %v2620_v41, %v2618_v61  ;;  %v2633_v3 = vmul.f32 %v2620_v41, %v2620_v41 }
 0x63a   : > { %2623 = vadd.xlane.f32.xlu0 %v2622_v35  ;;  %v2634_v38 = vadd.f32 %v2633_v3, %v2632_v25 }
 0x63c   : > { %2635 = vadd.xlane.f32.xlu1 %v2634_v38 }
 0x64d   : > { %2665 = vperm.xlu1 %4414, %v5314_v30  }
 0x650   : > { %2659 = vperm.xlu0 %4413, %v5314_v30  }
 0x6c3   : > { %v2624_v11 = vpop.xlane.xlu0 %2623 }
 0x6c4   : > { %v2625_v51 = vrot.slane %v2624_v11, 4 }
 0x6c5   : > { %v2636_v31 = vpop.xlane.xlu1 %2635 }
 0x6c6   : > { %v2626_v49 = vadd.f32 %v2625_v51, %v2624_v11  ;;  %v2637_v56 = vrot.slane %v2636_v31, 4 }
 0x6c8   : > { %v2627_v55 = vrot.slane %v2626_v49, 2  ;;  %v2638_v32 = vadd.f32 %v2637_v56, %v2636_v31 }
 0x6c9   : > { %v2666_v13 = vpop.permute.xlu1 %2665 }
 0x6ca   : > { %v2639_v47 = vrot.slane %v2638_v32, 2  ;;  %v2628_v37 = vadd.f32 %v2627_v55, %v2626_v49 }
 0x6cb   : > { %v2660_v8 = vpop.permute.xlu0 %2659 }
 0x6cc   : > { %v2629_v22 = vrot.slane %v2628_v37, 1  ;;  %v2640_v36 = vadd.f32 %v2639_v47, %v2638_v32 }
 0x6ce   : > { %v2630_v14 = vadd.f32 %v2629_v22, %v2628_v37  ;;  %v2641_v63 = vrot.slane %v2640_v36, 1 }
 0x6d0   : > { %4372 = vpush %v2630_v14  ;;  %v2642_v62 = vadd.f32 %v2641_v63, %v2640_v36 }
 0x6d2   : > { %4374 = vpush %v2642_v62 }
 0x701   : > { %s4373_s27 = spop %4372 }
 0x702   : > { %s2644_s28 = smul.f32 0.00048828125, %s4373_s27 }
 0x703   : > { %s4375_s29 = spop %4374 }
 0x704   : > { %s2646_s11 = smul.f32 %s2644_s28, %s2644_s28  ;;  %v2648_v10 = vstv %s2644_s28 }
 0x705   : > { %s2645_s12 = smul.f32 0.00048828125, %s4375_s29  ;;  %v2649_v27 = vsub.f32 %v2618_v61, %v2648_v10  ;;  %v2650_v4 = vsub.f32 %v2620_v41, %v2648_v10  ;;  %v2746_v10 = vld [vmem:[%s6479_s6] sm:$0xff] }
 0x707   : > { %s2647_s13 = ssub.f32 %s2645_s12, %s2646_s11 }
 0x709   : > { %s2651_s18 = sadd.f32 1e-05, %s2647_s13 }
 0x70b   : > { %v2652_v30 = vstv %s2651_s18 }
 0x70c   : > { %4426 = vrsqrt.f32 %v2652_v30 }
 0x719   : > { %v4427_v54 = vpop.eup %4426 }
 0x71a   : > { %4376 = vpush %v4427_v54 }
 0x74b   : > { %s4377_s19 = spop %4376 }
 0x74c   : > { %v2655_v23 = vstv %s4377_s19 }
 0x74d   : > { %v2656_v7 = vmul.f32 %v2655_v23, %v2649_v27  ;;  %v2657_v58 = vmul.f32 %v2655_v23, %v2650_v4 }
 0x74f   : > { %v2662_v12 = vmul.f32 %v2660_v8, %v2656_v7  ;;  %v2663_v39 = vmul.f32 %v2660_v8, %v2657_v58 }
 0x751   : > { %v2668_v28 = vadd.f32 %v2666_v13, %v2662_v12  ;;  %v2669_v16 = vadd.f32 %v2666_v13, %v2663_v39 }
 0x753   : > { %v2670_v29 = vadd.f32 %v2668_v28, %v6578_v1  ;;  %v2671_v46 = vadd.f32 %v2669_v16, %v6579_v9  ;;  %v2748_v16 = vsel %vm1144_vm4, %v2746_v10, 0 }
 0x755   : > { %v2674_v48 = vmul.f32 0.70710677, %v2670_v29  ;;  %v2675_v5 = vmul.f32 0.70710677, %v2671_v46  ;;  %v2672_v59 = vmul.f32 0.5, %v2670_v29  ;;  %v2673_v34 = vmul.f32 0.5, %v2671_v46 }
 0x757   : > { %4428 = verf.f32 %v2674_v48 }
 0x758   : > { %4430 = verf.f32 %v2675_v5 }
 0x764   : > { %v4429_v17 = vpop.eup %4428 }
 0x765   : > { %v4431_v18 = vpop.eup %4430  ;;  %v2678_v53 = vadd.f32 1.0, %v4429_v17  ;;  %v5802_v17 = vand.u32 4294901760, %v2748_v16 }
 0x766   : > { %v2679_v60 = vadd.f32 1.0, %v4431_v18 }
 0x767   : > { %v2680_v21 = vmul.f32 %v2678_v53, %v2672_v59 }
 0x768   : > { %v2681_v52 = vmul.f32 %v2679_v60, %v2673_v34 }
 0x769   : > { %2690 = vrot.lane.b32.xlu1 %v2680_v21, %s4451_s15  ;;  %v5745_v55 = vand.u32 4294901760, %v2680_v21 }
 0x76a   : > { %2732 = vrot.lane.b32.xlu0 %v2681_v52, %s4452_s16  ;;  %v5747_v32 = vand.u32 4294901760, %v2681_v52 }
 0x76b   : > { %v5756_v36 = vsub.f32 %v2680_v21, %v5745_v55 }
 0x76c   : > { %v5770_v23 = vsub.f32 %v2681_v52, %v5747_v32 }
 0x76d   : > { %2692 = vrot.lane.b32.xlu1 %v2681_v52, %s4451_s15  ;;  %v6514_v13 = vand.u32 4294901760, %v5756_v36 }
 0x76e   : > { %v6516_v9 = vand.u32 4294901760, %v5770_v23 }
 0x771   : > { %2682 = vrot.lane.b32.xlu1 %v2680_v21, %s4450_s14 }
 0x775   : > { %2684 = vrot.lane.b32.xlu1 %v2681_v52, %s4450_s14 }
 0x779   : > { %2730 = vrot.lane.b32.xlu1 %v2680_v21, %s4452_s16 }
 0x7db   : > { %v2691_v57 = vpop.permute.xlu1 %2690 }
 0x7dc   : > { %v2733_v11 = vpop.permute.xlu0 %2732 }
 0x7df   : > { %v2693_v0 = vpop.permute.xlu1 %2692 }
 0x7e0   : > { %v2694_v45 = vsel %vm1055_vm1, %v2691_v57, %v2693_v0  ;;  %v2695_v19 = vsel %vm1055_vm1, %v2693_v0, %v2691_v57 }
 0x7e1   : > { %v2696_v61 = vmul.f32 %v2694_v45, %v4902_v2  ;;  %v2697_v40 = vmul.f32 %v2695_v19, %v4905_v6 }
 0x7e3   : > { %2740 = vrot.lane.b32.xlu0 %v2697_v40, %s4452_s16  ;;  %2738 = vrot.lane.b32.xlu1 %v2696_v61, %s4452_s16  ;;  %v2683_v41 = vpop.permute.xlu1 %2682  ;;  %v5753_v22 = vand.u32 4294901760, %v2697_v40  ;;  %v5758_v62 = vand.u32 4294901760, %v2696_v61 }
 0x7e5   : > { %v5779_v58 = vsub.f32 %v2697_v40, %v5753_v22  ;;  %v5787_v28 = vsub.f32 %v2696_v61, %v5758_v62 }
 0x7e7   : > { %v2685_v35 = vpop.permute.xlu1 %2684  ;;  %v6517_v5 = vand.u32 4294901760, %v5779_v58  ;;  %v6515_v60 = vand.u32 4294901760, %v5787_v28 }
 0x7e8   : > { %v2686_v25 = vsel %vm1035_vm2, %v2683_v41, %v2685_v35  ;;  %v2687_v3 = vsel %vm1035_vm2, %v2685_v35, %v2683_v41 }
 0x7e9   : > { %v5722_v38 = vmul.f32 %v2687_v3, %v4915_v43  ;;  %v5725_v42 = vmul.f32 %v2686_v25, %v4918_v44  ;;  %v5841_v3 = vsub.f32 %v5779_v58, %v6517_v5 }
 0x7eb   : > { %2722 = vrot.lane.b32.xlu1 %v5722_v38, %s4452_s16  ;;  %2724 = vrot.lane.b32.xlu0 %v5725_v42, %s4452_s16  ;;  %v2731_v26 = vpop.permute.xlu1 %2730  ;;  %v5819_v0 = vand.u32 4294901760, %v5725_v42  ;;  %v5822_v45 = vand.u32 4294901760, %v5722_v38 }
 0x7ec   : > { %v2734_v51 = vsel %vm1111_vm3, %v2731_v26, %v2733_v11  ;;  %v2735_v31 = vsel %vm1111_vm3, %v2733_v11, %v2731_v26  ;;  %v5844_v26 = vsub.f32 %v2748_v16, %v5802_v17 }
 0x7ed   : > { %v2736_v49 = vmul.f32 %v2734_v51, %v4947_v15  ;;  %v2737_v56 = vmul.f32 %v2735_v31, %v4950_v20  ;;  %v5860_v10 = vsub.f32 %v5722_v38, %v5822_v45 }
 0x7ef   : > { %2706 = vrot.lane.b32.xlu1 %v2680_v21, %s4453_s22  ;;  %2708 = vrot.lane.b32.xlu0 %v2681_v52, %s4453_s22  ;;  %v5749_v47 = vand.u32 4294901760, %v2737_v56  ;;  %v5751_v37 = vand.u32 4294901760, %v2736_v49  ;;  %v5811_v21 = vsub.f32 %v5756_v36, %v6514_v13  ;;  %v6525_v13 = vand.u32 4294901760, %v5860_v10 }
 0x7f1   : > { %v5773_v8 = vsub.f32 %v2737_v56, %v5749_v47  ;;  %v5776_v7 = vsub.f32 %v2736_v49, %v5751_v37 }
 0x7f3   : > { %2714 = vrot.lane.b32.xlu1 %v2696_v61, %s4453_s22  ;;  %2716 = vrot.lane.b32.xlu0 %v2697_v40, %s4453_s22  ;;  %v6520_v46 = vand.u32 4294901760, %v5776_v7  ;;  %v6521_v48 = vand.u32 4294901760, %v5773_v8 }
 0x7f5   : > { %v2873_v35 = vsub.f32 %v5773_v8, %v6521_v48  ;;  %v2879_v25 = vsub.f32 %v5776_v7, %v6520_v46 }
 0x7f7   : > { %2698 = vrot.lane.b32.xlu1 %v5722_v38, %s4453_s22  ;;  %2700 = vrot.lane.b32.xlu0 %v5725_v42, %s4453_s22  ;;  %v2903_v38 = vsub.f32 %v5787_v28, %v6515_v60 }
 0x855   : > { %v2741_v14 = vpop.permute.xlu0 %2740  ;;  %v2739_v63 = vpop.permute.xlu1 %2738 }
 0x856   : > { %v2742_v30 = vsel %vm1111_vm3, %v2739_v63, %v2741_v14  ;;  %v2743_v54 = vsel %vm1111_vm3, %v2741_v14, %v2739_v63 }
 0x857   : > { %v2744_v27 = vmul.f32 %v2742_v30, %v4947_v15  ;;  %v2745_v4 = vmul.f32 %v2743_v54, %v4950_v20  ;;  %v5856_v54 = vsub.f32 %v5725_v42, %v5819_v0  ;;  %v2874_v42 = vand.u32 4294901760, %v2873_v35 }
 0x859   : > { %v5782_v12 = vand.u32 4294901760, %v2745_v4  ;;  %v5784_v39 = vand.u32 4294901760, %v2744_v27 }
 0x85b   : > { %v5791_v1 = vsub.f32 %v2745_v4, %v5782_v12  ;;  %v5794_v29 = vsub.f32 %v2744_v27, %v5784_v39  ;;  %2765 = vmatprep.subr.mxu0 %v5782_v12 }
 0x85c   : > { %2767 = vmatpush1.msra.mxu0 %v5784_v39 }
 0x85d   : > { %v6522_v18 = vand.u32 4294901760, %v5794_v29  ;;  %v2725_v59 = vpop.permute.xlu0 %2724  ;;  %2769 = vmatprep.subr.mxu0 %v5749_v47  ;;  %v2723_v53 = vpop.permute.xlu1 %2722  ;;  %v6524_v34 = vand.u32 4294901760, %v5791_v1 }
 0x85e   : > { %v2726_v52 = vsel %vm1111_vm3, %v2723_v53, %v2725_v59  ;;  %v2727_v57 = vsel %vm1111_vm3, %v2725_v59, %v2723_v53  ;;  %2771 = vmatpush1.msra.mxu0 %v5751_v37  ;;  %v6580_v59 = vld [vmem:[#allocation4_spill] sm:$0xff] }
 0x85f   : > { %v2728_v19 = vmul.f32 %v2726_v52, %v4947_v15  ;;  %v2729_v61 = vmul.f32 %v2727_v57, %v4950_v20  ;;  %v2861_v40 = vsub.f32 %v5791_v1, %v6524_v34  ;;  %v2867_v41 = vsub.f32 %v5794_v29, %v6522_v18 }
 0x860   : > { %v2880_v52 = vand.u32 4294901760, %v2879_v25  ;;  %v6523_v57 = vand.u32 4294901760, %v5844_v26 }
 0x861   : > { %v5846_v11 = vand.u32 4294901760, %v2729_v61  ;;  %v5848_v51 = vand.u32 4294901760, %v2728_v19  ;;  %v2709_v31 = vpop.permute.xlu0 %2708  ;;  %v2707_v49 = vpop.permute.xlu1 %2706  ;;  %v2862_v56 = vand.u32 4294901760, %v2861_v40  ;;  %v2868_v14 = vand.u32 4294901760, %v2867_v41 }
 0x862   : > { %v2710_v63 = vsel %vm1075_vm5, %v2707_v49, %v2709_v31  ;;  %v2711_v30 = vsel %vm1075_vm5, %v2709_v31, %v2707_v49 }
 0x863   : > { %v5863_v27 = vsub.f32 %v2729_v61, %v5846_v11  ;;  %v5866_v4 = vsub.f32 %v2728_v19, %v5848_v51  ;;  %v2712_v16 = vmul.f32 %v2711_v30, %v4996_v24  ;;  %v2713_v53 = vmul.f32 %v2710_v63, %v6580_v59  ;;  %2773 = vmatprep.subr.mxu0 %v5846_v11 }
 0x864   : > { %2863 = vmatprep.subr.mxu1 %v2862_v56  ;;  %2775 = vmatpush1.msra.mxu0 %v5848_v51  ;;  %v2898_v56 = vand.u32 4294901760, %v5841_v3 }
 0x865   : > { %v6519_v19 = vand.u32 4294901760, %v5866_v4  ;;  %v5877_v61 = vand.u32 4294901760, %v2713_v53  ;;  %v5879_v40 = vand.u32 4294901760, %v2712_v16  ;;  %2869 = vmatpush1.msra.mxu1 %v2868_v14  ;;  %v2717_v41 = vpop.permute.xlu0 %2716  ;;  %2777 = vmatprep.subr.mxu0 %v5753_v22  ;;  %v2715_v31 = vpop.permute.xlu1 %2714  ;;  %v6518_v35 = vand.u32 4294901760, %v5863_v27 }
 0x866   : > { %2875 = vmatprep.subr.mxu1 %v2874_v42  ;;  %v2718_v25 = vsel %vm1075_vm5, %v2715_v31, %v2717_v41  ;;  %v2719_v49 = vsel %vm1075_vm5, %v2717_v41, %v2715_v31  ;;  %2779 = vmatpush1.msra.mxu0 %v5758_v62  ;;  %v2909_v14 = vsub.f32 %v5770_v23, %v6516_v9  ;;  %v6526_v42 = vand.u32 4294901760, %v5856_v54 }
 0x867   : > { %v2720_v63 = vmul.f32 %v2719_v49, %v4996_v24  ;;  %v2721_v30 = vmul.f32 %v2718_v25, %v6580_v59  ;;  %2881 = vmatpush1.msra.mxu1 %v2880_v52  ;;  %v5897_v60 = vsub.f32 %v2713_v53, %v5877_v61  ;;  %v5900_v41 = vsub.f32 %v2712_v16, %v5879_v40 }
 0x868   : > { %2781 = vmatprep.subr.mxu0 %v5747_v32  ;;  %v2885_v3 = vsub.f32 %v5863_v27, %v6518_v35  ;;  %v2891_v52 = vsub.f32 %v5866_v4, %v6519_v19  ;;  %v2904_v16 = vand.u32 4294901760, %v2903_v38  ;;  %v2836_v9 = vsub.f32 %v5844_v26, %v6523_v57 }
 0x869   : > { %v5909_v31 = vand.u32 4294901760, %v2721_v30  ;;  %v5911_v25 = vand.u32 4294901760, %v2720_v63  ;;  %2783 = vmatpush1.msra.mxu0 %v5745_v55  ;;  %v2701_v53 = vpop.permute.xlu0 %2700  ;;  %v2699_v49 = vpop.permute.xlu1 %2698 }
 0x86a   : > { %v2702_v5 = vsel %vm1075_vm5, %v2699_v49, %v2701_v53  ;;  %v2703_v35 = vsel %vm1075_vm5, %v2701_v53, %v2699_v49  ;;  %2785 = vmatprep.subr.mxu0 %v5819_v0  ;;  %v2886_v19 = vand.u32 4294901760, %v2885_v3  ;;  %v2892_v46 = vand.u32 4294901760, %v2891_v52 }
 0x86b   : > { %v5923_v48 = vsub.f32 %v2721_v30, %v5909_v31  ;;  %v5926_v18 = vsub.f32 %v2720_v63, %v5911_v25  ;;  %v2704_v38 = vmul.f32 %v2703_v35, %v4996_v24  ;;  %v2705_v57 = vmul.f32 %v2702_v5, %v6580_v59  ;;  %2787 = vmatpush1.msra.mxu0 %v5822_v45 }
 0x86c   : > { %2789 = vmatprep.subr.mxu0 %v5909_v31  ;;  %2887 = vmatprep.subr.mxu1 %v2886_v19  ;;  %v2921_v3 = vsub.f32 %v5856_v54, %v6526_v42  ;;  %v2927_v63 = vsub.f32 %v5860_v10, %v6525_v13  ;;  %v6527_v30 = vand.u32 4294901760, %v5897_v60  ;;  %v2910_v53 = vand.u32 4294901760, %v2909_v14 }
 0x86d   : > { %v2938_v35 = vand.u32 4294901760, %v5926_v18  ;;  %v5941_v5 = vand.u32 4294901760, %v2705_v57  ;;  %v5943_v52 = vand.u32 4294901760, %v2704_v38  ;;  %2791 = vmatpush1.msra.mxu0 %v5911_v25  ;;  %2893 = vmatpush1.msra.mxu1 %v2892_v46  ;;  %v2932_v19 = vand.u32 4294901760, %v5923_v48 }
 0x86e   : > { %2793 = vmatprep.subr.mxu0 %v5877_v61  ;;  %2899 = vmatprep.subr.mxu1 %v2898_v56  ;;  %v2916_v49 = vand.u32 4294901760, %v5811_v21  ;;  %v2837_v34 = vand.u32 4294901760, %v2836_v9  ;;  %v2922_v56 = vand.u32 4294901760, %v2921_v3  ;;  %v2928_v14 = vand.u32 4294901760, %v2927_v63 }
 0x86f   : > { %v5950_v13 = vsub.f32 %v2705_v57, %v5941_v5  ;;  %v5953_v42 = vsub.f32 %v2704_v38, %v5943_v52  ;;  %2795 = vmatpush1.msra.mxu0 %v5879_v40  ;;  %2905 = vmatpush1.msra.mxu1 %v2904_v16  ;;  %v2933_v46 = vsub.f32 %v5923_v48, %v2932_v19  ;;  %v6581_v38 = vand.u32 4294901760, %v5900_v41 }
 0x870   : > { %2797 = vmatprep.subr.mxu0 %v5941_v5  ;;  %2911 = vmatprep.subr.mxu1 %v2910_v53  ;;  %v2939_v21 = vsub.f32 %v5926_v18, %v2938_v35  ;;  %v2945_v57 = vsub.f32 %v5897_v60, %v6527_v30 }
 0x871   : > { %v2962_v16 = vand.u32 4294901760, %v5953_v42  ;;  %2799 = vmatpush1.msra.mxu0 %v5943_v52  ;;  %2917 = vmatpush1.msra.mxu1 %v2916_v49  ;;  %v2934_v9 = vand.u32 4294901760, %v2933_v46  ;;  %v2951_v53 = vsub.f32 %v5900_v41, %v6581_v38  ;;  %v2956_v3 = vand.u32 4294901760, %v5950_v13 }
 0x872   : > { %2923 = vmatprep.subr.mxu1 %v2922_v56  ;;  %3022 = vmatprep.subr.mxu0 %v5791_v1  ;;  %v2940_v63 = vand.u32 4294901760, %v2939_v21  ;;  %v2946_v46 = vand.u32 4294901760, %v2945_v57  ;;  %v6585_v57 = vand.u32 4294901760, %v5776_v7 }
 0x873   : > { %2838 = vmatmul.mubr.f32.vlgmr.msra.gmra.mxu0 %v2837_v34  ;;  %2929 = vmatpush1.msra.mxu1 %v2928_v14  ;;  %v2957_v30 = vsub.f32 %v5950_v13, %v2956_v3  ;;  %v2963_v49 = vsub.f32 %v5953_v42, %v2962_v16  ;;  %v2952_v56 = vand.u32 4294901760, %v2951_v53  ;;  %v6582_v34 = vand.u32 4294901760, %v5791_v1 }
 0x874   : > { %3025 = vmatpush1.msra.mxu0 %v5794_v29  ;;  %2935 = vmatprep.subr.mxu1 %v2934_v9  ;;  %v6584_v14 = vand.u32 4294901760, %v5773_v8  ;;  %v6586_v1 = vand.u32 4294901760, %v5863_v27  ;;  %v6591_v9 = vand.u32 4294901760, %v5770_v23 }
 0x875   : > { %3028 = vmatprep.subr.mxu0 %v5773_v8  ;;  %2941 = vmatpush1.msra.mxu1 %v2940_v63  ;;  %v2958_v38 = vand.u32 4294901760, %v2957_v30  ;;  %v2964_v21 = vand.u32 4294901760, %v2963_v49  ;;  %v6583_v30 = vand.u32 4294901760, %v5794_v29  ;;  %v6587_v29 = vand.u32 4294901760, %v5866_v4 }
 0x876   : > { %3031 = vmatpush1.msra.mxu0 %v5776_v7  ;;  %2947 = vmatprep.subr.mxu1 %v2946_v46  ;;  %v6588_v8 = vand.u32 4294901760, %v5779_v58  ;;  %v6589_v7 = vand.u32 4294901760, %v5787_v28 }
 0x877   : > { %3034 = vmatprep.subr.mxu0 %v5863_v27  ;;  %2953 = vmatpush1.msra.mxu1 %v2952_v56  ;;  %v6590_v27 = vand.u32 4294901760, %v5844_v26 }
 0x878   : > { %3037 = vmatpush1.msra.mxu0 %v5866_v4  ;;  %2959 = vmatprep.subr.mxu1 %v2958_v38  ;;  %v6592_v4 = vand.u32 4294901760, %v5756_v36 }
 0x879   : > { %3040 = vmatprep.subr.mxu0 %v5779_v58  ;;  %2965 = vmatpush1.msra.mxu1 %v2964_v21  ;;  %v6593_v58 = vand.u32 4294901760, %v5856_v54 }
 0x87a   : > { %3043 = vmatpush1.msra.mxu0 %v5787_v28  ;;  %3000 = vmatmul.mubr.f32.vlgmr.msra.gmra.mxu1 %v5802_v17  ;;  %v6594_v28 = vand.u32 4294901760, %v5860_v10 }
 0x87b   : > { %3046 = vmatprep.subr.mxu0 %v5770_v23  ;;  %3130 = vmatprep.subr.mxu1 %v5782_v12 }
 0x87c   : > { %3049 = vmatpush1.msra.mxu0 %v5756_v36  ;;  %3132 = vmatpush1.msra.mxu1 %v5784_v39  ;;  %v6595_v36 = vand.u32 4294901760, %v5897_v60 }
 0x87d   : > { %3052 = vmatprep.subr.mxu0 %v5856_v54  ;;  %3134 = vmatprep.subr.mxu1 %v5749_v47 }
 0x87e   : > { %3055 = vmatpush1.msra.mxu0 %v5860_v10  ;;  %3136 = vmatpush1.msra.mxu1 %v5751_v37 }
 0x87f   : > { %3058 = vmatprep.subr.mxu0 %v5923_v48  ;;  %3138 = vmatprep.subr.mxu1 %v5846_v11 }
 0x880   : > { %3061 = vmatpush1.msra.mxu0 %v5926_v18  ;;  %3140 = vmatpush1.msra.mxu1 %v5848_v51 }
 0x881   : > { %3064 = vmatprep.subr.mxu0 %v5897_v60  ;;  %3142 = vmatprep.subr.mxu1 %v5753_v22 }
 0x882   : > { %3067 = vmatpush1.msra.mxu0 %v5900_v41  ;;  %3144 = vmatpush1.msra.mxu1 %v5758_v62 }
 0x883   : > { %3070 = vmatprep.subr.mxu0 %v5950_v13  ;;  %3146 = vmatprep.subr.mxu1 %v5747_v32 }
 0x884   : > { %3073 = vmatpush1.msra.mxu0 %v5953_v42  ;;  %3106 = vmatprep.mubr.f32.mxu0 %v6540_v33 }
 0x885   : > { %3148 = vmatpush1.msra.mxu1 %v5745_v55  ;;  %3109 = vmatmul.mubr.f32.vlgmr.msra.gmra.mxu0 %v5844_v26 }
 0x886   : > { %3150 = vmatprep.subr.mxu1 %v5819_v0  ;;  %3224 = vmatprep.subr.mxu0 %v6582_v34 }
 0x887   : > { %3152 = vmatpush1.msra.mxu1 %v5822_v45  ;;  %3228 = vmatpush1.msra.mxu0 %v6583_v30 }
 0x888   : > { %3154 = vmatprep.subr.mxu1 %v5909_v31  ;;  %3232 = vmatprep.subr.mxu0 %v6584_v14 }
 0x889   : > { %3156 = vmatpush1.msra.mxu1 %v5911_v25  ;;  %3236 = vmatpush1.msra.mxu0 %v6585_v57 }
 0x88a   : > { %3158 = vmatprep.subr.mxu1 %v5877_v61  ;;  %3240 = vmatprep.subr.mxu0 %v6586_v1 }
 0x88b   : > { %3160 = vmatpush1.msra.mxu1 %v5879_v40  ;;  %3244 = vmatpush1.msra.mxu0 %v6587_v29 }
 0x88c   : > { %3162 = vmatprep.subr.mxu1 %v5941_v5  ;;  %3248 = vmatprep.subr.mxu0 %v6588_v8 }
 0x88d   : > { %3164 = vmatpush1.msra.mxu1 %v5943_v52  ;;  %3197 = vmatprep.mubr.f32.mxu1 %v6540_v33 }
 0x88e   : > { %3252 = vmatpush1.msra.mxu0 %v6589_v7  ;;  %3201 = vmatmul.mubr.f32.vlgmr.msra.gmra.mxu1 %v6590_v27 }
 0x88f   : > { %3256 = vmatprep.subr.mxu0 %v6591_v9  ;;  %3348 = vmatprep.subr.mxu1 %v5782_v12 }
 0x890   : > { %3260 = vmatpush1.msra.mxu0 %v6592_v4  ;;  %3350 = vmatpush1.msra.mxu1 %v5784_v39 }
 0x891   : > { %3264 = vmatprep.subr.mxu0 %v6593_v58  ;;  %3352 = vmatprep.subr.mxu1 %v5749_v47  ;;  %v6596_v47 = vand.u32 4294901760, %v5900_v41 }
 0x892   : > { %3268 = vmatpush1.msra.mxu0 %v6594_v28  ;;  %3354 = vmatpush1.msra.mxu1 %v5751_v37 }
 0x893   : > { %3272 = vmatprep.subr.mxu0 %v2932_v19  ;;  %3356 = vmatprep.subr.mxu1 %v5846_v11 }
 0x894   : > { %3276 = vmatpush1.msra.mxu0 %v2938_v35  ;;  %3358 = vmatpush1.msra.mxu1 %v5848_v51  ;;  %v4458_v35 = vmov 4  }
 0x895   : > { %3280 = vmatprep.subr.mxu0 %v6595_v36  ;;  %3360 = vmatprep.subr.mxu1 %v5753_v22 }
 0x896   : > { %3284 = vmatpush1.msra.mxu0 %v6596_v47  ;;  %3362 = vmatpush1.msra.mxu1 %v5758_v62 }
 0x897   : > { %3288 = vmatprep.subr.mxu0 %v2956_v3  ;;  %3364 = vmatprep.subr.mxu1 %v5747_v32 }
 0x898   : > { %3292 = vmatpush1.msra.mxu0 %v2962_v16  ;;  %3325 = vmatprep.mubr.f32.mxu0 %v6540_v33 }
 0x899   : > { %3366 = vmatpush1.msra.mxu1 %v5745_v55  ;;  %3327 = vmatmul.mubr.f32.vlgmr.msra.gmra.mxu0 %v5802_v17 }
 0x89a   : > { %3368 = vmatprep.subr.mxu1 %v5819_v0  ;;  %3415 = vmatprep.mubr.f32.mxu1 %v6540_v33 }
 0x89b   : > { %3370 = vmatpush1.msra.mxu1 %v5822_v45  ;;  %3631 = vmatprep.mubr.f32.mxu0 %v6540_v33 }
 0x89c   : > { %3372 = vmatprep.subr.mxu1 %v5909_v31  ;;  %4415 = vset.pattern.permute.xlu0 %v4458_v35 }
 0x89d   : > { %3374 = vmatpush1.msra.mxu1 %v5911_v25 }
 0x89e   : > { %3376 = vmatprep.subr.mxu1 %v5877_v61 }
 0x89f   : > { %3378 = vmatpush1.msra.mxu1 %v5879_v40 }
 0x8a0   : > { %3380 = vmatprep.subr.mxu1 %v5941_v5  ;;  %v4440_v5 = vld [vmem:[%s6481_s8] sm:$0xff] }
 0x8a1   : > { %3382 = vmatpush1.msra.mxu1 %v5943_v52  ;;  %v4459_v52 = vmov 5  }
 0x8a2   : > { %3417 = vmatmul.mubr.f32.vlgmr.msra.gmra.mxu1 %v5802_v17  ;;  %4416 = vset.pattern.permute.xlu1 %v4459_v52 }
 0x8a3   : > { %3797 = vmatprep.mubr.f32.mxu1 %v6540_v33 }
 0x933   : > { %v2839_v55 = vpop.f32.mrf.mxu0 }
 0x935   : > { %v2841_v32 = vpop.f32.mrf.mxu0 }
 0x93a   : > { %v3001_v37 = vpop.f32.mrf.mxu1 }
 0x93b   : > { %v3002_v12 = vadd.f32 %v3001_v37, %v2839_v55 }
 0x93c   : > { %v3003_v62 = vpop.f32.mrf.mxu1 }
 0x93d   : > { %v3004_v48 = vadd.f32 %v3003_v62, %v2841_v32 }
 0x945   : > { %v3110_v22 = vpop.f32.mrf.mxu0 }
 0x946   : > { %v3111_v18 = vadd.f32 %v3110_v22, %v3002_v12 }
 0x947   : > { %v3112_v23 = vpop.f32.mrf.mxu0 }
 0x948   : > { %v3113_v0 = vadd.f32 %v3112_v23, %v3004_v48 }
 0x94e   : > { %v3202_v13 = vpop.f32.mrf.mxu1 }
 0x94f   : > { %v3203_v45 = vadd.f32 %v3202_v13, %v3111_v18 }
 0x950   : > { %v3204_v60 = vpop.f32.mrf.mxu1 }
 0x951   : > { %v3205_v11 = vadd.f32 %v3204_v60, %v3113_v0 }
 0x959   : > { %v3328_v39 = vpop.f32.mrf.mxu0 }
 0x95a   : > { %v3329_v51 = vadd.f32 %v3328_v39, %v3203_v45 }
 0x95b   : > { %v3330_v26 = vpop.f32.mrf.mxu0 }
 0x95c   : > { %v3331_v54 = vadd.f32 %v3330_v26, %v3205_v11 }
 0x962   : > { %v3418_v17 = vpop.f32.mrf.mxu1 }
 0x963   : > { %v3419_v10 = vadd.f32 %v3418_v17, %v3329_v51 }
 0x964   : > { %v3420_v61 = vpop.f32.mrf.mxu1 }
 0x965   : > { %v3421_v40 = vadd.f32 %v3420_v61, %v3331_v54  ;;  %v3433_v41 = vmul.f32 %v3419_v10, %v3419_v10 }
 0x967   : > { %v3423_v42 = vadd.f32 %v3421_v40, %v3419_v10  ;;  %v3434_v31 = vmul.f32 %v3421_v40, %v3421_v40 }
 0x969   : > { %3424 = vadd.xlane.f32.xlu1 %v3423_v42  ;;  %v3435_v25 = vadd.f32 %v3434_v31, %v3433_v41 }
 0x96b   : > { %3436 = vadd.xlane.f32.xlu0 %v3435_v25 }
 0x97a   : > { %3466 = vperm.xlu1 %4416, %v4440_v5  }
 0x981   : > { %3460 = vperm.xlu0 %4415, %v4440_v5  }
 0x9f2   : > { %v3425_v19 = vpop.xlane.xlu1 %3424 }
 0x9f3   : > { %v3426_v16 = vrot.slane %v3425_v19, 4 }
 0x9f4   : > { %v3437_v53 = vpop.xlane.xlu0 %3436 }
 0x9f5   : > { %v3427_v3 = vadd.f32 %v3426_v16, %v3425_v19  ;;  %v3438_v63 = vrot.slane %v3437_v53, 4 }
 0x9f6   : > { %v3467_v36 = vpop.permute.xlu1 %3466 }
 0x9f7   : > { %v3428_v49 = vrot.slane %v3427_v3, 2  ;;  %v3439_v46 = vadd.f32 %v3438_v63, %v3437_v53 }
 0x9f9   : > { %v3440_v56 = vrot.slane %v3439_v46, 2  ;;  %v3429_v38 = vadd.f32 %v3428_v49, %v3427_v3  ;;  %v3545_v49 = vld [vmem:[%s6480_s7] sm:$0xf] }
 0x9fb   : > { %v3430_v21 = vrot.slane %v3429_v38, 1  ;;  %v3441_v34 = vadd.f32 %v3440_v56, %v3439_v46 }
 0x9fc   : > { %v3461_v4 = vpop.permute.xlu0 %3460 }
 0x9fd   : > { %v3431_v30 = vadd.f32 %v3430_v21, %v3429_v38  ;;  %v3442_v14 = vrot.slane %v3441_v34, 1 }
 0x9ff   : > { %4378 = vpush %v3431_v30  ;;  %v3443_v57 = vadd.f32 %v3442_v14, %v3441_v34  ;;  %v3547_v34 = vsel %vm1144_vm4, %v3545_v49, 0 }
 0xa01   : > { %4380 = vpush %v3443_v57 }
 0xa30   : > { %s4379_s24 = spop %4378 }
 0xa31   : > { %s3445_s26 = smul.f32 0.0009765625, %s4379_s24 }
 0xa32   : > { %s4381_s27 = spop %4380 }
 0xa33   : > { %s3447_s28 = smul.f32 %s3445_s26, %s3445_s26  ;;  %v3449_v8 = vstv %s3445_s26 }
 0xa34   : > { %s3446_s29 = smul.f32 0.0009765625, %s4381_s27  ;;  %v3450_v7 = vsub.f32 %v3419_v10, %v3449_v8  ;;  %v3451_v27 = vsub.f32 %v3421_v40, %v3449_v8 }
 0xa36   : > { %s3448_s11 = ssub.f32 %s3446_s29, %s3447_s28  ;;  %s349_s29 = scalar_lea.vmem %s6482_s9, %s4354_s25 }
 0xa38   : > { %s3452_s12 = sadd.f32 1e-05, %s3448_s11 }
 0xa3a   : > { %v3453_v1 = vstv %s3452_s12 }
 0xa3b   : > { %4432 = vrsqrt.f32 %v3453_v1 }
 0xa48   : > { %v4433_v29 = vpop.eup %4432 }
 0xa49   : > { %4382 = vpush %v4433_v29 }
 0xa7a   : > { %s4383_s13 = spop %4382 }
 0xa7b   : > { %v3456_v9 = vstv %s4383_s13 }
 0xa7c   : > { %v3457_v58 = vmul.f32 %v3456_v9, %v3450_v7  ;;  %v3458_v28 = vmul.f32 %v3456_v9, %v3451_v27 }
 0xa7e   : > { %v3463_v47 = vmul.f32 %v3461_v4, %v3457_v58  ;;  %v3464_v55 = vmul.f32 %v3461_v4, %v3458_v28  ;;  %v6164_v4 = vand.u32 4294901760, %v3547_v34 }
 0xa80   : > { %v3469_v32 = vadd.f32 %v3467_v36, %v3463_v47  ;;  %v3470_v37 = vadd.f32 %v3467_v36, %v3464_v55 }
 0xa82   : > { %v3473_v22 = vmul.f32 0.70710677, %v3469_v32  ;;  %v3474_v62 = vmul.f32 0.70710677, %v3470_v37  ;;  %v3471_v12 = vmul.f32 0.5, %v3469_v32  ;;  %v3472_v48 = vmul.f32 0.5, %v3470_v37 }
 0xa84   : > { %4434 = verf.f32 %v3473_v22 }
 0xa85   : > { %4436 = verf.f32 %v3474_v62 }
 0xa91   : > { %v4435_v23 = vpop.eup %4434 }
 0xa92   : > { %v4437_v13 = vpop.eup %4436  ;;  %v3477_v39 = vadd.f32 1.0, %v4435_v23 }
 0xa93   : > { %v3478_v18 = vadd.f32 1.0, %v4437_v13 }
 0xa94   : > { %v3479_v60 = vmul.f32 %v3477_v39, %v3471_v12 }
 0xa95   : > { %v3480_v0 = vmul.f32 %v3478_v18, %v3472_v48 }
 0xa96   : > { %3489 = vrot.lane.b32.xlu1 %v3479_v60, %s4451_s15 }
 0xa97   : > { %3531 = vrot.lane.b32.xlu0 %v3480_v0, %s4452_s16  ;;  %v6125_v52 = vand.u32 4294901760, %v3480_v0 }
 0xa99   : > { %v6143_v38 = vsub.f32 %v3480_v0, %v6125_v52 }
 0xa9a   : > { %3491 = vrot.lane.b32.xlu1 %v3480_v0, %s4451_s15 }
 0xa9b   : > { %v6529_v8 = vand.u32 4294901760, %v6143_v38 }
 0xa9d   : > { %v6195_v39 = vsub.f32 %v6143_v38, %v6529_v8 }
 0xa9e   : > { %3481 = vrot.lane.b32.xlu1 %v3479_v60, %s4450_s14 }
 0xaa2   : > { %3483 = vrot.lane.b32.xlu1 %v3480_v0, %s4450_s14 }
 0xaa6   : > { %3529 = vrot.lane.b32.xlu1 %v3479_v60, %s4452_s16 }
 0xb08   : > { %v3490_v45 = vpop.permute.xlu1 %3489 }
 0xb09   : > { %v3532_v31 = vpop.permute.xlu0 %3531 }
 0xb0c   : > { %v3492_v26 = vpop.permute.xlu1 %3491 }
 0xb0d   : > { %v3493_v11 = vsel %vm1055_vm1, %v3490_v45, %v3492_v26  ;;  %v3494_v17 = vsel %vm1055_vm1, %v3492_v26, %v3490_v45 }
 0xb0e   : > { %v3495_v51 = vmul.f32 %v3493_v11, %v4902_v2  ;;  %v3496_v10 = vmul.f32 %v3494_v17, %v4905_v6 }
 0xb10   : > { %3537 = vrot.lane.b32.xlu1 %v3495_v51, %s4452_s16  ;;  %v3482_v54 = vpop.permute.xlu1 %3481  ;;  %v6115_v6 = vand.u32 4294901760, %v3496_v10  ;;  %v6119_v25 = vand.u32 4294901760, %v3495_v51 }
 0xb12   : > { %v6128_v19 = vsub.f32 %v3496_v10, %v6115_v6  ;;  %v6136_v63 = vsub.f32 %v3495_v51, %v6119_v25 }
 0xb14   : > { %3539 = vrot.lane.b32.xlu1 %v3496_v10, %s4452_s16  ;;  %v3484_v61 = vpop.permute.xlu1 %3483  ;;  %v6531_v56 = vand.u32 4294901760, %v6128_v19  ;;  %v6530_v57 = vand.u32 4294901760, %v6136_v63 }
 0xb15   : > { %v3485_v40 = vsel %vm1035_vm2, %v3482_v54, %v3484_v61  ;;  %v3486_v42 = vsel %vm1035_vm2, %v3484_v61, %v3482_v54 }
 0xb16   : > { %v6102_v41 = vmul.f32 %v3486_v42, %v4915_v43  ;;  %v3488_v2 = vmul.f32 %v3485_v40, %v4918_v44  ;;  %v6117_v44 = vand.u32 4294901760, %v3479_v60  ;;  %v6155_v29 = vsub.f32 %v6128_v19, %v6531_v56 }
 0xb17   : > { %v6185_v37 = vsub.f32 %v6136_v63, %v6530_v57 }
 0xb18   : > { %3521 = vrot.lane.b32.xlu1 %v6102_v41, %s4452_s16  ;;  %3523 = vrot.lane.b32.xlu0 %v3488_v2, %s4452_s16  ;;  %v3530_v43 = vpop.permute.xlu1 %3529  ;;  %v6131_v16 = vsub.f32 %v3479_v60, %v6117_v44  ;;  %v6162_v9 = vand.u32 4294901760, %v3488_v2  ;;  %v6180_v32 = vand.u32 4294901760, %v6102_v41  ;;  %v3697_v12 = vand.u32 4294901760, %v6155_v29 }
 0xb19   : > { %v3533_v35 = vsel %vm1111_vm3, %v3530_v43, %v3532_v31  ;;  %v3534_v5 = vsel %vm1111_vm3, %v3532_v31, %v3530_v43 }
 0xb1a   : > { %v3535_v53 = vmul.f32 %v3533_v35, %v4947_v15  ;;  %v3536_v3 = vmul.f32 %v3534_v5, %v4950_v20  ;;  %v6528_v21 = vand.u32 4294901760, %v6131_v16  ;;  %v6222_v61 = vsub.f32 %v6102_v41, %v6180_v32 }
 0xb1c   : > { %3505 = vrot.lane.b32.xlu1 %v3479_v60, %s4453_s22  ;;  %3507 = vrot.lane.b32.xlu0 %v3480_v0, %s4453_s22  ;;  %v6147_v30 = vand.u32 4294901760, %v3536_v3  ;;  %v6149_v14 = vand.u32 4294901760, %v3535_v53  ;;  %v6171_v36 = vsub.f32 %v6131_v16, %v6528_v21  ;;  %v6202_v60 = vsub.f32 %v3488_v2, %v6162_v9 }
 0xb1d   : > { %v6205_v0 = vsub.f32 %v3547_v34, %v6164_v4  ;;  %v3725_v8 = vand.u32 4294901760, %v6222_v61 }
 0xb1e   : > { %v6174_v47 = vsub.f32 %v3536_v3, %v6147_v30  ;;  %v6177_v55 = vsub.f32 %v3535_v53, %v6149_v14 }
 0xb1f   : > { %v6535_v5 = vand.u32 4294901760, %v6205_v0 }
 0xb20   : > { %3513 = vrot.lane.b32.xlu1 %v3495_v51, %s4453_s22  ;;  %3515 = vrot.lane.b32.xlu0 %v3496_v10, %s4453_s22  ;;  %v6534_v17 = vand.u32 4294901760, %v6177_v55  ;;  %v3671_v54 = vand.u32 4294901760, %v6174_v47  ;;  %v3703_v10 = vand.u32 4294901760, %v6185_v37 }
 0xb24   : > { %3497 = vrot.lane.b32.xlu1 %v6102_v41, %s4453_s22  ;;  %3499 = vrot.lane.b32.xlu0 %v3488_v2, %s4453_s22  ;;  %v3719_v41 = vand.u32 4294901760, %v6202_v60 }
 0xb26   : > { %v3720_v50 = vsub.f32 %v6202_v60, %v3719_v41 }
 0xb82   : > { %v3538_v46 = vpop.permute.xlu1 %3537 }
 0xb86   : > { %v3540_v1 = vpop.permute.xlu1 %3539 }
 0xb87   : > { %v3541_v7 = vsel %vm1111_vm3, %v3538_v46, %v3540_v1  ;;  %v3542_v27 = vsel %vm1111_vm3, %v3540_v1, %v3538_v46 }
 0xb88   : > { %v3543_v58 = vmul.f32 %v3541_v7, %v4947_v15  ;;  %v3544_v28 = vmul.f32 %v3542_v27, %v4950_v20  ;;  %v3672_v7 = vsub.f32 %v6174_v47, %v3671_v54  ;;  %v3678_v27 = vsub.f32 %v6177_v55, %v6534_v17 }
 0xb8a   : > { %v6187_v22 = vand.u32 4294901760, %v3544_v28  ;;  %v6189_v62 = vand.u32 4294901760, %v3543_v58  ;;  %v3524_v23 = vpop.permute.xlu0 %3523  ;;  %v3522_v13 = vpop.permute.xlu1 %3521 }
 0xb8b   : > { %v3525_v48 = vsel %vm1111_vm3, %v3522_v13, %v3524_v23  ;;  %v3526_v18 = vsel %vm1111_vm3, %v3524_v23, %v3522_v13 }
 0xb8c   : > { %v6208_v45 = vsub.f32 %v3544_v28, %v6187_v22  ;;  %v6211_v26 = vsub.f32 %v3543_v58, %v6189_v62  ;;  %v3527_v11 = vmul.f32 %v3525_v48, %v4947_v15  ;;  %v3528_v51 = vmul.f32 %v3526_v18, %v4950_v20  ;;  %3564 = vmatprep.subr.mxu0 %v6187_v22 }
 0xb8d   : > { %3566 = vmatpush1.msra.mxu0 %v6189_v62 }
 0xb8e   : > { %v3665_v40 = vand.u32 4294901760, %v6211_v26  ;;  %v6225_v42 = vand.u32 4294901760, %v3528_v51  ;;  %v6227_v15 = vand.u32 4294901760, %v3527_v11  ;;  %v3508_v20 = vpop.permute.xlu0 %3507  ;;  %3568 = vmatprep.subr.mxu0 %v6147_v30  ;;  %v3506_v2 = vpop.permute.xlu1 %3505  ;;  %v3659_v43 = vand.u32 4294901760, %v6208_v45 }
 0xb8f   : > { %v3509_v31 = vsel %vm1075_vm5, %v3506_v2, %v3508_v20  ;;  %v3510_v35 = vsel %vm1075_vm5, %v3508_v20, %v3506_v2  ;;  %3570 = vmatpush1.msra.mxu0 %v6149_v14 }
 0xb90   : > { %v6239_v53 = vsub.f32 %v3528_v51, %v6225_v42  ;;  %v6242_v3 = vsub.f32 %v3527_v11, %v6227_v15  ;;  %v3511_v49 = vmul.f32 %v3510_v35, %v4996_v24  ;;  %v3512_v46 = vmul.f32 %v3509_v31, %v6580_v59  ;;  %3572 = vmatprep.subr.mxu0 %v6225_v42 }
 0xb91   : > { %3574 = vmatpush1.msra.mxu0 %v6227_v15  ;;  %v3660_v34 = vsub.f32 %v6208_v45, %v3659_v43  ;;  %v3666_v1 = vsub.f32 %v6211_v26, %v3665_v40 }
 0xb92   : > { %v6532_v58 = vand.u32 4294901760, %v6242_v3  ;;  %v6261_v28 = vand.u32 4294901760, %v3512_v46  ;;  %v6263_v23 = vand.u32 4294901760, %v3511_v49  ;;  %v3516_v13 = vpop.permute.xlu0 %3515  ;;  %3576 = vmatprep.subr.mxu0 %v6115_v6  ;;  %v3514_v48 = vpop.permute.xlu1 %3513  ;;  %v6533_v18 = vand.u32 4294901760, %v6239_v53 }
 0xb93   : > { %v3517_v11 = vsel %vm1075_vm5, %v3514_v48, %v3516_v13  ;;  %v3518_v51 = vsel %vm1075_vm5, %v3516_v13, %v3514_v48  ;;  %3578 = vmatpush1.msra.mxu0 %v6119_v25  ;;  %v3661_v20 = vand.u32 4294901760, %v3660_v34  ;;  %v3667_v2 = vand.u32 4294901760, %v3666_v1 }
 0xb94   : > { %v6273_v31 = vsub.f32 %v3512_v46, %v6261_v28  ;;  %v3519_v35 = vmul.f32 %v3518_v51, %v4996_v24  ;;  %v3520_v21 = vmul.f32 %v3517_v11, %v6580_v59  ;;  %3580 = vmatprep.subr.mxu0 %v6125_v52  ;;  %v6280_v57 = vsub.f32 %v3511_v49, %v6263_v23 }
 0xb95   : > { %3662 = vmatprep.subr.mxu1 %v3661_v20  ;;  %3582 = vmatpush1.msra.mxu0 %v6117_v44  ;;  %v3673_v13 = vand.u32 4294901760, %v3672_v7  ;;  %v3684_v46 = vsub.f32 %v6239_v53, %v6533_v18  ;;  %v3690_v34 = vsub.f32 %v6242_v3, %v6532_v58  ;;  %v3679_v51 = vand.u32 4294901760, %v3678_v27 }
 0xb96   : > { %v6289_v1 = vand.u32 4294901760, %v3520_v21  ;;  %v6291_v48 = vand.u32 4294901760, %v3519_v35  ;;  %3668 = vmatpush1.msra.mxu1 %v3667_v2  ;;  %v3500_v11 = vpop.permute.xlu0 %3499  ;;  %v3498_v49 = vpop.permute.xlu1 %3497  ;;  %3584 = vmatprep.subr.mxu0 %v6162_v9  ;;  %v3635_v7 = vsub.f32 %v6205_v0, %v6535_v5  ;;  %v3749_v5 = vand.u32 4294901760, %v6280_v57 }
 0xb97   : > { %3674 = vmatprep.subr.mxu1 %v3673_v13  ;;  %v3501_v20 = vsel %vm1075_vm5, %v3498_v49, %v3500_v11  ;;  %v3502_v56 = vsel %vm1075_vm5, %v3500_v11, %v3498_v49  ;;  %3586 = vmatpush1.msra.mxu0 %v6180_v32  ;;  %v3685_v58 = vand.u32 4294901760, %v3684_v46  ;;  %v3691_v2 = vand.u32 4294901760, %v3690_v34 }
 0xb98   : > { %v6303_v18 = vsub.f32 %v3520_v21, %v6289_v1  ;;  %v6306_v27 = vsub.f32 %v3519_v35, %v6291_v48  ;;  %v3503_v17 = vmul.f32 %v3502_v56, %v4996_v24  ;;  %v3504_v13 = vmul.f32 %v3501_v20, %v6580_v59  ;;  %3680 = vmatpush1.msra.mxu1 %v3679_v51 }
 0xb99   : > { %3588 = vmatprep.subr.mxu0 %v6289_v1  ;;  %3686 = vmatprep.subr.mxu1 %v3685_v58  ;;  %v3726_v21 = vsub.f32 %v6222_v61, %v3725_v8  ;;  %v3743_v35 = vand.u32 4294901760, %v6273_v31  ;;  %v3709_v46 = vand.u32 4294901760, %v6195_v39  ;;  %v3715_v34 = vand.u32 4294901760, %v6171_v36 }
 0xb9a   : > { %v3737_v24 = vand.u32 4294901760, %v6306_v27  ;;  %v6320_v56 = vand.u32 4294901760, %v3504_v13  ;;  %v6322_v59 = vand.u32 4294901760, %v3503_v17  ;;  %3590 = vmatpush1.msra.mxu0 %v6291_v48  ;;  %3692 = vmatpush1.msra.mxu1 %v3691_v2  ;;  %v3731_v58 = vand.u32 4294901760, %v6303_v18 }
 0xb9b   : > { %3592 = vmatprep.subr.mxu0 %v6261_v28  ;;  %3698 = vmatprep.subr.mxu1 %v3697_v12  ;;  %v3636_v51 = vand.u32 4294901760, %v3635_v7  ;;  %v3721_v36 = vand.u32 4294901760, %v3720_v50  ;;  %v3727_v12 = vand.u32 4294901760, %v3726_v21  ;;  %v3750_v7 = vsub.f32 %v6280_v57, %v3749_v5 }
 0xb9c   : > { %v6332_v11 = vsub.f32 %v3504_v13, %v6320_v56  ;;  %v6335_v49 = vsub.f32 %v3503_v17, %v6322_v59  ;;  %3594 = vmatpush1.msra.mxu0 %v6263_v23  ;;  %3704 = vmatpush1.msra.mxu1 %v3703_v10  ;;  %v3732_v29 = vsub.f32 %v6303_v18, %v3731_v58 }
 0xb9d   : > { %3596 = vmatprep.subr.mxu0 %v6320_v56  ;;  %3710 = vmatprep.subr.mxu1 %v3709_v46  ;;  %v3738_v39 = vsub.f32 %v6306_v27, %v3737_v24  ;;  %v3744_v17 = vsub.f32 %v6273_v31, %v3743_v35  ;;  %v3751_v46 = vand.u32 4294901760, %v3750_v7 }
 0xb9e   : > { %v3761_v37 = vand.u32 4294901760, %v6335_v49  ;;  %3598 = vmatpush1.msra.mxu0 %v6322_v59  ;;  %3716 = vmatpush1.msra.mxu1 %v3715_v34  ;;  %v3733_v10 = vand.u32 4294901760, %v3732_v29  ;;  %v3755_v20 = vand.u32 4294901760, %v6332_v11 }
 0xb9f   : > { %3722 = vmatprep.subr.mxu1 %v3721_v36  ;;  %3821 = vmatprep.subr.mxu0 %v6208_v45  ;;  %v3739_v2 = vand.u32 4294901760, %v3738_v39  ;;  %v3745_v21 = vand.u32 4294901760, %v3744_v17  ;;  %v6598_v45 = vand.u32 4294901760, %v6239_v53 }
 0xba0   : > { %3637 = vmatmul.mubr.f32.vlgmr.msra.gmra.mxu0 %v3636_v51  ;;  %3728 = vmatpush1.msra.mxu1 %v3727_v12  ;;  %v3756_v13 = vsub.f32 %v6332_v11, %v3755_v20  ;;  %v3762_v50 = vsub.f32 %v6335_v49, %v3761_v37  ;;  %v6597_v51 = vand.u32 4294901760, %v6177_v55 }
 0xba1   : > { %3824 = vmatpush1.msra.mxu0 %v6211_v26  ;;  %3734 = vmatprep.subr.mxu1 %v3733_v10  ;;  %v6599_v26 = vand.u32 4294901760, %v6242_v3 }
 0xba2   : > { %3827 = vmatprep.subr.mxu0 %v6174_v47  ;;  %3740 = vmatpush1.msra.mxu1 %v3739_v2  ;;  %v3757_v34 = vand.u32 4294901760, %v3756_v13  ;;  %v3763_v29 = vand.u32 4294901760, %v3762_v50  ;;  %v6600_v47 = vand.u32 4294901760, %v6128_v19 }
 0xba3   : > { %3830 = vmatpush1.msra.mxu0 %v6177_v55  ;;  %3746 = vmatprep.subr.mxu1 %v3745_v21  ;;  %v6601_v55 = vand.u32 4294901760, %v6136_v63 }
 0xba4   : > { %3833 = vmatprep.subr.mxu0 %v6239_v53  ;;  %3752 = vmatpush1.msra.mxu1 %v3751_v46 }
 0xba5   : > { %3836 = vmatpush1.msra.mxu0 %v6242_v3  ;;  %3758 = vmatprep.subr.mxu1 %v3757_v34 }
 0xba6   : > { %3839 = vmatprep.subr.mxu0 %v6128_v19  ;;  %3764 = vmatpush1.msra.mxu1 %v3763_v29 }
 0xba7   : > { %3842 = vmatpush1.msra.mxu0 %v6136_v63  ;;  %3799 = vmatmul.mubr.f32.vlgmr.msra.gmra.mxu1 %v6164_v4 }
 0xba8   : > { %3845 = vmatprep.subr.mxu0 %v6143_v38  ;;  %3929 = vmatprep.subr.mxu1 %v6187_v22 }
 0xba9   : > { %3848 = vmatpush1.msra.mxu0 %v6131_v16  ;;  %3931 = vmatpush1.msra.mxu1 %v6189_v62 }
 0xbaa   : > { %3851 = vmatprep.subr.mxu0 %v6202_v60  ;;  %3933 = vmatprep.subr.mxu1 %v6147_v30 }
 0xbab   : > { %3854 = vmatpush1.msra.mxu0 %v6222_v61  ;;  %3935 = vmatpush1.msra.mxu1 %v6149_v14 }
 0xbac   : > { %3857 = vmatprep.subr.mxu0 %v6303_v18  ;;  %3937 = vmatprep.subr.mxu1 %v6225_v42 }
 0xbad   : > { %3860 = vmatpush1.msra.mxu0 %v6306_v27  ;;  %3939 = vmatpush1.msra.mxu1 %v6227_v15 }
 0xbae   : > { %3863 = vmatprep.subr.mxu0 %v6273_v31  ;;  %3941 = vmatprep.subr.mxu1 %v6115_v6  ;;  %v4222_v31 = vld [vmem:[%s6481_s8] sm:$0xf] }
 0xbaf   : > { %3866 = vmatpush1.msra.mxu0 %v6280_v57  ;;  %3943 = vmatpush1.msra.mxu1 %v6119_v25 }
 0xbb0   : > { %3869 = vmatprep.subr.mxu0 %v6332_v11  ;;  %3945 = vmatprep.subr.mxu1 %v6125_v52 }
 0xbb1   : > { %3872 = vmatpush1.msra.mxu0 %v6335_v49  ;;  %3905 = vmatprep.mubr.f32.mxu0 %v6540_v33 }
 0xbb2   : > { %3947 = vmatpush1.msra.mxu1 %v6117_v44  ;;  %3908 = vmatmul.mubr.f32.vlgmr.msra.gmra.mxu0 %v6205_v0 }
 0xbb3   : > { %3949 = vmatprep.subr.mxu1 %v6162_v9  ;;  %4023 = vmatprep.subr.mxu0 %v3659_v43  ;;  %v6604_v43 = vand.u32 4294901760, %v6131_v16 }
 0xbb4   : > { %3951 = vmatpush1.msra.mxu1 %v6180_v32  ;;  %4027 = vmatpush1.msra.mxu0 %v3665_v40  ;;  %v6603_v40 = vand.u32 4294901760, %v6143_v38 }
 0xbb5   : > { %3953 = vmatprep.subr.mxu1 %v6289_v1  ;;  %4031 = vmatprep.subr.mxu0 %v3671_v54  ;;  %v6602_v54 = vand.u32 4294901760, %v6205_v0 }
 0xbb6   : > { %3955 = vmatpush1.msra.mxu1 %v6291_v48  ;;  %4035 = vmatpush1.msra.mxu0 %v6597_v51 }
 0xbb7   : > { %3957 = vmatprep.subr.mxu1 %v6261_v28  ;;  %4039 = vmatprep.subr.mxu0 %v6598_v45 }
 0xbb8   : > { %3959 = vmatpush1.msra.mxu1 %v6263_v23  ;;  %4043 = vmatpush1.msra.mxu0 %v6599_v26 }
 0xbb9   : > { %3961 = vmatprep.subr.mxu1 %v6320_v56  ;;  %4047 = vmatprep.subr.mxu0 %v6600_v47 }
 0xbba   : > { %3963 = vmatpush1.msra.mxu1 %v6322_v59  ;;  %3996 = vmatprep.mubr.f32.mxu1 %v6540_v33 }
 0xbbb   : > { %4051 = vmatpush1.msra.mxu0 %v6601_v55  ;;  %4000 = vmatmul.mubr.f32.vlgmr.msra.gmra.mxu1 %v6602_v54 }
 0xbbc   : > { %4055 = vmatprep.subr.mxu0 %v6603_v40  ;;  %4147 = vmatprep.subr.mxu1 %v6187_v22 }
 0xbbd   : > { %4059 = vmatpush1.msra.mxu0 %v6604_v43  ;;  %4149 = vmatpush1.msra.mxu1 %v6189_v62 }
 0xbbe   : > { %4063 = vmatprep.subr.mxu0 %v3719_v41  ;;  %4151 = vmatprep.subr.mxu1 %v6147_v30 }
 0xbbf   : > { %4067 = vmatpush1.msra.mxu0 %v3725_v8  ;;  %4153 = vmatpush1.msra.mxu1 %v6149_v14 }
 0xbc0   : > { %4071 = vmatprep.subr.mxu0 %v3731_v58  ;;  %4155 = vmatprep.subr.mxu1 %v6225_v42 }
 0xbc1   : > { %4075 = vmatpush1.msra.mxu0 %v3737_v24  ;;  %4157 = vmatpush1.msra.mxu1 %v6227_v15 }
 0xbc2   : > { %4079 = vmatprep.subr.mxu0 %v3743_v35  ;;  %4159 = vmatprep.subr.mxu1 %v6115_v6 }
 0xbc3   : > { %4083 = vmatpush1.msra.mxu0 %v3749_v5  ;;  %4161 = vmatpush1.msra.mxu1 %v6119_v25 }
 0xbc4   : > { %4087 = vmatprep.subr.mxu0 %v3755_v20  ;;  %4163 = vmatprep.subr.mxu1 %v6125_v52 }
 0xbc5   : > { %4091 = vmatpush1.msra.mxu0 %v3761_v37  ;;  %4124 = vmatprep.mubr.f32.mxu0 %v6540_v33 }
 0xbc6   : > { %4165 = vmatpush1.msra.mxu1 %v6117_v44  ;;  %4126 = vmatmul.mubr.f32.vlgmr.msra.gmra.mxu0 %v6164_v4 }
 0xbc7   : > { %4167 = vmatprep.subr.mxu1 %v6162_v9  ;;  %4214 = vmatprep.mubr.f32.mxu1 %v6540_v33 }
 0xbc8   : > { %4169 = vmatpush1.msra.mxu1 %v6180_v32 }
 0xbc9   : > { %4171 = vmatprep.subr.mxu1 %v6289_v1  ;;  %v4460_v1 = vmov 6  }
 0xbca   : > { %4173 = vmatpush1.msra.mxu1 %v6291_v48  ;;  %4417 = vset.pattern.permute.xlu0 %v4460_v1  ;;  %v4461_v48 = vmov 7  }
 0xbcb   : > { %4175 = vmatprep.subr.mxu1 %v6261_v28  ;;  %4418 = vset.pattern.permute.xlu1 %v4461_v48 }
 0xbcc   : > { %4177 = vmatpush1.msra.mxu1 %v6263_v23 }
 0xbcd   : > { %4179 = vmatprep.subr.mxu1 %v6320_v56 }
 0xbce   : > { %4181 = vmatpush1.msra.mxu1 %v6322_v59 }
 0xbcf   : > { %4216 = vmatmul.mubr.f32.vlgmr.msra.gmra.mxu1 %v6164_v4 }
 0xc60   : > { %v3638_v6 = vpop.f32.mrf.mxu0 }
 0xc62   : > { %v3640_v44 = vpop.f32.mrf.mxu0 }
 0xc67   : > { %v3800_v25 = vpop.f32.mrf.mxu1 }
 0xc68   : > { %v3801_v63 = vadd.f32 %v3800_v25, %v3638_v6 }
 0xc69   : > { %v3802_v52 = vpop.f32.mrf.mxu1 }
 0xc6a   : > { %v3803_v30 = vadd.f32 %v3802_v52, %v3640_v44 }
 0xc72   : > { %v3909_v33 = vpop.f32.mrf.mxu0 }
 0xc73   : > { %v3910_v14 = vadd.f32 %v3909_v33, %v3801_v63 }
 0xc74   : > { %v3911_v19 = vpop.f32.mrf.mxu0 }
 0xc75   : > { %v3912_v8 = vadd.f32 %v3911_v19, %v3803_v30 }
 0xc7b   : > { %v4001_v16 = vpop.f32.mrf.mxu1 }
 0xc7c   : > { %v4002_v9 = vadd.f32 %v4001_v16, %v3910_v14 }
 0xc7d   : > { %v4003_v57 = vpop.f32.mrf.mxu1 }
 0xc7e   : > { %v4004_v22 = vadd.f32 %v4003_v57, %v3912_v8 }
 0xc86   : > { %v4127_v38 = vpop.f32.mrf.mxu0 }
 0xc87   : > { %v4128_v62 = vadd.f32 %v4127_v38, %v4002_v9 }
 0xc88   : > { %v4129_v32 = vpop.f32.mrf.mxu0 }
 0xc89   : > { %v4130_v0 = vadd.f32 %v4129_v32, %v4004_v22 }
 0xc8f   : > { %v4217_v60 = vpop.f32.mrf.mxu1 }
 0xc90   : > { %v4218_v4 = vadd.f32 %v4217_v60, %v4128_v62 }
 0xc91   : > { %v4219_v61 = vpop.f32.mrf.mxu1 }
 0xc92   : > { %v4220_v42 = vadd.f32 %v4219_v61, %v4130_v0  ;;  %v4236_v15 = vmul.f32 %v4218_v4, %v4218_v4  ;;  %v4224_v41 = vsel %vm4223_vm6, %v4218_v4, 0.0 }
 0xc94   : > { %v4225_v5 = vsel %vm4223_vm6, %v4220_v42, 0.0  ;;  %v4237_v53 = vmul.f32 %v4220_v42, %v4220_v42  ;;  %v4238_v28 = vsel %vm4223_vm6, %v4236_v15, 0.0 }
 0xc95   : > { %v4226_v3 = vadd.f32 %v4225_v5, %v4224_v41 }
 0xc96   : > { %v4239_v23 = vsel %vm4223_vm6, %v4237_v53, 0.0 }
 0xc97   : > { %4227 = vadd.xlane.f32.xlu1 %v4226_v3  ;;  %v4240_v18 = vadd.f32 %v4239_v23, %v4238_v28 }
 0xc99   : > { %4241 = vadd.xlane.f32.xlu0 %v4240_v18 }
 0xca8   : > { %4272 = vperm.xlu1 %4418, %v4222_v31  }
 0xcaf   : > { %4266 = vperm.xlu0 %4417, %v4222_v31  }
 0xcb3   : > { %4419 = vset.pattern.permute.xlu0 %v4461_v48 }
 0xd20   : > { %v4228_v27 = vpop.xlane.xlu1 %4227 }
 0xd21   : > { %v4229_v35 = vrot.slane %v4228_v27, 4 }
 0xd22   : > { %v4242_v24 = vpop.xlane.xlu0 %4241 }
 0xd23   : > { %v4230_v56 = vadd.f32 %v4229_v35, %v4228_v27  ;;  %v4243_v59 = vrot.slane %v4242_v24, 4 }
 0xd24   : > { %v4273_v51 = vpop.permute.xlu1 %4272 }
 0xd25   : > { %v4231_v58 = vrot.slane %v4230_v56, 2  ;;  %v4244_v11 = vadd.f32 %v4243_v59, %v4242_v24 }
 0xd27   : > { %v4245_v49 = vrot.slane %v4244_v11, 2  ;;  %v4232_v36 = vadd.f32 %v4231_v58, %v4230_v56 }
 0xd29   : > { %v4233_v12 = vrot.slane %v4232_v36, 1  ;;  %v4246_v39 = vadd.f32 %v4245_v49, %v4244_v11 }
 0xd2a   : > { %v4267_v46 = vpop.permute.xlu0 %4266 }
 0xd2b   : > { %v4234_v17 = vadd.f32 %v4233_v12, %v4232_v36  ;;  %v4247_v37 = vrot.slane %v4246_v39, 1 }
 0xd2d   : > { %4384 = vpush %v4234_v17  ;;  %v4248_v10 = vadd.f32 %v4247_v37, %v4246_v39 }
 0xd2f   : > { %4386 = vpush %v4248_v10 }
 0xd5e   : > { %s4385_s18 = spop %4384 }
 0xd5f   : > { %s4250_s19 = smul.f32 0.0009765625, %s4385_s18 }
 0xd60   : > { %s4387_s20 = spop %4386 }
 0xd61   : > { %s4252_s21 = smul.f32 %s4250_s19, %s4250_s19  ;;  %v4254_v2 = vstv %s4250_s19 }
 0xd62   : > { %s4251_s23 = smul.f32 0.0009765625, %s4387_s20  ;;  %v4255_v13 = vsub.f32 %v4218_v4, %v4254_v2  ;;  %v4256_v50 = vsub.f32 %v4220_v42, %v4254_v2 }
 0xd64   : > { %s4253_s17 = ssub.f32 %s4251_s23, %s4252_s21 }
 0xd66   : > { %s4257_s24 = sadd.f32 1e-05, %s4253_s17 }
 0xd68   : > { %v4258_v7 = vstv %s4257_s24 }
 0xd69   : > { %4438 = vrsqrt.f32 %v4258_v7 }
 0xd76   : > { %v4439_v20 = vpop.eup %4438 }
 0xd77   : > { %4388 = vpush %v4439_v20 }
 0xda8   : > { %s4389_s26 = spop %4388 }
 0xda9   : > { %v4261_v21 = vstv %s4389_s26 }
 0xdaa   : > { %v4262_v34 = vmul.f32 %v4261_v21, %v4255_v13  ;;  %v4263_v29 = vmul.f32 %v4261_v21, %v4256_v50 }
 0xdac   : > { %v4269_v45 = vmul.f32 %v4267_v46, %v4262_v34  ;;  %v4270_v26 = vmul.f32 %v4267_v46, %v4263_v29 }
 0xdae   : > { %v4275_v47 = vadd.f32 %v4273_v51, %v4269_v45  ;;  %v4276_v55 = vadd.f32 %v4273_v51, %v4270_v26 }
 0xdb0   : > { %v4279_v54 = vcombine.low %v4275_v47, %v4276_v55 }
 0xdb2   : > { %4281 = vst [vmem:[%s349_s29] sm:$0xff] %v4279_v54 }
 0xdb3 PF: > { %s19_s30 = sadd.s32 1, %s4447_s30  }
 0xdb4   : > { %p16_p4 = scmp.ge.s32.totalorder %s19_s30, 4  }
 0xdb6   :  { %18 = sbr.rel (!%p16_p4) target bundleno = 1 (0x1), region = 92 }

</bundles_post_ra>
